<compile_context>
chip_gen: v7x
topology: tpu7x:2x2x1
jax: 0.10.0
libtpu: 0.0.40
codegen_flags: <defaults>
</compile_context>

<pallas_src>
import jax
import jax.numpy as jnp
from jax.experimental import pallas as pl
from jax.experimental.pallas import tpu as pltpu


N_HIDDEN = 256  # fixed by the module


# ----------------------------- kernel -----------------------------------------

def make_trunk_kernel(n_linear: int, bf16_tanh: bool):
    """Kernel for an MLP with `n_linear` Linear layers.

    Ref order: x_ref, (w1, b1), (w2, b2), ..., (w_n, b_n), o_ref
    Layers 1..n_linear-1 are followed by tanh; the last layer is affine only.
    """
    act_dt = jnp.bfloat16 if bf16_tanh else jnp.float32

    def kernel(*refs):
        x_ref = refs[0]
        o_ref = refs[-1]
        idx = 1

        # --- layer 1: Linear(2 -> 256) + tanh ---------------------------------
        # Contraction dim is only 2: expand as two broadcast multiplies on the
        # VPU instead of a degenerate K=2 MXU matmul.  Accumulate in f32,
        # transcendental in act_dt (bf16 on bf16-EUP chips).
        w = refs[idx][...]        # (2, 256)  f32
        b = refs[idx + 1][...]    # (1, 256)  f32
        idx += 2
        x = x_ref[...]            # (tm, 2)   f32
        w0 = w[0:1, :]            # hoisted row slices
        w1 = w[1:2, :]
        pre = x[:, 0:1] * w0 + x[:, 1:2] * w1 + b
        h = jnp.tanh(pre.astype(act_dt)).astype(jnp.bfloat16)

        # --- layers 2..n_nonlinear: Linear(256 -> 256) + tanh (MXU bf16 in /
        #     f32 accumulate; tanh in act_dt) ----------------------------------
        for _ in range(n_linear - 2):
            w = refs[idx][...]        # (256, 256) bf16
            b = refs[idx + 1][...]    # (1, 256)   f32
            idx += 2
            pre = jnp.dot(h, w, preferred_element_type=jnp.float32) + b
            h = jnp.tanh(pre.astype(act_dt)).astype(jnp.bfloat16)

        # --- final layer: Linear(256 -> dout_pad), no activation --------------
        w = refs[idx][...]            # (256, dout_pad) bf16
        b = refs[idx + 1][...]        # (1, dout_pad)   f32
        out = jnp.dot(h, w, preferred_element_type=jnp.float32) + b
        o_ref[...] = out.astype(o_ref.dtype)

    return kernel


# ----------------------------- host-side helpers -------------------------------

def _round_up(a: int, b: int) -> int:
    return (a + b - 1) // b * b


def _device_kind() -> str:
    try:
        return jax.devices()[0].device_kind.lower()
    except Exception:
        return ""


def prepare_params(params):
    """One-time host-side conversion to kernel dtypes (do NOT call per forward).

    - layer-1 weight stays f32 (VPU path), hidden/final weights cast to bf16
      once (halves weight DMA bytes, MXU-native dtype),
    - biases kept f32, shaped (1, out),
    - final layer zero-padded to a lane-dense multiple of 128 columns.

    Returns (prepared_params, dout) where dout is the original output width.
    """
    dout = params[-1][0].shape[1]
    dout_pad = _round_up(dout, 128)
    n = len(params)
    prepared = []
    for li, (w, b) in enumerate(params):
        w = jnp.asarray(w, jnp.float32)
        b = jnp.asarray(b, jnp.float32).reshape(1, -1)
        if li == n - 1 and dout_pad != dout:
            w = jnp.pad(w, ((0, 0), (0, dout_pad - dout)))
            b = jnp.pad(b, ((0, 0), (0, dout_pad - dout)))
        if li > 0:
            w = w.astype(jnp.bfloat16)
        prepared.append((w, b))
    return prepared, dout


def trunk_forward(x, prepared_params, dout, *, tm=None, bf16_tanh=None):
    """Run the trunk MLP.  `prepared_params` must come from prepare_params()."""
    Nc, din = x.shape
    n_linear = len(prepared_params)
    dout_pad = prepared_params[-1][0].shape[1]

    kind = _device_kind()
    if bf16_tanh is None:
        # v5e has no bf16 EUP/VPU: keep f32 tanh there; bf16 tanh elsewhere.
        bf16_tanh = "v5" not in kind
    two_tc = "v7" in kind  # v7x: 2 TensorCores per chip

    # --- per-generation row tile / grid choice --------------------------------
    if tm is None:
        if two_tc:
            tm = 128 if Nc <= 2048 else 256
        else:
            # single TC: one big tile for small Nc (grid=(1,)), cap at 512.
            tm = min(_round_up(Nc, 8), 512)
    if two_tc:
        # even grid with >= 2 steps per core so DMAs stay pipelined.
        nc_pad = max(_round_up(Nc, 2 * tm), 4 * tm)
    else:
        nc_pad = _round_up(Nc, tm)
    if nc_pad != Nc:
        x = jnp.pad(x, ((0, nc_pad - Nc), (0, 0)))

    # --- specs ----------------------------------------------------------------
    in_specs = [pl.BlockSpec((tm, din), lambda i: (i, 0))]
    flat_params = []
    for (w, b) in prepared_params:
        # Weights/biases are small full-array blocks, constant across the grid
        # (constant index_map => fetched once, VMEM-resident).
        in_specs.append(pl.BlockSpec(w.shape, lambda i: (0, 0)))
        in_specs.append(pl.BlockSpec(b.shape, lambda i: (0, 0)))
        flat_params += [w, b]
    # TODO(synk): pipeline_mode=pl.Buffered(1) on the constant weight/bias specs
    # would halve their (already tiny, <0.5 MiB) VMEM; left default-buffered to
    # keep lowering maximally portable across Mosaic versions.

    # Advisory cost estimate so XLA schedules/overlaps this small kernel well.
    flops = 2 * nc_pad * din * N_HIDDEN
    flops += 2 * nc_pad * N_HIDDEN * N_HIDDEN * (n_linear - 2)
    flops += 2 * nc_pad * N_HIDDEN * dout_pad
    transcendentals = nc_pad * N_HIDDEN * (n_linear - 1)
    bytes_accessed = nc_pad * din * 4 + nc_pad * dout_pad * 4
    bytes_accessed += sum(int(a.size) * a.dtype.itemsize for a in flat_params)

    out = pl.pallas_call(
        make_trunk_kernel(n_linear, bf16_tanh),
        out_shape=jax.ShapeDtypeStruct((nc_pad, dout_pad), jnp.float32),
        grid_spec=pltpu.PrefetchScalarGridSpec(
            num_scalar_prefetch=0,
            grid=(nc_pad // tm,),
            in_specs=in_specs,
            out_specs=pl.BlockSpec((tm, dout_pad), lambda i: (i, 0)),
        ),
        compiler_params=pltpu.CompilerParams(
            dimension_semantics=("parallel",)),
        cost_estimate=pl.CostEstimate(
            flops=int(flops),
            transcendentals=int(transcendentals),
            bytes_accessed=int(bytes_accessed)),
    )(x, *flat_params)

    return out[:Nc, :dout]


# ----------------------------- init + references -------------------------------

def init_params(key, n_nonlinear: int, p: int):
    """Deterministic init matching nn.Linear's default U(-1/sqrt(fan_in), ...)."""
    params = []
    dims = []
    for i in range(n_nonlinear):
        dims.append((2 if i == 0 else N_HIDDEN, N_HIDDEN))
    dims.append((N_HIDDEN, 2 * p))
    for (fan_in, fan_out) in dims:
        key, kw, kb = jax.random.split(key, 3)
        bound = 1.0 / jnp.sqrt(fan_in)
        w = jax.random.uniform(kw, (fan_in, fan_out), jnp.float32, -bound, bound)
        b = jax.random.uniform(kb, (1, fan_out), jnp.float32, -bound, bound)
        params.append((w, b))
    return params


def trunk_reference(x, params):
    """Pure-JAX f32 reference of the module semantics."""
    h = x
    for (w, b) in params[:-1]:
        h = jnp.tanh(h @ w + b)
    w, b = params[-1]
    return h @ w + b


def trunk_reference_mixed(x, params, bf16_tanh):
    """Pure-JAX reference mirroring the kernel's mixed precision exactly."""
    act_dt = jnp.bfloat16 if bf16_tanh else jnp.float32
    w, b = params[0]
    pre = x[:, 0:1] * w[0:1, :] + x[:, 1:2] * w[1:2, :] + b
    h = jnp.tanh(pre.astype(act_dt)).astype(jnp.bfloat16)
    for (w, b) in params[1:-1]:
        pre = jnp.dot(h, w.astype(jnp.bfloat16),
                      preferred_element_type=jnp.float32) + b
        h = jnp.tanh(pre.astype(act_dt)).astype(jnp.bfloat16)
    w, b = params[-1]
    return jnp.dot(h, w.astype(jnp.bfloat16),
                   preferred_element_type=jnp.float32) + b


# ----------------------------- demo / self-test ---------------------------------

if __name__ == "__main__":
    n_nonlinear = 3
    p = 64            # output dim = 2*p = 128 (already lane-dense)
    Nc = 512          # trunk query points

    key = jax.random.PRNGKey(0)
    key, kx = jax.random.split(key)
    x = jax.random.uniform(kx, (Nc, 2), jnp.float32)   # coordinates in [0,1)^2

    params = init_params(key, n_nonlinear, p)
    # Hoisted, one-time host-side dtype prep (cache these across forward calls).
    prepared, dout = prepare_params(params)

    bf16_tanh = "v5" not in _device_kind()
    out = trunk_forward(x, prepared, dout, bf16_tanh=bf16_tanh)
    out = jax.block_until_ready(out)
    assert out.shape == (Nc, 2 * p), out.shape

    # Tight-ish check vs. a reference with identical mixed precision...
    ref_mixed = trunk_reference_mixed(x, params, bf16_tanh)
    err_mixed = float(jnp.max(jnp.abs(out - ref_mixed)))
    assert jnp.allclose(out, ref_mixed, rtol=3e-2, atol=3e-2), err_mixed
    # ...and a looser sanity envelope vs. pure-f32 module semantics.
    ref_f32 = trunk_reference(x, params)
    err_f32 = float(jnp.max(jnp.abs(out - ref_f32)))
    assert jnp.allclose(out, ref_f32, rtol=8e-2, atol=8e-2), err_f32

    print("KERNEL_OK")
</pallas_src>

<mosaic_0001>
module attributes {stable_mosaic.version = 11 : i64} {
  func.func @kernel(%arg0: i32, %arg1: memref<512x2xf32, #tpu.memory_space<vmem>>, %arg2: memref<2x256xf32, #tpu.memory_space<vmem>>, %arg3: memref<1x256xf32, #tpu.memory_space<vmem>>, %arg4: memref<256x256xbf16, #tpu.memory_space<vmem>>, %arg5: memref<1x256xf32, #tpu.memory_space<vmem>>, %arg6: memref<256x256xbf16, #tpu.memory_space<vmem>>, %arg7: memref<1x256xf32, #tpu.memory_space<vmem>>, %arg8: memref<256x128xbf16, #tpu.memory_space<vmem>>, %arg9: memref<1x128xf32, #tpu.memory_space<vmem>>, %arg10: memref<512x128xf32, #tpu.memory_space<vmem>>) attributes {dimension_semantics = [#tpu.dimension_semantics<parallel>], iteration_bounds = array<i64: 1>, scalar_prefetch = 0 : i64, scratch_operands = 0 : i64, tpu.core_type = #tpu.core_type<tc>, window_params = [{transform_indices = @transform_0, window_bounds = array<i64: 512, 2>}, {pipeline_mode = #tpu.pipeline_mode<synchronous>, transform_indices = @transform_1, window_bounds = array<i64: 2, 256>}, {pipeline_mode = #tpu.pipeline_mode<synchronous>, transform_indices = @transform_2, window_bounds = array<i64: 1, 256>}, {pipeline_mode = #tpu.pipeline_mode<synchronous>, transform_indices = @transform_3, window_bounds = array<i64: 256, 256>}, {pipeline_mode = #tpu.pipeline_mode<synchronous>, transform_indices = @transform_4, window_bounds = array<i64: 1, 256>}, {pipeline_mode = #tpu.pipeline_mode<synchronous>, transform_indices = @transform_5, window_bounds = array<i64: 256, 256>}, {pipeline_mode = #tpu.pipeline_mode<synchronous>, transform_indices = @transform_6, window_bounds = array<i64: 1, 256>}, {pipeline_mode = #tpu.pipeline_mode<synchronous>, transform_indices = @transform_7, window_bounds = array<i64: 256, 128>}, {pipeline_mode = #tpu.pipeline_mode<synchronous>, transform_indices = @transform_8, window_bounds = array<i64: 1, 128>}, {transform_indices = @transform_9, window_bounds = array<i64: 512, 128>}]} {
    %c0 = arith.constant 0 : index
    %c0_0 = arith.constant 0 : index
    %0 = vector.load %arg2[%c0, %c0_0] : memref<2x256xf32, #tpu.memory_space<vmem>>, vector<2x256xf32>
    %c0_1 = arith.constant 0 : index
    %c0_2 = arith.constant 0 : index
    %1 = vector.load %arg3[%c0_1, %c0_2] : memref<1x256xf32, #tpu.memory_space<vmem>>, vector<1x256xf32>
    %c0_3 = arith.constant 0 : index
    %c0_4 = arith.constant 0 : index
    %2 = vector.load %arg1[%c0_3, %c0_4] : memref<512x2xf32, #tpu.memory_space<vmem>>, vector<512x2xf32>
    %3 = vector.extract_strided_slice %0 {offsets = [0, 0], sizes = [1, 256], strides = [1, 1]} : vector<2x256xf32> to vector<1x256xf32>
    %4 = vector.extract_strided_slice %0 {offsets = [1, 0], sizes = [1, 256], strides = [1, 1]} : vector<2x256xf32> to vector<1x256xf32>
    %5 = vector.extract_strided_slice %2 {offsets = [0, 0], sizes = [512, 1], strides = [1, 1]} : vector<512x2xf32> to vector<512x1xf32>
    %6 = vector.broadcast %5 : vector<512x1xf32> to vector<512x256xf32>
    %7 = vector.broadcast %3 : vector<1x256xf32> to vector<512x256xf32>
    %8 = arith.mulf %6, %7 : vector<512x256xf32>
    %9 = vector.extract_strided_slice %2 {offsets = [0, 1], sizes = [512, 1], strides = [1, 1]} : vector<512x2xf32> to vector<512x1xf32>
    %10 = vector.broadcast %9 : vector<512x1xf32> to vector<512x256xf32>
    %11 = vector.broadcast %4 : vector<1x256xf32> to vector<512x256xf32>
    %12 = arith.mulf %10, %11 : vector<512x256xf32>
    %13 = arith.addf %8, %12 : vector<512x256xf32>
    %14 = vector.broadcast %1 : vector<1x256xf32> to vector<512x256xf32>
    %15 = arith.addf %13, %14 : vector<512x256xf32>
    %16 = arith.truncf %15 : vector<512x256xf32> to vector<512x256xbf16>
    %17 = math.tanh %16 : vector<512x256xbf16>
    %c0_5 = arith.constant 0 : index
    %c0_6 = arith.constant 0 : index
    %18 = vector.load %arg4[%c0_5, %c0_6] : memref<256x256xbf16, #tpu.memory_space<vmem>>, vector<256x256xbf16>
    %c0_7 = arith.constant 0 : index
    %c0_8 = arith.constant 0 : index
    %19 = vector.load %arg5[%c0_7, %c0_8] : memref<1x256xf32, #tpu.memory_space<vmem>>, vector<1x256xf32>
    %cst = arith.constant dense<0.000000e+00> : vector<512x256xf32>
    %20 = tpu.matmul %17, %18, %cst {dimension_numbers = #tpu.dot_dimension_numbers<[1], [0], [0], [1], [0, 0, 1, 1], [], []>} : vector<512x256xbf16>, vector<256x256xbf16>, vector<512x256xf32> -> vector<512x256xf32>
    %21 = vector.broadcast %19 : vector<1x256xf32> to vector<512x256xf32>
    %22 = arith.addf %20, %21 : vector<512x256xf32>
    %23 = arith.truncf %22 : vector<512x256xf32> to vector<512x256xbf16>
    %24 = math.tanh %23 : vector<512x256xbf16>
    %c0_9 = arith.constant 0 : index
    %c0_10 = arith.constant 0 : index
    %25 = vector.load %arg6[%c0_9, %c0_10] : memref<256x256xbf16, #tpu.memory_space<vmem>>, vector<256x256xbf16>
    %c0_11 = arith.constant 0 : index
    %c0_12 = arith.constant 0 : index
    %26 = vector.load %arg7[%c0_11, %c0_12] : memref<1x256xf32, #tpu.memory_space<vmem>>, vector<1x256xf32>
    %cst_13 = arith.constant dense<0.000000e+00> : vector<512x256xf32>
    %27 = tpu.matmul %24, %25, %cst_13 {dimension_numbers = #tpu.dot_dimension_numbers<[1], [0], [0], [1], [0, 0, 1, 1], [], []>} : vector<512x256xbf16>, vector<256x256xbf16>, vector<512x256xf32> -> vector<512x256xf32>
    %28 = vector.broadcast %26 : vector<1x256xf32> to vector<512x256xf32>
    %29 = arith.addf %27, %28 : vector<512x256xf32>
    %30 = arith.truncf %29 : vector<512x256xf32> to vector<512x256xbf16>
    %31 = math.tanh %30 : vector<512x256xbf16>
    %c0_14 = arith.constant 0 : index
    %c0_15 = arith.constant 0 : index
    %32 = vector.load %arg8[%c0_14, %c0_15] : memref<256x128xbf16, #tpu.memory_space<vmem>>, vector<256x128xbf16>
    %c0_16 = arith.constant 0 : index
    %c0_17 = arith.constant 0 : index
    %33 = vector.load %arg9[%c0_16, %c0_17] : memref<1x128xf32, #tpu.memory_space<vmem>>, vector<1x128xf32>
    %cst_18 = arith.constant dense<0.000000e+00> : vector<512x128xf32>
    %34 = tpu.matmul %31, %32, %cst_18 {dimension_numbers = #tpu.dot_dimension_numbers<[1], [0], [0], [1], [0, 0, 1, 1], [], []>} : vector<512x256xbf16>, vector<256x128xbf16>, vector<512x128xf32> -> vector<512x128xf32>
    %35 = vector.broadcast %33 : vector<1x128xf32> to vector<512x128xf32>
    %36 = arith.addf %34, %35 : vector<512x128xf32>
    %c0_19 = arith.constant 0 : index
    %c0_20 = arith.constant 0 : index
    %37 = vector.load %arg10[%c0_19, %c0_20] : memref<512x128xf32, #tpu.memory_space<vmem>>, vector<512x128xf32>
    tpu.vector_store %arg10[%c0_19, %c0_20], %36 {strides = array<i32>} : memref<512x128xf32, #tpu.memory_space<vmem>>, vector<512x128xf32>,
    return
  }
  func.func @transform_0(%arg0: i32) -> (i32, i32) {
    %c0_i32 = arith.constant 0 : i32
    %c0_i32_0 = arith.constant 0 : i32
    return %arg0, %c0_i32 : i32, i32
  }
  func.func @transform_1(%arg0: i32) -> (i32, i32) {
    %c0_i32 = arith.constant 0 : i32
    %c0_i32_0 = arith.constant 0 : i32
    %c0_i32_1 = arith.constant 0 : i32
    return %c0_i32, %c0_i32_0 : i32, i32
  }
  func.func @transform_2(%arg0: i32) -> (i32, i32) {
    %c0_i32 = arith.constant 0 : i32
    %c0_i32_0 = arith.constant 0 : i32
    %c0_i32_1 = arith.constant 0 : i32
    return %c0_i32, %c0_i32_0 : i32, i32
  }
  func.func @transform_3(%arg0: i32) -> (i32, i32) {
    %c0_i32 = arith.constant 0 : i32
    %c0_i32_0 = arith.constant 0 : i32
    %c0_i32_1 = arith.constant 0 : i32
    return %c0_i32, %c0_i32_0 : i32, i32
  }
  func.func @transform_4(%arg0: i32) -> (i32, i32) {
    %c0_i32 = arith.constant 0 : i32
    %c0_i32_0 = arith.constant 0 : i32
    %c0_i32_1 = arith.constant 0 : i32
    return %c0_i32, %c0_i32_0 : i32, i32
  }
  func.func @transform_5(%arg0: i32) -> (i32, i32) {
    %c0_i32 = arith.constant 0 : i32
    %c0_i32_0 = arith.constant 0 : i32
    %c0_i32_1 = arith.constant 0 : i32
    return %c0_i32, %c0_i32_0 : i32, i32
  }
  func.func @transform_6(%arg0: i32) -> (i32, i32) {
    %c0_i32 = arith.constant 0 : i32
    %c0_i32_0 = arith.constant 0 : i32
    %c0_i32_1 = arith.constant 0 : i32
    return %c0_i32, %c0_i32_0 : i32, i32
  }
  func.func @transform_7(%arg0: i32) -> (i32, i32) {
    %c0_i32 = arith.constant 0 : i32
    %c0_i32_0 = arith.constant 0 : i32
    %c0_i32_1 = arith.constant 0 : i32
    return %c0_i32, %c0_i32_0 : i32, i32
  }
  func.func @transform_8(%arg0: i32) -> (i32, i32) {
    %c0_i32 = arith.constant 0 : i32
    %c0_i32_0 = arith.constant 0 : i32
    %c0_i32_1 = arith.constant 0 : i32
    return %c0_i32, %c0_i32_0 : i32, i32
  }
  func.func @transform_9(%arg0: i32) -> (i32, i32) {
    %c0_i32 = arith.constant 0 : i32
    %c0_i32_0 = arith.constant 0 : i32
    return %arg0, %c0_i32 : i32, i32
  }
}

</mosaic_0001>

<bundles_post_ra>
// kernel: tpu_custom_call.1
= control target key start
LH: loop header
LB: loop body
LE: loop exit
PB: predicated region body
PF: predicated region fallthrough
CT: control target
= control target key end

     0   :  { %14 = vsyncpa [#allocation3], 0  ;;  %s5946_s0 = inlined_call_operand.vmem [shape: f32[512,2], index: 0, kind: input, shape index: {}]   ;;  %s5947_s1 = inlined_call_operand.vmem [shape: f32[2,256], index: 1, kind: input, shape index: {}]   ;;  %s5948_s2 = inlined_call_operand.vmem [shape: f32[1,256], index: 2, kind: input, shape index: {}]   ;;  %s5949_s3 = inlined_call_operand.vmem [shape: bf16[256,256], index: 3, kind: input, shape index: {}]   ;;  %s5950_s4 = inlined_call_operand.vmem [shape: f32[1,256], index: 4, kind: input, shape index: {}]   ;;  %s5951_s5 = inlined_call_operand.vmem [shape: bf16[256,256], index: 5, kind: input, shape index: {}]   ;;  %s5952_s6 = inlined_call_operand.vmem [shape: f32[1,256], index: 6, kind: input, shape index: {}]   ;;  %s5953_s7 = inlined_call_operand.hbm [shape: bf16[256,128], index: 7, kind: input, shape index: {}]   ;;  %s5954_s8 = inlined_call_operand.vmem [shape: f32[1,128], index: 8, kind: input, shape index: {}]   ;;  %s5955_s9 = inlined_call_operand.hbm [shape: f32[512,128], index: 9, kind: output, shape index: {}]  }
   0x1   :  { %15 = vsyncpa [#allocation4], 0  ;;  %s3989_s30 = smov [#allocation2]   ;;  %s3941_s13 = scalar_lea.hbm %s5953_s7, 2048 }
   0x2   :  { %s35_s10 = sshll.u32 %s3989_s30, 4  ;;  %p3942_p0 = scmp.ne.s32.totalorder %s5953_s7, %s3941_s13  ;;  %s36_s10 = int_to_ptr.vmem [resolvable:$true] %s35_s10 }
   0x3   :  { %p3945_p1 = scmp.lt.u32.totalorder %s3941_s13, %s5953_s7 }
   0x5   :  { %p3947_p2 = pnand %p3945_p1, %p3942_p0 }
   0x7   :  { %3950 = shalt.err (!%p3947_p2)
}
   0x8   :  { %s3951_s18 = scalar_lea.vmem %s36_s10, 2048  ;;  %p3956_p4 = scmp.lt.s32.totalorder %s36_s10, %s36_s10 }
   0x9   :  { %p3952_p3 = scmp.ne.s32.totalorder %s36_s10, %s3951_s18  ;;  %p3957_p5 = scmp.lt.s32.totalorder %s3951_s18, %s3951_s18 }
   0xb   :  { %p3958_p6 = por %p3957_p5, %p3956_p4 }
   0xd   :  { %p3959_p7 = pnand %p3958_p6, %p3952_p3 }
   0xf   :  { %3962 = shalt.err (!%p3959_p7)
}
  0x10   :  { %s3990_s19 = smov 64   ;;  %s3991_s20 = smov 4  }
  0x11   :  { %41 = dma.hbm_to_vmem [thread:$0]  %s5953_s7, 2048, %s36_s10, [#allocation3], %s3990_s19, %s3990_s19, %s3991_s20  }
  0x12   :  { %3985 = dma.done.wait [#allocation3], 2048  }
  0x13   :  { %3986 = vsyncadd [#allocation3], 4294965248  ;;  %v3992_v0 = vmov 1   ;;  %v5956_v1 = vmov 0   ;;  %v50_v2 = vld [vmem:[%s5946_s0] sm:$0xff]  ;;  %v51_v3 = vld [vmem:[%s5946_s0 + $0x8] sm:$0xff]  ;;  %v435_v63 = vlaneseq }
  0x14   :  { %3375 = vset.pattern.permute.xlu1 %v3992_v0  ;;  %3374 = vset.pattern.permute.xlu0 %v5956_v1  ;;  %v52_v4 = vld [vmem:[%s5946_s0 + $0x10] sm:$0xff]  ;;  %v3445_v5 = vld [vmem:[%s5949_s3 + $0x4] ss:$8 sps:$4 sm:$0xff]   ;;  %v3447_v6 = vld [vmem:[%s5949_s3] ss:$8 sps:$4 sm:$0xff]  }
  0x15   :  { %582 = vperm.xlu1 %3375, %v50_v2   ;;  %116 = vperm.xlu0 %3374, %v50_v2   ;;  %v53_v7 = vld [vmem:[%s5946_s0 + $0x18] sm:$0xff]  ;;  %v55_v9 = vld [vmem:[%s5946_s0 + $0x28] sm:$0xff]  ;;  %v56_v12 = vld [vmem:[%s5946_s0 + $0x30] sm:$0xff] }
  0x16   :  { %1582 = vmatprep.subr.bf16.mxu0 %v3445_v5  ;;  %v3448_v8 = vld [vmem:[%s5949_s3 + $0x14] ss:$8 sps:$4 sm:$0xff]   ;;  %3334 = vmatprep.subr.bf16.mxu1 %v3445_v5  ;;  %v3450_v10 = vld [vmem:[%s5949_s3 + $0x10] ss:$8 sps:$4 sm:$0xff]   ;;  %v3451_v11 = vld [vmem:[%s5949_s3 + $0x24] ss:$8 sps:$4 sm:$0xff]  }
  0x17   :  { %1583 = vmatpush1.bf16.msra.mxu0 %v3447_v6  ;;  %3350 = vmatpush1.bf16.msra.mxu1 %v3447_v6  ;;  %v3453_v13 = vld [vmem:[%s5949_s3 + $0x20] ss:$8 sps:$4 sm:$0xff]   ;;  %v3454_v14 = vld [vmem:[%s5949_s3 + $0x34] ss:$8 sps:$4 sm:$0xff]   ;;  %v3456_v16 = vld [vmem:[%s5949_s3 + $0x30] ss:$8 sps:$4 sm:$0xff]  }
  0x18   :  { %1584 = vmatprep.subr.bf16.mxu0 %v3448_v8  ;;  %3335 = vmatprep.subr.bf16.mxu1 %v3448_v8  ;;  %v54_v15 = vld [vmem:[%s5946_s0 + $0x20] sm:$0xff]  ;;  %v3460_v19 = vld [vmem:[%s5949_s3 + $0x54] ss:$8 sps:$4 sm:$0xff]   ;;  %v3462_v21 = vld [vmem:[%s5949_s3 + $0x50] ss:$8 sps:$4 sm:$0xff]  }
  0x19   :  { %586 = vperm.xlu1 %3375, %v51_v3   ;;  %121 = vperm.xlu0 %3374, %v51_v3   ;;  %v3457_v17 = vld [vmem:[%s5949_s3 + $0x44] ss:$8 sps:$4 sm:$0xff]   ;;  %v3459_v18 = vld [vmem:[%s5949_s3 + $0x40] ss:$8 sps:$4 sm:$0xff]   ;;  %v60_v20 = vld [vmem:[%s5946_s0 + $0x50] sm:$0xff] }
  0x1a   :  { %v3463_v22 = vld [vmem:[%s5949_s3 + $0x64] ss:$8 sps:$4 sm:$0xff]   ;;  %v57_v23 = vld [vmem:[%s5946_s0 + $0x38] sm:$0xff]  ;;  %v64_v24 = vld [vmem:[%s5946_s0 + $0x70] sm:$0xff] }
  0x1b   :  { %1585 = vmatpush1.bf16.msra.mxu0 %v3450_v10  ;;  %3351 = vmatpush1.bf16.msra.mxu1 %v3450_v10  ;;  %v3465_v25 = vld [vmem:[%s5949_s3 + $0x60] ss:$8 sps:$4 sm:$0xff]   ;;  %v3466_v26 = vld [vmem:[%s5949_s3 + $0x74] ss:$8 sps:$4 sm:$0xff]   ;;  %v3468_v28 = vld [vmem:[%s5949_s3 + $0x70] ss:$8 sps:$4 sm:$0xff]  }
  0x1c   :  { %1586 = vmatprep.subr.bf16.mxu0 %v3451_v11  ;;  %3336 = vmatprep.subr.bf16.mxu1 %v3451_v11  ;;  %v4145_v27 = vld [vmem:[%s5946_s0 + $0x90] sm:$0xff]  ;;  %v3469_v29 = vld [vmem:[%s5949_s3 + $0x84] ss:$8 sps:$4 sm:$0xff]   ;;  %v3471_v31 = vld [vmem:[%s5949_s3 + $0x80] ss:$8 sps:$4 sm:$0xff]  }
  0x1d   :  { %3376 = vset.pattern.permute.xlu1 %v5956_v1  ;;  %126 = vperm.xlu0 %3374, %v52_v4   ;;  %v59_v30 = vld [vmem:[%s5946_s0 + $0x48] sm:$0xff]  ;;  %v58_v32 = vld [vmem:[%s5946_s0 + $0x40] sm:$0xff]  ;;  %v3472_v33 = vld [vmem:[%s5949_s3 + $0x94] ss:$8 sps:$4 sm:$0xff]  }
  0x1e   :  { %131 = vperm.xlu1 %3376, %v53_v7   ;;  %v3474_v34 = vld [vmem:[%s5949_s3 + $0x90] ss:$8 sps:$4 sm:$0xff]   ;;  %v3475_v35 = vld [vmem:[%s5949_s3 + $0xa4] ss:$8 sps:$4 sm:$0xff]   ;;  %v3477_v37 = vld [vmem:[%s5949_s3 + $0xa0] ss:$8 sps:$4 sm:$0xff]  }
  0x1f   :  { %1587 = vmatpush1.bf16.msra.mxu0 %v3453_v13  ;;  %3352 = vmatpush1.bf16.msra.mxu1 %v3453_v13  ;;  %v4178_v36 = vld [vmem:[%s5946_s0 + $0x68] sm:$0xff]  ;;  %v3478_v38 = vld [vmem:[%s5949_s3 + $0xb4] ss:$8 sps:$4 sm:$0xff]   ;;  %v3480_v39 = vld [vmem:[%s5949_s3 + $0xb0] ss:$8 sps:$4 sm:$0xff]  }
  0x20   :  { %1588 = vmatprep.subr.bf16.mxu0 %v3454_v14  ;;  %3337 = vmatprep.subr.bf16.mxu1 %v3454_v14  ;;  %v3481_v40 = vld [vmem:[%s5949_s3 + $0xc4] ss:$8 sps:$4 sm:$0xff]   ;;  %v61_v41 = vld [vmem:[%s5946_s0 + $0x58] sm:$0xff]  ;;  %v3483_v43 = vld [vmem:[%s5949_s3 + $0xc0] ss:$8 sps:$4 sm:$0xff]  }
  0x21   :  { %141 = vperm.xlu0 %3374, %v55_v9   ;;  %v4200_v42 = vld [vmem:[%s5946_s0 + $0x88] sm:$0xff]  ;;  %v3484_v44 = vld [vmem:[%s5949_s3 + $0xd4] ss:$8 sps:$4 sm:$0xff]   ;;  %v3486_v45 = vld [vmem:[%s5949_s3 + $0xd0] ss:$8 sps:$4 sm:$0xff]  }
  0x22   :  { %3377 = vset.pattern.permute.xlu1 %v3992_v0  ;;  %v3487_v46 = vld [vmem:[%s5949_s3 + $0xe4] ss:$8 sps:$4 sm:$0xff]   ;;  %v3489_v48 = vld [vmem:[%s5949_s3 + $0xe0] ss:$8 sps:$4 sm:$0xff]   ;;  %v3490_v50 = vld [vmem:[%s5949_s3 + $0xf4] ss:$8 sps:$4 sm:$0xff]  }
  0x23   :  { %594 = vperm.xlu1 %3377, %v53_v7   ;;  %1589 = vmatpush1.bf16.msra.mxu0 %v3456_v16  ;;  %v4221_v47 = vld [vmem:[%s5946_s0 + $0xa8] sm:$0xff]  ;;  %v62_v49 = vld [vmem:[%s5946_s0 + $0x60] sm:$0xff]  ;;  %v72_v51 = vld [vmem:[%s5946_s0 + $0xb0] sm:$0xff] }
  0x24   :  { %1590 = vmatprep.subr.bf16.mxu0 %v3457_v17  ;;  %3353 = vmatpush1.bf16.msra.mxu1 %v3456_v16  ;;  %v3492_v52 = vld [vmem:[%s5949_s3 + $0xf0] ss:$8 sps:$4 sm:$0xff]   ;;  %v4244_v53 = vld [vmem:[%s5946_s0 + $0xc8] sm:$0xff]  ;;  %v4258_v56 = vld [vmem:[%s5946_s0 + $0x100] sm:$0xff] }
  0x25   :  { %146 = vperm.xlu0 %3374, %v56_v12   ;;  %3338 = vmatprep.subr.bf16.mxu1 %v3457_v17  ;;  %v76_v54 = vld [vmem:[%s5946_s0 + $0xd0] sm:$0xff]  ;;  %v65_v55 = vld [vmem:[%s5946_s0 + $0x78] sm:$0xff]  ;;  %v66_v57 = vld [vmem:[%s5946_s0 + $0x80] sm:$0xff] }
  0x26   :  { %v4271_v58 = vld [vmem:[%s5946_s0 + $0x108] sm:$0xff]  ;;  %v4278_v59 = vld [vmem:[%s5946_s0 + $0xe0] sm:$0xff]  ;;  %v4285_v60 = vld [vmem:[%s5946_s0 + $0x118] sm:$0xff] }
  0x27   :  { %3378 = vset.pattern.permute.xlu1 %v5956_v1  ;;  %1591 = vmatpush1.bf16.msra.mxu0 %v3459_v18  ;;  %v69_v61 = vld [vmem:[%s5946_s0 + $0x98] sm:$0xff]  ;;  %v4295_v62 = vld [vmem:[%s5946_s0 + $0xf0] sm:$0xff]  ;;  %v4301_v2 = vld [vmem:[%s5946_s0 + $0x128] sm:$0xff] }
  0x28   :  { %136 = vperm.xlu1 %3378, %v54_v15   ;;  %1592 = vmatprep.subr.bf16.mxu0 %v3460_v19  ;;  %v70_v3 = vld [vmem:[%s5946_s0 + $0xa0] sm:$0xff]  ;;  %v4311_v5 = vld [vmem:[%s5946_s0 + $0xe8] sm:$0xff]  ;;  %v4326_v11 = vld [vmem:[%s5946_s0 + $0xf8] sm:$0xff] }
  0x29   :  { %3380 = vset.pattern.permute.xlu0 %v3992_v0  ;;  %3354 = vmatpush1.bf16.msra.mxu1 %v3459_v18  ;;  %v4335_v16 = vld [vmem:[%s5946_s0 + $0x138] sm:$0xff] }
  0x2a   :  { %590 = vperm.xlu0 %3380, %v52_v4   ;;  %3339 = vmatprep.subr.bf16.mxu1 %v3460_v19  ;;  %v436_v4 = vshrl.u32 %v435_v63, 7 }
  0x2b   :  { %1593 = vmatpush1.bf16.msra.mxu0 %v3462_v21 }
  0x2c   :  { %3379 = vset.pattern.permute.xlu1 %v3992_v0  ;;  %1594 = vmatprep.subr.bf16.mxu0 %v3463_v22  ;;  %v4315_v6 = vsub.s32 1, %v436_v4  ;;  %v4317_v7 = vsub.s32 0, %v436_v4  ;;  %v843_v8 = vsub.s32 3, %v436_v4  ;;  %v441_v10 = vsub.s32 2, %v436_v4 }
  0x2d   :  { %598 = vperm.xlu1 %3379, %v54_v15   ;;  %3355 = vmatpush1.bf16.msra.mxu1 %v3462_v21  ;;  %v73_v21 = vld [vmem:[%s5946_s0 + $0xb8] sm:$0xff] }
  0x2e   :  { %606 = vperm.xlu0 %3380, %v56_v12   ;;  %3340 = vmatprep.subr.bf16.mxu1 %v3463_v22  ;;  %5967 = vst [vmem:[#allocation8_spill] sm:$0xff] %v4315_v6  ;;  %5968 = vst [vmem:[#allocation9_spill] sm:$0xff] %v4317_v7  ;;  %v90_v22 = vld [vmem:[%s5946_s0 + $0x140] sm:$0xff] }
  0x2f   :  { %1595 = vmatpush1.bf16.msra.mxu0 %v3465_v25 }
  0x30   :  { %1596 = vmatprep.subr.bf16.mxu0 %v3466_v26 }
  0x31   :  { %602 = vperm.xlu1 %3379, %v55_v9   ;;  %3356 = vmatpush1.bf16.msra.mxu1 %v3465_v25  ;;  %v48_v9 = vld [vmem:[%s5947_s1] sm:$0xf] }
  0x32   :  { %622 = vperm.xlu0 %3380, %v60_v20   ;;  %3341 = vmatprep.subr.bf16.mxu1 %v3466_v26  ;;  %v840_v12 = vrot.slane %v48_v9, %v4315_v6  ;;  %v438_v13 = vrot.slane %v48_v9, %v4317_v7  ;;  %v844_v14 = vrot.slane %v48_v9, %v843_v8  ;;  %v49_v26 = vld [vmem:[%s5948_s2] sm:$0x3] }
  0x33   :  { %1597 = vmatpush1.bf16.msra.mxu0 %v3468_v28  ;;  %v442_v15 = vrot.slane %v48_v9, %v441_v10 }
  0x34   :  { %1598 = vmatprep.subr.bf16.mxu0 %v3469_v29  ;;  %v4339_v17 = vrot.slane %v840_v12, %v4315_v6  ;;  %v4342_v18 = vrot.slane %v438_v13, %v4317_v7  ;;  %v4346_v19 = vrot.slane %v844_v14, %v4315_v6 }
  0x35   :  { %3381 = vset.pattern.permute.xlu1 %v5956_v1  ;;  %3357 = vmatpush1.bf16.msra.mxu1 %v3468_v28 }
  0x36   :  { %151 = vperm.xlu1 %3381, %v57_v23   ;;  %638 = vperm.xlu0 %3380, %v64_v24  }
  0x37   :  { %3342 = vmatprep.subr.bf16.mxu1 %v3469_v29  ;;  %1599 = vmatpush1.bf16.msra.mxu0 %v3471_v31 }
  0x38   :  { %1600 = vmatprep.subr.bf16.mxu0 %v3472_v33 }
  0x39   :  { %3358 = vmatpush1.bf16.msra.mxu1 %v3471_v31 }
  0x3a   :  { %3382 = vset.pattern.permute.xlu1 %v3992_v0  ;;  %654 = vperm.xlu0 %3380, %v4145_v27  }
  0x3b   :  { %610 = vperm.xlu1 %3382, %v57_v23   ;;  %3343 = vmatprep.subr.bf16.mxu1 %v3472_v33 }
  0x3c   :  { %1601 = vmatpush1.bf16.msra.mxu0 %v3474_v34 }
  0x3d   :  { %1602 = vmatprep.subr.bf16.mxu0 %v3475_v35  ;;  %3359 = vmatpush1.bf16.msra.mxu1 %v3474_v34 }
  0x3e   :  { %3394 = vset.pattern.permute.xlu0 %v5956_v1  ;;  %3344 = vmatprep.subr.bf16.mxu1 %v3475_v35 }
  0x3f   :  { %3383 = vset.pattern.permute.xlu1 %v5956_v1  ;;  %161 = vperm.xlu0 %3394, %v59_v30  }
  0x40   :  { %156 = vperm.xlu1 %3383, %v58_v32   ;;  %1603 = vmatpush1.bf16.msra.mxu0 %v3477_v37 }
  0x41   :  { %1604 = vmatprep.subr.bf16.mxu0 %v3478_v38  ;;  %3360 = vmatpush1.bf16.msra.mxu1 %v3477_v37 }
  0x42   :  { %3345 = vmatprep.subr.bf16.mxu1 %v3478_v38 }
  0x43   :  { %166 = vperm.xlu0 %3394, %v60_v20   ;;  %v4349_v20 = vrot.slane %v442_v15, %v4317_v7  ;;  %v4406_v15 = vld [vmem:[%s5946_s0 + $0x178] sm:$0xff] }
  0x44   :  { %3384 = vset.pattern.permute.xlu1 %v3992_v0  ;;  %1605 = vmatpush1.bf16.msra.mxu0 %v3480_v39 }
  0x45   :  { %614 = vperm.xlu1 %3384, %v58_v32   ;;  %1606 = vmatprep.subr.bf16.mxu0 %v3481_v40 }
  0x46   :  { %3361 = vmatpush1.bf16.msra.mxu1 %v3480_v39  ;;  %v4374_v39 = vrot.slane %v49_v26, %v4315_v6 }
  0x47   :  { %181 = vperm.xlu0 %3394, %v4178_v36   ;;  %3346 = vmatprep.subr.bf16.mxu1 %v3481_v40 }
  0x48   :  { %1607 = vmatpush1.bf16.msra.mxu0 %v3483_v43 }
  0x49   :  { %618 = vperm.xlu1 %3384, %v59_v30   ;;  %1608 = vmatprep.subr.bf16.mxu0 %v3484_v44  ;;  %v4366_v30 = vrot.slane %v49_v26, %v4317_v7 }
  0x4a   :  { %3362 = vmatpush1.bf16.msra.mxu1 %v3483_v43  ;;  %v94_v43 = vld [vmem:[%s5946_s0 + $0x160] sm:$0xff] }
  0x4b   :  { %186 = vperm.xlu0 %3394, %v64_v24   ;;  %3347 = vmatprep.subr.bf16.mxu1 %v3484_v44 }
  0x4c   :  { %1609 = vmatpush1.bf16.msra.mxu0 %v3486_v45 }
  0x4d   :  { %3385 = vset.pattern.permute.xlu1 %v5956_v1  ;;  %1610 = vmatprep.subr.bf16.mxu0 %v3487_v46 }
  0x4e   :  { %171 = vperm.xlu1 %3385, %v61_v41   ;;  %3363 = vmatpush1.bf16.msra.mxu1 %v3486_v45 }
  0x4f   :  { %201 = vperm.xlu0 %3394, %v4200_v42   ;;  %3348 = vmatprep.subr.bf16.mxu1 %v3487_v46 }
  0x50   :  { %1611 = vmatpush1.bf16.msra.mxu0 %v3489_v48 }
  0x51   :  { %1612 = vmatprep.subr.bf16.mxu0 %v3490_v50 }
  0x52   :  { %3386 = vset.pattern.permute.xlu1 %v3992_v0  ;;  %3364 = vmatpush1.bf16.msra.mxu1 %v3489_v48 }
  0x53   :  { %626 = vperm.xlu1 %3386, %v61_v41   ;;  %206 = vperm.xlu0 %3394, %v4145_v27  }
  0x54   :  { %3349 = vmatprep.subr.bf16.mxu1 %v3490_v50  ;;  %1613 = vmatpush1.bf16.msra.mxu0 %v3492_v52 }
  0x55   :  { %2883 = vmatprep.subr.bf16.mxu0 %v5956_v1 }
  0x56   :  { %3365 = vmatpush1.bf16.msra.mxu1 %v3492_v52 }
  0x57   :  { %3387 = vset.pattern.permute.xlu1 %v5956_v1  ;;  %221 = vperm.xlu0 %3394, %v4221_v47  }
  0x58   :  { %176 = vperm.xlu1 %3387, %v62_v49  }
  0x5b   :  { %226 = vperm.xlu0 %3394, %v72_v51  }
  0x5c   :  { %3388 = vset.pattern.permute.xlu1 %v3992_v0 }
  0x5d   :  { %630 = vperm.xlu1 %3388, %v62_v49  }
  0x5f   :  { %241 = vperm.xlu0 %3394, %v4244_v53  }
  0x61   :  { %634 = vperm.xlu1 %3388, %v4178_v36  }
  0x63   :  { %246 = vperm.xlu0 %3394, %v76_v54  }
  0x65   :  { %3389 = vset.pattern.permute.xlu1 %v5956_v1 }
  0x66   :  { %191 = vperm.xlu1 %3389, %v65_v55  }
  0x67   :  { %276 = vperm.xlu0 %3394, %v4258_v56  }
  0x6a   :  { %3390 = vset.pattern.permute.xlu1 %v3992_v0 }
  0x6b   :  { %642 = vperm.xlu1 %3390, %v65_v55   ;;  %3403 = vset.pattern.permute.xlu0 %v3992_v0 }
  0x6c   :  { %670 = vperm.xlu0 %3403, %v72_v51  }
  0x6f   :  { %3391 = vset.pattern.permute.xlu1 %v5956_v1 }
  0x70   :  { %196 = vperm.xlu1 %3391, %v66_v57   ;;  %686 = vperm.xlu0 %3403, %v76_v54   ;;  %v4391_v54 = vld [vmem:[%s5946_s0 + $0x158] sm:$0xff] }
  0x74   :  { %3392 = vset.pattern.permute.xlu1 %v3992_v0  ;;  %714 = vperm.xlu0 %3403, %v4271_v58  }
  0x75   :  { %646 = vperm.xlu1 %3392, %v66_v57  }
  0x78   :  { %694 = vperm.xlu0 %3403, %v4278_v59  }
  0x79   :  { %650 = vperm.xlu1 %3392, %v4200_v42  }
  0x7c   :  { %722 = vperm.xlu0 %3403, %v4285_v60  }
  0x7d   :  { %3393 = vset.pattern.permute.xlu1 %v5956_v1 }
  0x7e   :  { %211 = vperm.xlu1 %3393, %v69_v61  }
  0x80   :  { %702 = vperm.xlu0 %3403, %v4295_v62  }
  0x82   :  { %3395 = vset.pattern.permute.xlu1 %v3992_v0 }
  0x83   :  { %658 = vperm.xlu1 %3395, %v69_v61  }
  0x84   :  { %730 = vperm.xlu0 %3403, %v4301_v2  }
  0x87   :  { %3396 = vset.pattern.permute.xlu1 %v5956_v1 }
  0x88   :  { %216 = vperm.xlu1 %3396, %v70_v3   ;;  %3409 = vset.pattern.permute.xlu0 %v5956_v1 }
  0x89   :  { %261 = vperm.xlu0 %3409, %v4311_v5  }
  0x8c   :  { %3397 = vset.pattern.permute.xlu1 %v3992_v0 }
  0x8d   :  { %662 = vperm.xlu1 %3397, %v70_v3   ;;  %271 = vperm.xlu0 %3409, %v4326_v11  }
  0x91   :  { %666 = vperm.xlu1 %3397, %v4221_v47   ;;  %311 = vperm.xlu0 %3409, %v4335_v16   ;;  %v74_v47 = vld [vmem:[%s5946_s0 + $0xc0] sm:$0xff] }
  0x94   :  { %v583_v23 = vpop.permute.xlu1 %582  ;;  %v117_v24 = vpop.permute.xlu0 %116 }
  0x95   :  { %v855_v25 = vmul.f32 %v4339_v17, %v583_v23  ;;  %v453_v27 = vmul.f32 %v4342_v18, %v117_v24  ;;  %3398 = vset.pattern.permute.xlu1 %v5956_v1  ;;  %v856_v28 = vmul.f32 %v4346_v19, %v583_v23  ;;  %v454_v29 = vmul.f32 %v4349_v20, %v117_v24  ;;  %v77_v23 = vld [vmem:[%s5946_s0 + $0xd8] sm:$0xff] }
  0x96   :  { %231 = vperm.xlu1 %3398, %v73_v21   ;;  %316 = vperm.xlu0 %3409, %v90_v22  }
  0x97   :  { %v983_v33 = vadd.f32 %v855_v25, %v453_v27  ;;  %v984_v37 = vadd.f32 %v856_v28, %v454_v29 }
  0x98   :  { %v587_v31 = vpop.permute.xlu1 %586  ;;  %v122_v32 = vpop.permute.xlu0 %121 }
  0x99   :  { %v857_v34 = vmul.f32 %v4339_v17, %v587_v31  ;;  %v858_v35 = vmul.f32 %v4346_v19, %v587_v31  ;;  %v455_v36 = vmul.f32 %v4342_v18, %v122_v32  ;;  %v456_v38 = vmul.f32 %v4349_v20, %v122_v32 }
  0x9a   :  { %3399 = vset.pattern.permute.xlu1 %v3992_v0  ;;  %3413 = vset.pattern.permute.xlu0 %v3992_v0  ;;  %v1122_v44 = vadd.f32 %v4366_v30, %v983_v33  ;;  %v1123_v48 = vadd.f32 %v4374_v39, %v984_v37  ;;  %v98_v33 = vld [vmem:[%s5946_s0 + $0x180] sm:$0xff] }
  0x9b   :  { %v985_v40 = vadd.f32 %v857_v34, %v455_v36  ;;  %674 = vperm.xlu1 %3399, %v73_v21   ;;  %742 = vperm.xlu0 %3413, %v90_v22   ;;  %v986_v41 = vadd.f32 %v858_v35, %v456_v38 }
  0x9c   :  { %v127_v42 = vpop.permute.xlu0 %126 }
  0x9d   :  { %v1124_v45 = vadd.f32 %v4366_v30, %v985_v40  ;;  %v132_v46 = vpop.permute.xlu1 %131  ;;  %v1125_v49 = vadd.f32 %v4374_v39, %v986_v41  ;;  %v457_v9 = vmul.f32 %v4342_v18, %v127_v42  ;;  %v458_v10 = vmul.f32 %v4349_v20, %v127_v42 }
  0x9e   :  { %v459_v3 = vmul.f32 %v4342_v18, %v132_v46  ;;  %v460_v4 = vmul.f32 %v4349_v20, %v132_v46 }
  0x9f   :  { %v1250_v50 = vpack.c.bf16 %v1124_v45, %v1122_v44  ;;  %3400 = vset.pattern.permute.xlu1 %v5956_v1  ;;  %758 = vperm.xlu0 %3413, %v94_v43   ;;  %v1251_v52 = vpack.c.bf16 %v1125_v49, %v1123_v48 }
  0xa0   :  { %236 = vperm.xlu1 %3400, %v74_v47   ;;  %v142_v51 = vpop.permute.xlu0 %141 }
  0xa1   :  { %3557 = vtanh.bf16 %v1250_v50  ;;  %v463_v37 = vmul.f32 %v4342_v18, %v142_v51  ;;  %v464_v38 = vmul.f32 %v4349_v20, %v142_v51 }
  0xa2   :  { %v595_v55 = vpop.permute.xlu1 %594  ;;  %3559 = vtanh.bf16 %v1251_v52 }
  0xa3   :  { %3418 = vset.pattern.permute.xlu0 %v5956_v1  ;;  %v861_v61 = vmul.f32 %v4339_v17, %v595_v55  ;;  %v862_v63 = vmul.f32 %v4346_v19, %v595_v55 }
  0xa4   :  { %3401 = vset.pattern.permute.xlu1 %v3992_v0  ;;  %v147_v57 = vpop.permute.xlu0 %146  ;;  %331 = vperm.xlu0 %3418, %v4391_v54  }
  0xa5   :  { %678 = vperm.xlu1 %3401, %v74_v47   ;;  %v989_v12 = vadd.f32 %v861_v61, %v459_v3  ;;  %v990_v13 = vadd.f32 %v862_v63, %v460_v4  ;;  %v465_v52 = vmul.f32 %v4342_v18, %v147_v57  ;;  %v466_v55 = vmul.f32 %v4349_v20, %v147_v57 }
  0xa7   :  { %v137_v8 = vpop.permute.xlu1 %136  ;;  %v1128_v28 = vadd.f32 %v4366_v30, %v989_v12  ;;  %v1129_v29 = vadd.f32 %v4374_v39, %v990_v13  ;;  %v102_v13 = vld [vmem:[%s5946_s0 + $0x1a0] sm:$0xff] }
  0xa8   :  { %336 = vperm.xlu0 %3418, %v94_v43   ;;  %v462_v40 = vmul.f32 %v4349_v20, %v137_v8  ;;  %v461_v41 = vmul.f32 %v4342_v18, %v137_v8 }
  0xa9   :  { %682 = vperm.xlu1 %3401, %v4244_v53   ;;  %v591_v14 = vpop.permute.xlu0 %590 }
  0xaa   :  { %v859_v21 = vmul.f32 %v4339_v17, %v591_v14  ;;  %v860_v22 = vmul.f32 %v4346_v19, %v591_v14 }
  0xac   :  { %v3558_v24 = vpop.eup %3557  ;;  %v987_v25 = vadd.f32 %v859_v21, %v457_v9  ;;  %v988_v26 = vadd.f32 %v860_v22, %v458_v10  ;;  %v599_v27 = vpop.permute.xlu1 %598  ;;  %351 = vperm.xlu0 %3418, %v4406_v15  }
  0xad   :  { %v3560_v53 = vpop.eup %3559  ;;  %v864_v31 = vmul.f32 %v4346_v19, %v599_v27  ;;  %3402 = vset.pattern.permute.xlu1 %v5956_v1  ;;  %v607_v32 = vpop.permute.xlu0 %606  ;;  %v863_v36 = vmul.f32 %v4339_v17, %v599_v27 }
  0xae   :  { %v1126_v34 = vadd.f32 %v4366_v30, %v987_v25  ;;  %v1127_v35 = vadd.f32 %v4374_v39, %v988_v26  ;;  %1614 = vmatprep.mubr.bf16.mxu0 %v3560_v53  ;;  %251 = vperm.xlu1 %3402, %v77_v23   ;;  %v867_v61 = vmul.f32 %v4339_v17, %v607_v32 }
  0xaf   :  { %1615 = vmatmul.mubr.bf16.vlgmr.msra.gmra.mrb[0].mxu0 %v3558_v24  ;;  %v992_v45 = vadd.f32 %v864_v31, %v462_v40  ;;  %v991_v48 = vadd.f32 %v863_v36, %v461_v41  ;;  %v868_v8 = vmul.f32 %v4346_v19, %v607_v32  ;;  %v4459_v32 = vld [vmem:[%s5946_s0 + $0x198] sm:$0xff]  ;;  %v84_v40 = vld [vmem:[%s5946_s0 + $0x110] sm:$0xff] }
  0xb0   :  { %v1252_v42 = vpack.c.bf16 %v1128_v28, %v1126_v34  ;;  %v1253_v43 = vpack.c.bf16 %v1129_v29, %v1127_v35  ;;  %v603_v44 = vpop.permute.xlu1 %602  ;;  %356 = vperm.xlu0 %3418, %v98_v33   ;;  %v995_v14 = vadd.f32 %v867_v61, %v465_v52 }
  0xb1   :  { %v865_v46 = vmul.f32 %v4339_v17, %v603_v44  ;;  %v866_v47 = vmul.f32 %v4346_v19, %v603_v44  ;;  %v4431_v49 = vpop.permute.xlu0 %622  ;;  %v1131_v63 = vadd.f32 %v4374_v39, %v992_v45  ;;  %v1130_v9 = vadd.f32 %v4366_v30, %v991_v48 }
  0xb2   :  { %3561 = vtanh.bf16 %v1252_v42  ;;  %281 = vperm.xlu1 %3402, %v4271_v58   ;;  %v996_v21 = vadd.f32 %v868_v8, %v466_v55  ;;  %v1134_v53 = vadd.f32 %v4366_v30, %v995_v14  ;;  %v875_v8 = vmul.f32 %v4339_v17, %v4431_v49 }
  0xb3   :  { %3563 = vtanh.bf16 %v1253_v43  ;;  %v993_v50 = vadd.f32 %v865_v46, %v463_v37  ;;  %v994_v51 = vadd.f32 %v866_v47, %v464_v38 }
  0xb4   :  { %3423 = vset.pattern.permute.xlu0 %v3992_v0  ;;  %v1135_v28 = vadd.f32 %v4374_v39, %v996_v21 }
  0xb5   :  { %v1132_v3 = vadd.f32 %v4366_v30, %v993_v50  ;;  %v1133_v4 = vadd.f32 %v4374_v39, %v994_v51  ;;  %v152_v58 = vpop.permute.xlu1 %151  ;;  %774 = vperm.xlu0 %3423, %v98_v33   ;;  %v4443_v12 = vpop.permute.xlu0 %638 }
  0xb6   :  { %3404 = vset.pattern.permute.xlu1 %v3992_v0  ;;  %v467_v24 = vmul.f32 %v4342_v18, %v152_v58  ;;  %v468_v25 = vmul.f32 %v4349_v20, %v152_v58 }
  0xb7   :  { %v1255_v10 = vpack.c.bf16 %v1133_v4, %v1131_v63  ;;  %690 = vperm.xlu1 %3404, %v77_v23   ;;  %v1254_v57 = vpack.c.bf16 %v1132_v3, %v1130_v9  ;;  %v876_v9 = vmul.f32 %v4346_v19, %v4431_v49 }
  0xb9   :  { %790 = vperm.xlu0 %3423, %v102_v13   ;;  %3565 = vtanh.bf16 %v1255_v10  ;;  %v4461_v34 = vpop.permute.xlu0 %654 }
  0xba   :  { %v611_v22 = vpop.permute.xlu1 %610  ;;  %3567 = vtanh.bf16 %v1254_v57 }
  0xbb   :  { %v869_v26 = vmul.f32 %v4339_v17, %v611_v22  ;;  %v870_v23 = vmul.f32 %v4346_v19, %v611_v22  ;;  %710 = vperm.xlu1 %3404, %v4258_v56  }
  0xbd   :  { %v3562_v27 = vpop.eup %3561  ;;  %v997_v29 = vadd.f32 %v869_v26, %v467_v24  ;;  %v998_v31 = vadd.f32 %v870_v23, %v468_v25  ;;  %3428 = vset.pattern.permute.xlu0 %v5956_v1 }
  0xbe   :  { %v3564_v33 = vpop.eup %3563  ;;  %371 = vperm.xlu0 %3428, %v4459_v32   ;;  %v162_v42 = vpop.permute.xlu0 %161 }
  0xbf   :  { %v1136_v56 = vadd.f32 %v4366_v30, %v997_v29  ;;  %v1137_v35 = vadd.f32 %v4374_v39, %v998_v31  ;;  %1624 = vmatprep.mubr.bf16.mxu0 %v3564_v33  ;;  %3405 = vset.pattern.permute.xlu1 %v5956_v1  ;;  %v157_v36 = vpop.permute.xlu1 %156  ;;  %v471_v48 = vmul.f32 %v4342_v18, %v162_v42 }
  0xc0   :  { %1625 = vmatmul.mubr.bf16.gmra.mrb[4].mxu0 %v3562_v27  ;;  %256 = vperm.xlu1 %3405, %v4278_v59   ;;  %v469_v59 = vmul.f32 %v4342_v18, %v157_v36  ;;  %v470_v47 = vmul.f32 %v4349_v20, %v157_v36  ;;  %v472_v50 = vmul.f32 %v4349_v20, %v162_v42  ;;  %v86_v42 = vld [vmem:[%s5946_s0 + $0x120] sm:$0xff] }
  0xc1   :  { %v1256_v37 = vpack.c.bf16 %v1136_v56, %v1134_v53  ;;  %v1257_v38 = vpack.c.bf16 %v1137_v35, %v1135_v28 }
  0xc2   :  { %376 = vperm.xlu0 %3428, %v102_v13   ;;  %v167_v3 = vpop.permute.xlu0 %166 }
  0xc3   :  { %3569 = vtanh.bf16 %v1256_v37  ;;  %v474_v10 = vmul.f32 %v4349_v20, %v167_v3  ;;  %v4503_v37 = vld [vmem:[%s5946_s0 + $0x1b8] sm:$0xff] }
  0xc4   :  { %3571 = vtanh.bf16 %v1257_v38  ;;  %286 = vperm.xlu1 %3405, %v84_v40   ;;  %v615_v41 = vpop.permute.xlu1 %614  ;;  %v3566_v43 = vpop.eup %3565 }
  0xc5   :  { %v871_v44 = vmul.f32 %v4339_v17, %v615_v41  ;;  %v872_v45 = vmul.f32 %v4346_v19, %v615_v41  ;;  %1634 = vmatprep.mubr.bf16.mxu0 %v3566_v43  ;;  %v3568_v46 = vpop.eup %3567  ;;  %v1004_v27 = vadd.f32 %v876_v9, %v474_v10  ;;  %v883_v10 = vmul.f32 %v4339_v17, %v4443_v12 }
  0xc6   :  { %391 = vperm.xlu0 %3428, %v4503_v37  }
  0xc7   :  { %v999_v52 = vadd.f32 %v871_v44, %v469_v59  ;;  %v1000_v55 = vadd.f32 %v872_v45, %v470_v47  ;;  %v1143_v36 = vadd.f32 %v4374_v39, %v1004_v27  ;;  %v182_v59 = vpop.permute.xlu0 %181 }
  0xc8   :  { %1635 = vmatmul.mubr.bf16.gmra.mrb[8].mxu0 %v3568_v46  ;;  %291 = vperm.xlu1 %3405, %v4285_v60   ;;  %v619_v51 = vpop.permute.xlu1 %618  ;;  %v473_v60 = vmul.f32 %v4342_v18, %v167_v3 }
  0xc9   :  { %v873_v61 = vmul.f32 %v4339_v17, %v619_v51  ;;  %v874_v63 = vmul.f32 %v4346_v19, %v619_v51  ;;  %v1138_v57 = vadd.f32 %v4366_v30, %v999_v52  ;;  %v1139_v13 = vadd.f32 %v4374_v39, %v1000_v55 }
  0xca   :  { %v1003_v23 = vadd.f32 %v875_v8, %v473_v60  ;;  %3433 = vset.pattern.permute.xlu0 %v3992_v0  ;;  %v479_v55 = vmul.f32 %v4342_v18, %v182_v59 }
  0xcb   :  { %v1001_v4 = vadd.f32 %v873_v61, %v471_v48  ;;  %v1002_v58 = vadd.f32 %v874_v63, %v472_v50  ;;  %v480_v61 = vmul.f32 %v4349_v20, %v182_v59  ;;  %v187_v9 = vpop.permute.xlu0 %186 }
  0xcc   :  { %3406 = vset.pattern.permute.xlu1 %v3992_v0  ;;  %v1142_v35 = vadd.f32 %v4366_v30, %v1003_v23 }
  0xcd   :  { %v1140_v14 = vadd.f32 %v4366_v30, %v1001_v4  ;;  %v1141_v21 = vadd.f32 %v4374_v39, %v1002_v58  ;;  %698 = vperm.xlu1 %3406, %v4311_v5   ;;  %v172_v22 = vpop.permute.xlu1 %171 }
  0xce   :  { %v3570_v24 = vpop.eup %3569  ;;  %v475_v28 = vmul.f32 %v4342_v18, %v172_v22  ;;  %v476_v29 = vmul.f32 %v4349_v20, %v172_v22 }
  0xcf   :  { %v3572_v25 = vpop.eup %3571  ;;  %v1258_v49 = vpack.c.bf16 %v1140_v14, %v1138_v57  ;;  %v1259_v26 = vpack.c.bf16 %v1141_v21, %v1139_v13  ;;  %v884_v57 = vmul.f32 %v4346_v19, %v4443_v12  ;;  %v481_v13 = vmul.f32 %v4342_v18, %v187_v9 }
  0xd0   :  { %1644 = vmatprep.mubr.bf16.mxu0 %v3572_v25  ;;  %v482_v14 = vmul.f32 %v4349_v20, %v187_v9 }
  0xd1   :  { %3573 = vtanh.bf16 %v1258_v49  ;;  %1645 = vmatmul.mubr.bf16.gmra.mrb[12].mxu0 %v3570_v24  ;;  %718 = vperm.xlu1 %3406, %v84_v40  }
  0xd2   :  { %3575 = vtanh.bf16 %v1259_v26  ;;  %v627_v53 = vpop.permute.xlu1 %626 }
  0xd3   :  { %v877_v31 = vmul.f32 %v4339_v17, %v627_v53  ;;  %v878_v5 = vmul.f32 %v4346_v19, %v627_v53  ;;  %v1011_v53 = vadd.f32 %v883_v10, %v481_v13 }
  0xd5   :  { %v1005_v33 = vadd.f32 %v877_v31, %v475_v28  ;;  %v1006_v56 = vadd.f32 %v878_v5, %v476_v29  ;;  %3407 = vset.pattern.permute.xlu1 %v5956_v1  ;;  %v1012_v28 = vadd.f32 %v884_v57, %v482_v14  ;;  %v88_v29 = vld [vmem:[%s5946_s0 + $0x130] sm:$0xff]  ;;  %v202_v31 = vpop.permute.xlu0 %201  ;;  %v110_v5 = vld [vmem:[%s5946_s0 + $0x1e0] sm:$0xff] }
  0xd6   :  { %266 = vperm.xlu1 %3407, %v4295_v62   ;;  %v106_v62 = vld [vmem:[%s5946_s0 + $0x1c0] sm:$0xff] }
  0xd7   :  { %v1144_v38 = vadd.f32 %v4366_v30, %v1005_v33  ;;  %v1145_v40 = vadd.f32 %v4374_v39, %v1006_v56  ;;  %v177_v41 = vpop.permute.xlu1 %176  ;;  %806 = vperm.xlu0 %3433, %v106_v62  }
  0xd8   :  { %v477_v51 = vmul.f32 %v4342_v18, %v177_v41  ;;  %v478_v52 = vmul.f32 %v4349_v20, %v177_v41 }
  0xd9   :  { %v1260_v43 = vpack.c.bf16 %v1144_v38, %v1142_v35  ;;  %v1261_v44 = vpack.c.bf16 %v1145_v40, %v1143_v36 }
  0xda   :  { %296 = vperm.xlu1 %3407, %v86_v42  }
  0xdb   :  { %3577 = vtanh.bf16 %v1260_v43  ;;  %3434 = vset.pattern.permute.xlu0 %v5956_v1  ;;  %v1151_v43 = vadd.f32 %v4374_v39, %v1012_v28 }
  0xdc   :  { %v3574_v45 = vpop.eup %3573  ;;  %3579 = vtanh.bf16 %v1261_v44  ;;  %v631_v46 = vpop.permute.xlu1 %630  ;;  %396 = vperm.xlu0 %3434, %v106_v62  }
  0xdd   :  { %v3576_v47 = vpop.eup %3575  ;;  %v879_v48 = vmul.f32 %v4339_v17, %v631_v46  ;;  %v880_v50 = vmul.f32 %v4346_v19, %v631_v46  ;;  %v207_v44 = vpop.permute.xlu0 %206 }
  0xde   :  { %1654 = vmatprep.mubr.bf16.mxu0 %v3576_v47  ;;  %301 = vperm.xlu1 %3407, %v4301_v2  }
  0xdf   :  { %1655 = vmatmul.mubr.bf16.gmra.mrb[16].mxu0 %v3574_v45  ;;  %v1007_v3 = vadd.f32 %v879_v48, %v477_v51  ;;  %v1008_v4 = vadd.f32 %v880_v50, %v478_v52 }
  0xe0   :  { %v635_v63 = vpop.permute.xlu1 %634 }
  0xe1   :  { %v881_v58 = vmul.f32 %v4339_v17, %v635_v63  ;;  %v882_v8 = vmul.f32 %v4346_v19, %v635_v63  ;;  %v1146_v21 = vadd.f32 %v4366_v30, %v1007_v3  ;;  %v1147_v22 = vadd.f32 %v4374_v39, %v1008_v4  ;;  %v4560_v48 = vpop.permute.xlu0 %221 }
  0xe2   :  { %3408 = vset.pattern.permute.xlu1 %v3992_v0  ;;  %v487_v4 = vmul.f32 %v4342_v18, %v202_v31 }
  0xe3   :  { %v1009_v2 = vadd.f32 %v881_v58, %v479_v55  ;;  %v1010_v60 = vadd.f32 %v882_v8, %v480_v61  ;;  %706 = vperm.xlu1 %3408, %v4326_v11   ;;  %v4540_v11 = vld [vmem:[%s5946_s0 + $0x1d8] sm:$0xff]  ;;  %v488_v58 = vmul.f32 %v4349_v20, %v202_v31  ;;  %v91_v8 = vld [vmem:[%s5946_s0 + $0x148] sm:$0xff] }
  0xe4   :  { %411 = vperm.xlu0 %3434, %v4540_v11  }
  0xe5   :  { %v1148_v24 = vadd.f32 %v4366_v30, %v1009_v2  ;;  %v1149_v25 = vadd.f32 %v4374_v39, %v1010_v60  ;;  %v192_v49 = vpop.permute.xlu1 %191  ;;  %v4576_v57 = vpop.permute.xlu0 %226 }
  0xe6   :  { %v3578_v26 = vpop.eup %3577  ;;  %v483_v56 = vmul.f32 %v4342_v18, %v192_v49  ;;  %v484_v35 = vmul.f32 %v4349_v20, %v192_v49 }
  0xe7   :  { %v3580_v12 = vpop.eup %3579  ;;  %v1262_v23 = vpack.c.bf16 %v1148_v24, %v1146_v21  ;;  %v1263_v27 = vpack.c.bf16 %v1149_v25, %v1147_v22  ;;  %726 = vperm.xlu1 %3408, %v86_v42   ;;  %v1150_v42 = vadd.f32 %v4366_v30, %v1011_v53  ;;  %v891_v21 = vmul.f32 %v4339_v17, %v4461_v34 }
  0xe8   :  { %1664 = vmatprep.mubr.bf16.mxu0 %v3580_v12  ;;  %416 = vperm.xlu0 %3434, %v110_v5   ;;  %v892_v22 = vmul.f32 %v4346_v19, %v4461_v34  ;;  %v489_v24 = vmul.f32 %v4342_v18, %v207_v44  ;;  %v490_v25 = vmul.f32 %v4349_v20, %v207_v44 }
  0xe9   :  { %3581 = vtanh.bf16 %v1262_v23  ;;  %1665 = vmatmul.mubr.bf16.gmra.mrb[20].mxu0 %v3578_v26  ;;  %v4589_v34 = vpop.permute.xlu0 %241 }
  0xea   :  { %3583 = vtanh.bf16 %v1263_v27  ;;  %v643_v33 = vpop.permute.xlu1 %642 }
  0xeb   :  { %v885_v36 = vmul.f32 %v4339_v17, %v643_v33  ;;  %v886_v38 = vmul.f32 %v4346_v19, %v643_v33  ;;  %3410 = vset.pattern.permute.xlu1 %v5956_v1  ;;  %v1020_v33 = vadd.f32 %v892_v22, %v490_v25  ;;  %v497_v25 = vmul.f32 %v4342_v18, %v4576_v57 }
  0xec   :  { %306 = vperm.xlu1 %3410, %v88_v29   ;;  %3439 = vset.pattern.permute.xlu0 %v3992_v0 }
  0xed   :  { %v1013_v40 = vadd.f32 %v885_v36, %v483_v56  ;;  %v1014_v41 = vadd.f32 %v886_v38, %v484_v35  ;;  %822 = vperm.xlu0 %3439, %v110_v5   ;;  %v1019_v5 = vadd.f32 %v891_v21, %v489_v24  ;;  %v92_v56 = vld [vmem:[%s5946_s0 + $0x150] sm:$0xff] }
  0xef   :  { %v1152_v62 = vadd.f32 %v4366_v30, %v1013_v40  ;;  %v1153_v45 = vadd.f32 %v4374_v39, %v1014_v41  ;;  %v197_v46 = vpop.permute.xlu1 %196  ;;  %v1158_v44 = vadd.f32 %v4366_v30, %v1019_v5 }
  0xf0   :  { %3411 = vset.pattern.permute.xlu1 %v3992_v0  ;;  %v485_v63 = vmul.f32 %v4342_v18, %v197_v46  ;;  %v486_v3 = vmul.f32 %v4349_v20, %v197_v46  ;;  %v4606_v46 = vld [vmem:[%s5946_s0 + $0x1f8] sm:$0xff] }
  0xf1   :  { %v1264_v59 = vpack.c.bf16 %v1152_v62, %v1150_v42  ;;  %v1265_v47 = vpack.c.bf16 %v1153_v45, %v1151_v43  ;;  %734 = vperm.xlu1 %3411, %v88_v29   ;;  %3442 = vset.pattern.permute.xlu0 %v5956_v1  ;;  %v1159_v62 = vadd.f32 %v4374_v39, %v1020_v33  ;;  %v4601_v45 = vpop.permute.xlu0 %246 }
  0xf2   :  { %431 = vperm.xlu0 %3442, %v4606_v46  }
  0xf3   :  { %3585 = vtanh.bf16 %v1264_v59 }
  0xf4   :  { %v3582_v50 = vpop.eup %3581  ;;  %3587 = vtanh.bf16 %v1265_v47  ;;  %v647_v51 = vpop.permute.xlu1 %646 }
  0xf5   :  { %v3584_v52 = vpop.eup %3583  ;;  %v887_v55 = vmul.f32 %v4339_v17, %v647_v51  ;;  %v888_v61 = vmul.f32 %v4346_v19, %v647_v51  ;;  %738 = vperm.xlu1 %3411, %v4335_v16  }
  0xf6   :  { %1674 = vmatprep.mubr.bf16.mxu0 %v3584_v52  ;;  %3444 = vset.pattern.permute.xlu0 %v3992_v0 }
  0xf7   :  { %1675 = vmatmul.mubr.bf16.gmra.mrb[24].mxu0 %v3582_v50  ;;  %v1015_v2 = vadd.f32 %v887_v55, %v485_v63  ;;  %v1016_v60 = vadd.f32 %v888_v61, %v486_v3  ;;  %v4612_v55 = vpop.permute.xlu0 %276 }
  0xf8   :  { %v651_v9 = vpop.permute.xlu1 %650 }
  0xf9   :  { %v889_v10 = vmul.f32 %v4339_v17, %v651_v9  ;;  %v890_v16 = vmul.f32 %v4346_v19, %v651_v9  ;;  %3412 = vset.pattern.permute.xlu1 %v5956_v1  ;;  %v1154_v49 = vadd.f32 %v4366_v30, %v1015_v2  ;;  %v1155_v26 = vadd.f32 %v4374_v39, %v1016_v60 }
  0xfa   :  { %321 = vperm.xlu1 %3412, %v91_v8   ;;  %v496_v9 = vmul.f32 %v4349_v20, %v4560_v48 }
  0xfb   :  { %v1017_v13 = vadd.f32 %v889_v10, %v487_v4  ;;  %v1018_v14 = vadd.f32 %v890_v16, %v488_v58  ;;  %v95_v10 = vld [vmem:[%s5946_s0 + $0x168] sm:$0xff]  ;;  %v671_v22 = vpop.permute.xlu0 %670 }
  0xfd   :  { %v1156_v12 = vadd.f32 %v4366_v30, %v1017_v13  ;;  %v1157_v23 = vadd.f32 %v4374_v39, %v1018_v14  ;;  %v212_v27 = vpop.permute.xlu1 %211 }
  0xfe   :  { %v3586_v53 = vpop.eup %3585  ;;  %3414 = vset.pattern.permute.xlu1 %v3992_v0  ;;  %v491_v36 = vmul.f32 %v4342_v18, %v212_v27  ;;  %v492_v38 = vmul.f32 %v4349_v20, %v212_v27 }
  0xff   :  { %v3588_v28 = vpop.eup %3587  ;;  %v1266_v29 = vpack.c.bf16 %v1156_v12, %v1154_v49  ;;  %v1267_v31 = vpack.c.bf16 %v1157_v23, %v1155_v26  ;;  %746 = vperm.xlu1 %3414, %v91_v8   ;;  %v495_v8 = vmul.f32 %v4342_v18, %v4560_v48  ;;  %v498_v49 = vmul.f32 %v4349_v20, %v4576_v57 }
 0x100   :  { %1684 = vmatprep.mubr.bf16.mxu0 %v3588_v28  ;;  %v899_v26 = vmul.f32 %v4339_v17, %v671_v22  ;;  %v900_v12 = vmul.f32 %v4346_v19, %v671_v22 }
 0x101   :  { %3589 = vtanh.bf16 %v1266_v29  ;;  %1685 = vmatmul.mubr.bf16.gmra.mrb[28].mxu0 %v3586_v53 }
 0x102   :  { %3591 = vtanh.bf16 %v1267_v31  ;;  %v659_v35 = vpop.permute.xlu1 %658  ;;  %v1027_v57 = vadd.f32 %v899_v26, %v497_v25 }
 0x103   :  { %v893_v40 = vmul.f32 %v4339_v17, %v659_v35  ;;  %v894_v41 = vmul.f32 %v4346_v19, %v659_v35  ;;  %3415 = vset.pattern.permute.xlu1 %v5956_v1  ;;  %v1028_v35 = vadd.f32 %v900_v12, %v498_v49 }
 0x104   :  { %326 = vperm.xlu1 %3415, %v92_v56  }
 0x105   :  { %v1021_v42 = vadd.f32 %v893_v40, %v491_v36  ;;  %v1022_v43 = vadd.f32 %v894_v41, %v492_v38  ;;  %v96_v36 = vld [vmem:[%s5946_s0 + $0x170] sm:$0xff] }
 0x107   :  { %v1160_v59 = vadd.f32 %v4366_v30, %v1021_v42  ;;  %v1161_v47 = vadd.f32 %v4374_v39, %v1022_v43  ;;  %v217_v50 = vpop.permute.xlu1 %216 }
 0x108   :  { %3416 = vset.pattern.permute.xlu1 %v3992_v0  ;;  %v493_v2 = vmul.f32 %v4342_v18, %v217_v50  ;;  %v494_v60 = vmul.f32 %v4349_v20, %v217_v50 }
 0x109   :  { %v1268_v51 = vpack.c.bf16 %v1160_v59, %v1158_v44  ;;  %v1269_v52 = vpack.c.bf16 %v1161_v47, %v1159_v62  ;;  %750 = vperm.xlu1 %3416, %v92_v56   ;;  %v1166_v59 = vadd.f32 %v4366_v30, %v1027_v57  ;;  %v1167_v47 = vadd.f32 %v4374_v39, %v1028_v35 }
 0x10a   :  { %v506_v57 = vmul.f32 %v4349_v20, %v4601_v45 }
 0x10b   :  { %3593 = vtanh.bf16 %v1268_v51 }
 0x10c   :  { %v3590_v61 = vpop.eup %3589  ;;  %3595 = vtanh.bf16 %v1269_v52  ;;  %v663_v63 = vpop.permute.xlu1 %662 }
 0x10d   :  { %v3592_v3 = vpop.eup %3591  ;;  %v895_v4 = vmul.f32 %v4339_v17, %v663_v63  ;;  %v896_v58 = vmul.f32 %v4346_v19, %v663_v63  ;;  %754 = vperm.xlu1 %3416, %v4391_v54  }
 0x10e   :  { %1694 = vmatprep.mubr.bf16.mxu0 %v3592_v3 }
 0x10f   :  { %1695 = vmatmul.mubr.bf16.gmra.mrb[32].mxu0 %v3590_v61  ;;  %v1023_v13 = vadd.f32 %v895_v4, %v493_v2  ;;  %v1024_v14 = vadd.f32 %v896_v58, %v494_v60  ;;  %v3495_v2 = vld [vmem:[%s5951_s5 + $0x4] ss:$8 sps:$4 sm:$0xff]   ;;  %v503_v60 = vmul.f32 %v4342_v18, %v4589_v34 }
 0x110   :  { %v667_v16 = vpop.permute.xlu1 %666  ;;  %2267 = vmatprep.subr.bf16.mxu1 %v3495_v2 }
 0x111   :  { %v897_v54 = vmul.f32 %v4339_v17, %v667_v16  ;;  %v898_v21 = vmul.f32 %v4346_v19, %v667_v16  ;;  %3417 = vset.pattern.permute.xlu1 %v5956_v1  ;;  %v1162_v23 = vadd.f32 %v4366_v30, %v1023_v13  ;;  %v1163_v27 = vadd.f32 %v4374_v39, %v1024_v14 }
 0x112   :  { %341 = vperm.xlu1 %3417, %v95_v10   ;;  %v504_v16 = vmul.f32 %v4349_v20, %v4589_v34 }
 0x113   :  { %v1025_v48 = vadd.f32 %v897_v54, %v495_v8  ;;  %v1026_v24 = vadd.f32 %v898_v21, %v496_v9 }
 0x115   :  { %v1164_v53 = vadd.f32 %v4366_v30, %v1025_v48  ;;  %v1165_v28 = vadd.f32 %v4374_v39, %v1026_v24  ;;  %v232_v29 = vpop.permute.xlu1 %231 }
 0x116   :  { %v3594_v31 = vpop.eup %3593  ;;  %3419 = vset.pattern.permute.xlu1 %v3992_v0  ;;  %v499_v40 = vmul.f32 %v4342_v18, %v232_v29  ;;  %v500_v41 = vmul.f32 %v4349_v20, %v232_v29 }
 0x117   :  { %v3596_v5 = vpop.eup %3595  ;;  %v1270_v33 = vpack.c.bf16 %v1164_v53, %v1162_v23  ;;  %v1271_v56 = vpack.c.bf16 %v1165_v28, %v1163_v27  ;;  %762 = vperm.xlu1 %3419, %v95_v10   ;;  %v687_v10 = vpop.permute.xlu0 %686 }
 0x118   :  { %1704 = vmatprep.mubr.bf16.mxu0 %v3596_v5  ;;  %v907_v35 = vmul.f32 %v4339_v17, %v687_v10 }
 0x119   :  { %3597 = vtanh.bf16 %v1270_v33  ;;  %1705 = vmatmul.mubr.bf16.gmra.mrb[36].mxu0 %v3594_v31  ;;  %v505_v33 = vmul.f32 %v4342_v18, %v4601_v45 }
 0x11a   :  { %3599 = vtanh.bf16 %v1271_v56  ;;  %v675_v38 = vpop.permute.xlu1 %674 }
 0x11b   :  { %v901_v42 = vmul.f32 %v4339_v17, %v675_v38  ;;  %v902_v43 = vmul.f32 %v4346_v19, %v675_v38  ;;  %3420 = vset.pattern.permute.xlu1 %v5956_v1  ;;  %v715_v49 = vpop.permute.xlu0 %714 }
 0x11c   :  { %346 = vperm.xlu1 %3420, %v96_v36  }
 0x11d   :  { %v1029_v44 = vadd.f32 %v901_v42, %v499_v40  ;;  %v1030_v62 = vadd.f32 %v902_v43, %v500_v41  ;;  %v100_v40 = vld [vmem:[%s5946_s0 + $0x190] sm:$0xff]  ;;  %v1035_v41 = vadd.f32 %v907_v35, %v505_v33 }
 0x11f   :  { %v1168_v50 = vadd.f32 %v4366_v30, %v1029_v44  ;;  %v1169_v51 = vadd.f32 %v4374_v39, %v1030_v62  ;;  %v237_v52 = vpop.permute.xlu1 %236  ;;  %v4679_v56 = vpop.permute.xlu0 %694  ;;  %v921_v44 = vmul.f32 %v4339_v17, %v715_v49  ;;  %v922_v62 = vmul.f32 %v4346_v19, %v715_v49 }
 0x120   :  { %3421 = vset.pattern.permute.xlu1 %v3992_v0  ;;  %v501_v13 = vmul.f32 %v4342_v18, %v237_v52  ;;  %v502_v14 = vmul.f32 %v4349_v20, %v237_v52 }
 0x121   :  { %v1272_v61 = vpack.c.bf16 %v1168_v50, %v1166_v59  ;;  %v1273_v63 = vpack.c.bf16 %v1169_v51, %v1167_v47  ;;  %766 = vperm.xlu1 %3421, %v96_v36   ;;  %v908_v36 = vmul.f32 %v4346_v19, %v687_v10 }
 0x123   :  { %3601 = vtanh.bf16 %v1272_v61  ;;  %v1036_v42 = vadd.f32 %v908_v36, %v506_v57  ;;  %v4693_v47 = vpop.permute.xlu0 %722 }
 0x124   :  { %v3598_v3 = vpop.eup %3597  ;;  %3603 = vtanh.bf16 %v1273_v63  ;;  %v679_v4 = vpop.permute.xlu1 %678  ;;  %v517_v63 = vmul.f32 %v4342_v18, %v4612_v55 }
 0x125   :  { %v3600_v58 = vpop.eup %3599  ;;  %v903_v8 = vmul.f32 %v4339_v17, %v679_v4  ;;  %v904_v9 = vmul.f32 %v4346_v19, %v679_v4  ;;  %770 = vperm.xlu1 %3421, %v4406_v15   ;;  %v99_v15 = vld [vmem:[%s5946_s0 + $0x188] sm:$0xff]  ;;  %v1174_v4 = vadd.f32 %v4366_v30, %v1035_v41  ;;  %v925_v41 = vmul.f32 %v4339_v17, %v4693_v47 }
 0x126   :  { %1714 = vmatprep.mubr.bf16.mxu0 %v3600_v58  ;;  %v1175_v58 = vadd.f32 %v4374_v39, %v1036_v42 }
 0x127   :  { %1715 = vmatmul.mubr.bf16.gmra.mrb[40].mxu0 %v3598_v3  ;;  %v1031_v21 = vadd.f32 %v903_v8, %v501_v13  ;;  %v1032_v22 = vadd.f32 %v904_v9, %v502_v14  ;;  %v518_v3 = vmul.f32 %v4349_v20, %v4612_v55 }
 0x128   :  { %v683_v54 = vpop.permute.xlu1 %682 }
 0x129   :  { %v905_v48 = vmul.f32 %v4339_v17, %v683_v54  ;;  %v906_v24 = vmul.f32 %v4346_v19, %v683_v54  ;;  %3422 = vset.pattern.permute.xlu1 %v5956_v1  ;;  %v1170_v26 = vadd.f32 %v4366_v30, %v1031_v21  ;;  %v1171_v12 = vadd.f32 %v4374_v39, %v1032_v22  ;;  %v4710_v54 = vpop.permute.xlu0 %702 }
 0x12a   :  { %361 = vperm.xlu1 %3422, %v99_v15  }
 0x12b   :  { %v1033_v34 = vadd.f32 %v905_v48, %v503_v60  ;;  %v1034_v25 = vadd.f32 %v906_v24, %v504_v16 }
 0x12d   :  { %v1172_v23 = vadd.f32 %v4366_v30, %v1033_v34  ;;  %v1173_v27 = vadd.f32 %v4374_v39, %v1034_v25  ;;  %v252_v53 = vpop.permute.xlu1 %251 }
 0x12e   :  { %v3602_v28 = vpop.eup %3601  ;;  %3424 = vset.pattern.permute.xlu1 %v3992_v0  ;;  %v507_v50 = vmul.f32 %v4342_v18, %v252_v53  ;;  %v508_v51 = vmul.f32 %v4349_v20, %v252_v53 }
 0x12f   :  { %v3604_v29 = vpop.eup %3603  ;;  %v1274_v31 = vpack.c.bf16 %v1172_v23, %v1170_v26  ;;  %v1275_v5 = vpack.c.bf16 %v1173_v27, %v1171_v12  ;;  %778 = vperm.xlu1 %3424, %v99_v15   ;;  %v103_v12 = vld [vmem:[%s5946_s0 + $0x1a8] sm:$0xff] }
 0x130   :  { %1724 = vmatprep.mubr.bf16.mxu0 %v3604_v29 }
 0x131   :  { %3605 = vtanh.bf16 %v1274_v31  ;;  %1725 = vmatmul.mubr.bf16.gmra.mrb[44].mxu0 %v3602_v28  ;;  %v282_v38 = vpop.permute.xlu1 %281  ;;  %v4721_v28 = vpop.permute.xlu0 %730  ;;  %v911_v31 = vmul.f32 %v4339_v17, %v4679_v56 }
 0x132   :  { %3607 = vtanh.bf16 %v1275_v5  ;;  %v519_v43 = vmul.f32 %v4342_v18, %v282_v38  ;;  %v520_v45 = vmul.f32 %v4349_v20, %v282_v38  ;;  %v912_v5 = vmul.f32 %v4346_v19, %v4679_v56  ;;  %v104_v38 = vld [vmem:[%s5946_s0 + $0x1b0] sm:$0xff] }
 0x133   :  { %3425 = vset.pattern.permute.xlu1 %v5956_v1 }
 0x134   :  { %366 = vperm.xlu1 %3425, %v100_v40   ;;  %v1049_v2 = vadd.f32 %v921_v44, %v519_v43  ;;  %v1050_v60 = vadd.f32 %v922_v62, %v520_v45  ;;  %v926_v62 = vmul.f32 %v4346_v19, %v4693_v47  ;;  %v3493_v47 = vld [vmem:[%s5951_s5] ss:$8 sps:$4 sm:$0xff]  }
 0x135   :  { %v262_v36 = vpop.permute.xlu0 %261 }
 0x136   :  { %v691_v59 = vpop.permute.xlu1 %690  ;;  %v1188_v25 = vadd.f32 %v4366_v30, %v1049_v2  ;;  %v1189_v27 = vadd.f32 %v4374_v39, %v1050_v60  ;;  %v511_v56 = vmul.f32 %v4342_v18, %v262_v36  ;;  %v512_v44 = vmul.f32 %v4349_v20, %v262_v36  ;;  %v3507_v36 = vld [vmem:[%s5951_s5 + $0x44] ss:$8 sps:$4 sm:$0xff]  }
 0x137   :  { %v909_v52 = vmul.f32 %v4339_v17, %v691_v59  ;;  %v910_v61 = vmul.f32 %v4346_v19, %v691_v59 }
 0x138   :  { %3426 = vset.pattern.permute.xlu1 %v3992_v0 }
 0x139   :  { %v1037_v8 = vadd.f32 %v909_v52, %v507_v50  ;;  %v1038_v9 = vadd.f32 %v910_v61, %v508_v51  ;;  %782 = vperm.xlu1 %3426, %v100_v40  }
 0x13a   :  { %v711_v10 = vpop.permute.xlu1 %710 }
 0x13b   :  { %v1176_v16 = vadd.f32 %v4366_v30, %v1037_v8  ;;  %v1177_v13 = vadd.f32 %v4374_v39, %v1038_v9  ;;  %v919_v14 = vmul.f32 %v4339_v17, %v711_v10  ;;  %v920_v55 = vmul.f32 %v4346_v19, %v711_v10 }
 0x13c   :  { %v3606_v15 = vpop.eup %3605 }
 0x13d   :  { %v3608_v21 = vpop.eup %3607  ;;  %v1276_v22 = vpack.c.bf16 %v1176_v16, %v1174_v4  ;;  %v1277_v48 = vpack.c.bf16 %v1177_v13, %v1175_v58  ;;  %v1047_v24 = vadd.f32 %v919_v14, %v517_v63  ;;  %v1048_v34 = vadd.f32 %v920_v55, %v518_v3  ;;  %786 = vperm.xlu1 %3426, %v4459_v32   ;;  %v3498_v14 = vld [vmem:[%s5951_s5 + $0x14] ss:$8 sps:$4 sm:$0xff]  }
 0x13e   :  { %1734 = vmatprep.mubr.bf16.mxu0 %v3608_v21 }
 0x13f   :  { %3609 = vtanh.bf16 %v1276_v22  ;;  %v1186_v49 = vadd.f32 %v4366_v30, %v1047_v24  ;;  %1735 = vmatmul.mubr.bf16.gmra.mrb[48].mxu0 %v3606_v15  ;;  %v257_v26 = vpop.permute.xlu1 %256  ;;  %v1187_v23 = vadd.f32 %v4374_v39, %v1048_v34 }
 0x140   :  { %3611 = vtanh.bf16 %v1277_v48  ;;  %v509_v33 = vmul.f32 %v4342_v18, %v257_v26  ;;  %v510_v57 = vmul.f32 %v4349_v20, %v257_v26 }
 0x141   :  { %v1282_v53 = vpack.c.bf16 %v1188_v25, %v1186_v49  ;;  %3427 = vset.pattern.permute.xlu1 %v5956_v1  ;;  %v1283_v32 = vpack.c.bf16 %v1189_v27, %v1187_v23  ;;  %v3496_v49 = vld [vmem:[%s5951_s5 + $0x10] ss:$8 sps:$4 sm:$0xff]  }
 0x142   :  { %381 = vperm.xlu1 %3427, %v103_v12   ;;  %v1039_v43 = vadd.f32 %v911_v31, %v509_v33  ;;  %v1040_v45 = vadd.f32 %v912_v5, %v510_v57  ;;  %v3499_v5 = vld [vmem:[%s5951_s5 + $0x20] ss:$8 sps:$4 sm:$0xff]   ;;  %v3504_v57 = vld [vmem:[%s5951_s5 + $0x34] ss:$8 sps:$4 sm:$0xff]  }
 0x143   :  { %v287_v29 = vpop.permute.xlu1 %286  ;;  %3613 = vtanh.bf16 %v1282_v53  ;;  %v107_v33 = vld [vmem:[%s5946_s0 + $0x1c8] sm:$0xff] }
 0x144   :  { %3615 = vtanh.bf16 %v1283_v32  ;;  %v1178_v3 = vadd.f32 %v4366_v30, %v1039_v43  ;;  %v1179_v4 = vadd.f32 %v4374_v39, %v1040_v45  ;;  %v521_v2 = vmul.f32 %v4342_v18, %v287_v29  ;;  %v272_v45 = vpop.permute.xlu0 %271 }
 0x145   :  { %v522_v60 = vmul.f32 %v4349_v20, %v287_v29 }
 0x146   :  { %3429 = vset.pattern.permute.xlu1 %v3992_v0 }
 0x147   :  { %794 = vperm.xlu1 %3429, %v103_v12   ;;  %v292_v35 = vpop.permute.xlu1 %291  ;;  %v3501_v12 = vld [vmem:[%s5951_s5 + $0x24] ss:$8 sps:$4 sm:$0xff]  }
 0x148   :  { %v523_v59 = vmul.f32 %v4342_v18, %v292_v35  ;;  %v524_v50 = vmul.f32 %v4349_v20, %v292_v35 }
 0x14a   :  { %v3610_v40 = vpop.eup %3609  ;;  %v1053_v10 = vadd.f32 %v925_v41, %v523_v59  ;;  %v1054_v16 = vadd.f32 %v926_v62, %v524_v50 }
 0x14b   :  { %v3612_v42 = vpop.eup %3611  ;;  %3430 = vset.pattern.permute.xlu1 %v5956_v1 }
 0x14c   :  { %1744 = vmatprep.mubr.bf16.mxu0 %v3612_v42  ;;  %386 = vperm.xlu1 %3430, %v104_v38   ;;  %v699_v51 = vpop.permute.xlu1 %698  ;;  %v1192_v26 = vadd.f32 %v4366_v30, %v1053_v10  ;;  %v1193_v23 = vadd.f32 %v4374_v39, %v1054_v16 }
 0x14d   :  { %v913_v52 = vmul.f32 %v4339_v17, %v699_v51  ;;  %v914_v61 = vmul.f32 %v4346_v19, %v699_v51  ;;  %1745 = vmatmul.mubr.bf16.gmra.mrb[52].mxu0 %v3610_v40  ;;  %v916_v40 = vmul.f32 %v4346_v19, %v4710_v54  ;;  %v515_v51 = vmul.f32 %v4342_v18, %v272_v45 }
 0x14e   :  { %v3614_v63 = vpop.eup %3613 }
 0x14f   :  { %v1041_v58 = vadd.f32 %v913_v52, %v511_v56  ;;  %v1042_v8 = vadd.f32 %v914_v61, %v512_v44  ;;  %v3616_v9 = vpop.eup %3615  ;;  %v3505_v56 = vld [vmem:[%s5951_s5 + $0x40] ss:$8 sps:$4 sm:$0xff]   ;;  %v516_v52 = vmul.f32 %v4349_v20, %v272_v45  ;;  %v929_v61 = vmul.f32 %v4339_v17, %v4721_v28 }
 0x150   :  { %3431 = vset.pattern.permute.xlu1 %v3992_v0  ;;  %v719_v13 = vpop.permute.xlu1 %718  ;;  %1774 = vmatprep.mubr.bf16.mxu1 %v3616_v9  ;;  %v111_v45 = vld [vmem:[%s5946_s0 + $0x1e8] sm:$0xff] }
 0x151   :  { %v1180_v55 = vadd.f32 %v4366_v30, %v1041_v58  ;;  %v1181_v15 = vadd.f32 %v4374_v39, %v1042_v8  ;;  %v923_v21 = vmul.f32 %v4339_v17, %v719_v13  ;;  %v924_v22 = vmul.f32 %v4346_v19, %v719_v13  ;;  %1775 = vmatmul.mubr.bf16.vlgmr.msra.gmra.mrb[0].mxu1 %v3614_v63  ;;  %v108_v8 = vld [vmem:[%s5946_s0 + $0x1d0] sm:$0xff] }
 0x152   :  { %798 = vperm.xlu1 %3431, %v104_v38   ;;  %2268 = vmatpush1.bf16.msra.mxu1 %v3493_v47  ;;  %v915_v38 = vmul.f32 %v4339_v17, %v4710_v54  ;;  %v3510_v54 = vld [vmem:[%s5951_s5 + $0x54] ss:$8 sps:$4 sm:$0xff]   ;;  %v930_v63 = vmul.f32 %v4346_v19, %v4721_v28  ;;  %v3508_v28 = vld [vmem:[%s5951_s5 + $0x50] ss:$8 sps:$4 sm:$0xff]  }
 0x153   :  { %v1278_v48 = vpack.c.bf16 %v1180_v55, %v1178_v3  ;;  %v1279_v24 = vpack.c.bf16 %v1181_v15, %v1179_v4  ;;  %v1051_v34 = vadd.f32 %v923_v21, %v521_v2  ;;  %v1052_v25 = vadd.f32 %v924_v22, %v522_v60  ;;  %2269 = vmatprep.subr.bf16.mxu1 %v3498_v14 }
 0x155   :  { %3617 = vtanh.bf16 %v1278_v48  ;;  %v1190_v27 = vadd.f32 %v4366_v30, %v1051_v34  ;;  %v1191_v53 = vadd.f32 %v4374_v39, %v1052_v25  ;;  %v267_v32 = vpop.permute.xlu1 %266 }
 0x156   :  { %3619 = vtanh.bf16 %v1279_v24  ;;  %802 = vperm.xlu1 %3431, %v4503_v37   ;;  %2270 = vmatpush1.bf16.msra.mxu1 %v3496_v49  ;;  %v3502_v37 = vld [vmem:[%s5951_s5 + $0x30] ss:$8 sps:$4 sm:$0xff]   ;;  %v513_v41 = vmul.f32 %v4342_v18, %v267_v32  ;;  %v514_v42 = vmul.f32 %v4349_v20, %v267_v32  ;;  %v3513_v24 = vld [vmem:[%s5951_s5 + $0x64] ss:$8 sps:$4 sm:$0xff]  }
 0x157   :  { %v1284_v29 = vpack.c.bf16 %v1192_v26, %v1190_v27  ;;  %v1285_v31 = vpack.c.bf16 %v1193_v23, %v1191_v53  ;;  %2271 = vmatprep.subr.bf16.mxu1 %v3501_v12  ;;  %v3511_v12 = vld [vmem:[%s5951_s5 + $0x60] ss:$8 sps:$4 sm:$0xff]  }
 0x158   :  { %v1043_v59 = vadd.f32 %v915_v38, %v513_v41  ;;  %v1044_v50 = vadd.f32 %v916_v40, %v514_v42  ;;  %v3519_v41 = vld [vmem:[%s5951_s5 + $0x84] ss:$8 sps:$4 sm:$0xff]  }
 0x159   :  { %3621 = vtanh.bf16 %v1284_v29  ;;  %v297_v35 = vpop.permute.xlu1 %296  ;;  %v3516_v29 = vld [vmem:[%s5951_s5 + $0x74] ss:$8 sps:$4 sm:$0xff]  }
 0x15a   :  { %3623 = vtanh.bf16 %v1285_v31  ;;  %3432 = vset.pattern.permute.xlu1 %v5956_v1  ;;  %2272 = vmatpush1.bf16.msra.mxu1 %v3499_v5  ;;  %v1182_v10 = vadd.f32 %v4366_v30, %v1043_v59  ;;  %v1183_v16 = vadd.f32 %v4374_v39, %v1044_v50  ;;  %v525_v55 = vmul.f32 %v4342_v18, %v297_v35 }
 0x15b   :  { %401 = vperm.xlu1 %3432, %v107_v33   ;;  %2273 = vmatprep.subr.bf16.mxu1 %v3504_v57  ;;  %v526_v15 = vmul.f32 %v4349_v20, %v297_v35 }
 0x15d   :  { %v302_v43 = vpop.permute.xlu1 %301 }
 0x15e   :  { %2274 = vmatpush1.bf16.msra.mxu1 %v3502_v37  ;;  %v527_v3 = vmul.f32 %v4342_v18, %v302_v43  ;;  %v528_v4 = vmul.f32 %v4349_v20, %v302_v43  ;;  %v312_v37 = vpop.permute.xlu0 %311 }
 0x15f   :  { %3435 = vset.pattern.permute.xlu1 %v3992_v0  ;;  %2275 = vmatprep.subr.bf16.mxu1 %v3507_v36  ;;  %v3514_v36 = vld [vmem:[%s5951_s5 + $0x70] ss:$8 sps:$4 sm:$0xff]   ;;  %v531_v50 = vmul.f32 %v4342_v18, %v312_v37 }
 0x160   :  { %v3618_v44 = vpop.eup %3617  ;;  %810 = vperm.xlu1 %3435, %v107_v33   ;;  %v1057_v21 = vadd.f32 %v929_v61, %v527_v3  ;;  %v1058_v22 = vadd.f32 %v930_v63, %v528_v4 }
 0x161   :  { %v3620_v62 = vpop.eup %3619 }
 0x162   :  { %1754 = vmatprep.mubr.bf16.mxu0 %v3620_v62  ;;  %v707_v58 = vpop.permute.xlu1 %706  ;;  %2276 = vmatpush1.bf16.msra.mxu1 %v3505_v56  ;;  %v1196_v31 = vadd.f32 %v4366_v30, %v1057_v21  ;;  %v1197_v5 = vadd.f32 %v4374_v39, %v1058_v22  ;;  %v317_v42 = vpop.permute.xlu0 %316  ;;  %v3517_v56 = vld [vmem:[%s5951_s5 + $0x80] ss:$8 sps:$4 sm:$0xff]  }
 0x163   :  { %v917_v47 = vmul.f32 %v4339_v17, %v707_v58  ;;  %v918_v9 = vmul.f32 %v4346_v19, %v707_v58  ;;  %1755 = vmatmul.mubr.bf16.gmra.mrb[56].mxu0 %v3618_v44  ;;  %2277 = vmatprep.subr.bf16.mxu1 %v3510_v54 }
 0x164   :  { %v3622_v2 = vpop.eup %3621  ;;  %3436 = vset.pattern.permute.xlu1 %v5956_v1 }
 0x165   :  { %v3624_v60 = vpop.eup %3623  ;;  %v1045_v13 = vadd.f32 %v917_v47, %v515_v51  ;;  %v1046_v14 = vadd.f32 %v918_v9, %v516_v52  ;;  %406 = vperm.xlu1 %3436, %v108_v8   ;;  %v532_v51 = vmul.f32 %v4349_v20, %v312_v37 }
 0x166   :  { %1784 = vmatprep.mubr.bf16.mxu1 %v3624_v60  ;;  %v727_v48 = vpop.permute.xlu1 %726  ;;  %2278 = vmatpush1.bf16.msra.mxu1 %v3508_v28  ;;  %v743_v58 = vpop.permute.xlu0 %742  ;;  %v533_v60 = vmul.f32 %v4342_v18, %v317_v42 }
 0x167   :  { %v1184_v34 = vadd.f32 %v4366_v30, %v1045_v13  ;;  %v1185_v25 = vadd.f32 %v4374_v39, %v1046_v14  ;;  %v927_v49 = vmul.f32 %v4339_v17, %v727_v48  ;;  %v928_v26 = vmul.f32 %v4346_v19, %v727_v48  ;;  %1785 = vmatmul.mubr.bf16.gmra.mrb[4].mxu1 %v3622_v2 }
 0x168   :  { %2279 = vmatprep.subr.bf16.mxu1 %v3513_v24  ;;  %v935_v14 = vmul.f32 %v4339_v17, %v743_v58 }
 0x169   :  { %v1280_v23 = vpack.c.bf16 %v1184_v34, %v1182_v10  ;;  %v1281_v27 = vpack.c.bf16 %v1185_v25, %v1183_v16  ;;  %v1055_v53 = vadd.f32 %v927_v49, %v525_v55  ;;  %v1056_v32 = vadd.f32 %v928_v26, %v526_v15  ;;  %3437 = vset.pattern.permute.xlu1 %v3992_v0  ;;  %v3525_v16 = vld [vmem:[%s5951_s5 + $0xa4] ss:$8 sps:$4 sm:$0xff]   ;;  %v112_v34 = vld [vmem:[%s5946_s0 + $0x1f0] sm:$0xff]  ;;  %v3523_v25 = vld [vmem:[%s5951_s5 + $0xa0] ss:$8 sps:$4 sm:$0xff]  }
 0x16a   :  { %814 = vperm.xlu1 %3437, %v108_v8   ;;  %2280 = vmatpush1.bf16.msra.mxu1 %v3511_v12  ;;  %v3520_v8 = vld [vmem:[%s5951_s5 + $0x90] ss:$8 sps:$4 sm:$0xff]   ;;  %v534_v10 = vmul.f32 %v4349_v20, %v317_v42  ;;  %v936_v55 = vmul.f32 %v4346_v19, %v743_v58 }
 0x16b   :  { %3625 = vtanh.bf16 %v1280_v23  ;;  %v1194_v33 = vadd.f32 %v4366_v30, %v1055_v53  ;;  %v1195_v57 = vadd.f32 %v4374_v39, %v1056_v32  ;;  %v307_v35 = vpop.permute.xlu1 %306  ;;  %2281 = vmatprep.subr.bf16.mxu1 %v3516_v29  ;;  %v1063_v23 = vadd.f32 %v935_v14, %v533_v60  ;;  %v1410_v53 = vld [vmem:[%s5950_s4] sm:$0x3] }
 0x16c   :  { %3627 = vtanh.bf16 %v1281_v27  ;;  %v529_v62 = vmul.f32 %v4342_v18, %v307_v35  ;;  %v530_v59 = vmul.f32 %v4349_v20, %v307_v35  ;;  %v1064_v27 = vadd.f32 %v936_v55, %v534_v10 }
 0x16d   :  { %v1286_v38 = vpack.c.bf16 %v1196_v31, %v1194_v33  ;;  %v1287_v40 = vpack.c.bf16 %v1197_v5, %v1195_v57  ;;  %v4893_v57 = vrot.slane %v1410_v53, %v4317_v7 }
 0x16e   :  { %818 = vperm.xlu1 %3437, %v4540_v11   ;;  %2282 = vmatpush1.bf16.msra.mxu1 %v3514_v36  ;;  %v3522_v11 = vld [vmem:[%s5951_s5 + $0x94] ss:$8 sps:$4 sm:$0xff]   ;;  %v1202_v36 = vadd.f32 %v4366_v30, %v1063_v23 }
 0x16f   :  { %3629 = vtanh.bf16 %v1286_v38  ;;  %2283 = vmatprep.subr.bf16.mxu1 %v3519_v41  ;;  %v1203_v38 = vadd.f32 %v4374_v39, %v1064_v27  ;;  %v3528_v41 = vld [vmem:[%s5951_s5 + $0xb4] ss:$8 sps:$4 sm:$0xff]  }
 0x170   :  { %3631 = vtanh.bf16 %v1287_v40  ;;  %v735_v43 = vpop.permute.xlu1 %734  ;;  %v3526_v40 = vld [vmem:[%s5951_s5 + $0xb0] ss:$8 sps:$4 sm:$0xff]  }
 0x171   :  { %v931_v44 = vmul.f32 %v4339_v17, %v735_v43  ;;  %v932_v54 = vmul.f32 %v4346_v19, %v735_v43  ;;  %v4905_v43 = vrot.slane %v1410_v53, %v4315_v6 }
 0x172   :  { %3438 = vset.pattern.permute.xlu1 %v5956_v1  ;;  %2284 = vmatpush1.bf16.msra.mxu1 %v3517_v56 }
 0x173   :  { %421 = vperm.xlu1 %3438, %v111_v45   ;;  %v1059_v52 = vadd.f32 %v931_v44, %v529_v62  ;;  %v1060_v63 = vadd.f32 %v932_v54, %v530_v59  ;;  %2285 = vmatprep.subr.bf16.mxu1 %v3522_v11 }
 0x174   :  { %v739_v61 = vpop.permute.xlu1 %738 }
 0x175   :  { %v933_v3 = vmul.f32 %v4339_v17, %v739_v61  ;;  %v934_v4 = vmul.f32 %v4346_v19, %v739_v61  ;;  %v1198_v13 = vadd.f32 %v4366_v30, %v1059_v52  ;;  %v1199_v15 = vadd.f32 %v4374_v39, %v1060_v63 }
 0x176   :  { %v3626_v47 = vpop.eup %3625  ;;  %2286 = vmatpush1.bf16.msra.mxu1 %v3520_v8 }
 0x177   :  { %v3628_v9 = vpop.eup %3627  ;;  %v1061_v2 = vadd.f32 %v933_v3, %v531_v50  ;;  %v1062_v28 = vadd.f32 %v934_v4, %v532_v51  ;;  %3440 = vset.pattern.permute.xlu1 %v3992_v0  ;;  %2287 = vmatprep.subr.bf16.mxu1 %v3525_v16  ;;  %v3529_v3 = vld [vmem:[%s5951_s5 + $0xc0] ss:$8 sps:$4 sm:$0xff]   ;;  %v3531_v4 = vld [vmem:[%s5951_s5 + $0xc4] ss:$8 sps:$4 sm:$0xff]  }
 0x178   :  { %826 = vperm.xlu1 %3440, %v111_v45   ;;  %1764 = vmatprep.mubr.bf16.mxu0 %v3628_v9  ;;  %v759_v45 = vpop.permute.xlu0 %758 }
 0x179   :  { %v1200_v21 = vadd.f32 %v4366_v30, %v1061_v2  ;;  %v1201_v22 = vadd.f32 %v4374_v39, %v1062_v28  ;;  %1765 = vmatmul.mubr.bf16.gmra.mrb[60].mxu0 %v3626_v47  ;;  %v322_v48 = vpop.permute.xlu1 %321  ;;  %v944_v23 = vmul.f32 %v4346_v19, %v759_v45 }
 0x17a   :  { %v3630_v24 = vpop.eup %3629  ;;  %2288 = vmatpush1.bf16.msra.mxu1 %v3523_v25  ;;  %v535_v29 = vmul.f32 %v4342_v18, %v322_v48  ;;  %v536_v31 = vmul.f32 %v4349_v20, %v322_v48 }
 0x17b   :  { %v3632_v49 = vpop.eup %3631  ;;  %v1288_v26 = vpack.c.bf16 %v1200_v21, %v1198_v13  ;;  %v1289_v12 = vpack.c.bf16 %v1201_v22, %v1199_v15  ;;  %2289 = vmatprep.subr.bf16.mxu1 %v3528_v41  ;;  %v3535_v41 = vld [vmem:[%s5951_s5 + $0xe0] ss:$8 sps:$4 sm:$0xff]  }
 0x17c   :  { %3441 = vset.pattern.permute.xlu1 %v5956_v1  ;;  %1794 = vmatprep.mubr.bf16.mxu1 %v3632_v49  ;;  %v332_v2 = vpop.permute.xlu0 %331  ;;  %v3532_v49 = vld [vmem:[%s5951_s5 + $0xd0] ss:$8 sps:$4 sm:$0xff]  }
 0x17d   :  { %3633 = vtanh.bf16 %v1288_v26  ;;  %426 = vperm.xlu1 %3441, %v112_v34   ;;  %1795 = vmatmul.mubr.bf16.gmra.mrb[8].mxu1 %v3630_v24  ;;  %v539_v13 = vmul.f32 %v4342_v18, %v332_v2  ;;  %v540_v14 = vmul.f32 %v4349_v20, %v332_v2  ;;  %v3534_v26 = vld [vmem:[%s5951_s5 + $0xd4] ss:$8 sps:$4 sm:$0xff]  }
 0x17e   :  { %3635 = vtanh.bf16 %v1289_v12  ;;  %v747_v32 = vpop.permute.xlu1 %746  ;;  %2290 = vmatpush1.bf16.msra.mxu1 %v3526_v40  ;;  %v943_v12 = vmul.f32 %v4339_v17, %v759_v45 }
 0x17f   :  { %v937_v5 = vmul.f32 %v4339_v17, %v747_v32  ;;  %v938_v33 = vmul.f32 %v4346_v19, %v747_v32  ;;  %2291 = vmatprep.subr.bf16.mxu1 %v3531_v4 }
 0x180   :  { %v337_v24 = vpop.permute.xlu0 %336 }
 0x181   :  { %v1065_v35 = vadd.f32 %v937_v5, %v535_v29  ;;  %v1066_v37 = vadd.f32 %v938_v33, %v536_v31  ;;  %3443 = vset.pattern.permute.xlu1 %v3992_v0  ;;  %v541_v27 = vmul.f32 %v4342_v18, %v337_v24  ;;  %v542_v53 = vmul.f32 %v4349_v20, %v337_v24  ;;  %v3540_v24 = vld [vmem:[%s5951_s5 + $0xf4] ss:$8 sps:$4 sm:$0xff]  }
 0x182   :  { %830 = vperm.xlu1 %3443, %v112_v34   ;;  %v1616_v42 = vpop.f32.mrb[0].mxu0  ;;  %2292 = vmatpush1.bf16.msra.mxu1 %v3529_v3 }
 0x183   :  { %v1204_v56 = vadd.f32 %v4366_v30, %v1065_v35  ;;  %v1205_v44 = vadd.f32 %v4374_v39, %v1066_v37  ;;  %v1618_v54 = vpop.f32.mrb[1].mxu0  ;;  %v327_v0 = vpop.permute.xlu1 %326  ;;  %v4910_v50 = vadd.f32 %v1616_v42, %v4893_v57  ;;  %2293 = vmatprep.subr.bf16.mxu1 %v3534_v26  ;;  %v3537_v42 = vld [vmem:[%s5951_s5 + $0xe4] ss:$8 sps:$4 sm:$0xff]  }
 0x184   :  { %v1620_v11 = vpop.f32.mrb[2].mxu0  ;;  %v4916_v61 = vadd.f32 %v1618_v54, %v4905_v43  ;;  %v537_v10 = vmul.f32 %v4342_v18, %v327_v0  ;;  %v538_v16 = vmul.f32 %v4349_v20, %v327_v0  ;;  %v1072_v0 = vadd.f32 %v944_v23, %v542_v53 }
 0x185   :  { %v1290_v62 = vpack.c.bf16 %v1204_v56, %v1202_v36  ;;  %v1291_v59 = vpack.c.bf16 %v1205_v44, %v1203_v38  ;;  %v4913_v51 = vadd.f32 %v1620_v11, %v4893_v57  ;;  %v1622_v52 = vpop.f32.mrb[3].mxu0  ;;  %v1071_v56 = vadd.f32 %v943_v12, %v541_v27 }
 0x186   :  { %v4919_v63 = vadd.f32 %v1622_v52, %v4905_v43  ;;  %834 = vperm.xlu1 %3443, %v4606_v46   ;;  %2294 = vmatpush1.bf16.msra.mxu1 %v3532_v49 }
 0x187   :  { %3637 = vtanh.bf16 %v1290_v62  ;;  %2295 = vmatprep.subr.bf16.mxu1 %v3537_v42 }
 0x188   :  { %v3634_v8 = vpop.eup %3633  ;;  %3639 = vtanh.bf16 %v1291_v59  ;;  %v751_v9 = vpop.permute.xlu1 %750 }
 0x189   :  { %v3636_v46 = vpop.eup %3635  ;;  %v939_v28 = vmul.f32 %v4339_v17, %v751_v9  ;;  %v940_v60 = vmul.f32 %v4346_v19, %v751_v9 }
 0x18a   :  { %1804 = vmatprep.mubr.bf16.mxu1 %v3636_v46  ;;  %2296 = vmatpush1.bf16.msra.mxu1 %v3535_v41 }
 0x18b   :  { %1805 = vmatmul.mubr.bf16.gmra.mrb[12].mxu1 %v3634_v8  ;;  %v1067_v15 = vadd.f32 %v939_v28, %v537_v10  ;;  %v1068_v21 = vadd.f32 %v940_v60, %v538_v16  ;;  %v1210_v28 = vadd.f32 %v4366_v30, %v1071_v56  ;;  %2297 = vmatprep.subr.bf16.mxu1 %v3540_v24 }
 0x18c   :  { %v755_v55 = vpop.permute.xlu1 %754 }
 0x18d   :  { %v941_v22 = vmul.f32 %v4339_v17, %v755_v55  ;;  %v942_v48 = vmul.f32 %v4346_v19, %v755_v55  ;;  %v1206_v32 = vadd.f32 %v4366_v30, %v1067_v15  ;;  %v1207_v29 = vadd.f32 %v4374_v39, %v1068_v21 }
 0x18f   :  { %v1069_v34 = vadd.f32 %v941_v22, %v539_v13  ;;  %v1070_v25 = vadd.f32 %v942_v48, %v540_v14  ;;  %v1211_v13 = vadd.f32 %v4374_v39, %v1072_v0  ;;  %v352_v14 = vpop.permute.xlu0 %351  ;;  %v3538_v48 = vld [vmem:[%s5951_s5 + $0xf0] ss:$8 sps:$4 sm:$0xff]  }
 0x190   :  { %2298 = vmatpush1.bf16.msra.mxu1 %v3538_v48  ;;  %v547_v41 = vmul.f32 %v4342_v18, %v352_v14 }
 0x191   :  { %v1208_v31 = vadd.f32 %v4366_v30, %v1069_v34  ;;  %v1209_v5 = vadd.f32 %v4374_v39, %v1070_v25  ;;  %v342_v33 = vpop.permute.xlu1 %341 }
 0x192   :  { %v3638_v35 = vpop.eup %3637  ;;  %v543_v44 = vmul.f32 %v4342_v18, %v342_v33  ;;  %v544_v11 = vmul.f32 %v4349_v20, %v342_v33 }
 0x193   :  { %v3640_v37 = vpop.eup %3639  ;;  %v1292_v36 = vpack.c.bf16 %v1208_v31, %v1206_v32  ;;  %v1293_v38 = vpack.c.bf16 %v1209_v5, %v1207_v29  ;;  %v1626_v40 = vpop.f32.mrb[4].mxu0 }
 0x194   :  { %v1628_v45 = vpop.f32.mrb[5].mxu0  ;;  %1814 = vmatprep.mubr.bf16.mxu1 %v3640_v37  ;;  %v4963_v62 = vadd.f32 %v1626_v40, %v4893_v57  ;;  %v357_v29 = vpop.permute.xlu0 %356 }
 0x195   :  { %3641 = vtanh.bf16 %v1292_v36  ;;  %v1630_v54 = vpop.f32.mrb[6].mxu0  ;;  %1815 = vmatmul.mubr.bf16.gmra.mrb[16].mxu1 %v3638_v35  ;;  %v4969_v4 = vadd.f32 %v1628_v45, %v4905_v43 }
 0x196   :  { %3643 = vtanh.bf16 %v1293_v38  ;;  %v4966_v59 = vadd.f32 %v1630_v54, %v4893_v57  ;;  %v1632_v52 = vpop.f32.mrb[7].mxu0  ;;  %v763_v3 = vpop.permute.xlu1 %762 }
 0x197   :  { %v4972_v8 = vadd.f32 %v1632_v52, %v4905_v43  ;;  %v945_v9 = vmul.f32 %v4339_v17, %v763_v3  ;;  %v946_v2 = vmul.f32 %v4346_v19, %v763_v3 }
 0x198   :  { %v775_v52 = vpop.permute.xlu0 %774 }
 0x199   :  { %v1073_v10 = vadd.f32 %v945_v9, %v543_v44  ;;  %v1074_v16 = vadd.f32 %v946_v2, %v544_v11  ;;  %v548_v44 = vmul.f32 %v4349_v20, %v352_v14  ;;  %v550_v14 = vmul.f32 %v4349_v20, %v357_v29 }
 0x19a   :  { %v951_v48 = vmul.f32 %v4339_v17, %v775_v52 }
 0x19b   :  { %v1212_v55 = vadd.f32 %v4366_v30, %v1073_v10  ;;  %v1213_v15 = vadd.f32 %v4374_v39, %v1074_v16  ;;  %v1636_v21 = vpop.f32.mrb[8].mxu0  ;;  %v347_v22 = vpop.permute.xlu1 %346 }
 0x19c   :  { %v1638_v34 = vpop.f32.mrb[9].mxu0  ;;  %v4991_v12 = vadd.f32 %v1636_v21, %v4893_v57  ;;  %v545_v40 = vmul.f32 %v4342_v18, %v347_v22  ;;  %v546_v42 = vmul.f32 %v4349_v20, %v347_v22 }
 0x19d   :  { %v1294_v25 = vpack.c.bf16 %v1212_v55, %v1210_v28  ;;  %v1295_v49 = vpack.c.bf16 %v1213_v15, %v1211_v13  ;;  %v1640_v26 = vpop.f32.mrb[10].mxu0  ;;  %v4997_v53 = vadd.f32 %v1638_v34, %v4905_v43  ;;  %v549_v28 = vmul.f32 %v4342_v18, %v357_v29 }
 0x19e   :  { %v4994_v23 = vadd.f32 %v1640_v26, %v4893_v57  ;;  %v1642_v27 = vpop.f32.mrb[11].mxu0  ;;  %v952_v26 = vmul.f32 %v4346_v19, %v775_v52 }
 0x19f   :  { %3645 = vtanh.bf16 %v1294_v25  ;;  %v5000_v32 = vadd.f32 %v1642_v27, %v4905_v43 }
 0x1a0   :  { %v3642_v31 = vpop.eup %3641  ;;  %3647 = vtanh.bf16 %v1295_v49  ;;  %v767_v33 = vpop.permute.xlu1 %766 }
 0x1a1   :  { %v3644_v35 = vpop.eup %3643  ;;  %v947_v36 = vmul.f32 %v4339_v17, %v767_v33  ;;  %v948_v38 = vmul.f32 %v4346_v19, %v767_v33 }
 0x1a2   :  { %1824 = vmatprep.mubr.bf16.mxu1 %v3644_v35 }
 0x1a3   :  { %1825 = vmatmul.mubr.bf16.gmra.mrb[20].mxu1 %v3642_v31  ;;  %v1075_v54 = vadd.f32 %v947_v36, %v545_v40  ;;  %v1076_v3 = vadd.f32 %v948_v38, %v546_v42  ;;  %v1079_v40 = vadd.f32 %v951_v48, %v549_v28 }
 0x1a4   :  { %v1646_v45 = vpop.f32.mrb[12].mxu0  ;;  %v771_v56 = vpop.permute.xlu1 %770 }
 0x1a5   :  { %v949_v0 = vmul.f32 %v4339_v17, %v771_v56  ;;  %v1648_v11 = vpop.f32.mrb[13].mxu0  ;;  %v950_v9 = vmul.f32 %v4346_v19, %v771_v56  ;;  %v5016_v10 = vadd.f32 %v1646_v45, %v4893_v57  ;;  %v1214_v24 = vadd.f32 %v4366_v30, %v1075_v54 }
 0x1a6   :  { %v1650_v2 = vpop.f32.mrb[14].mxu0  ;;  %v5023_v21 = vadd.f32 %v1648_v11, %v4905_v43  ;;  %v1215_v29 = vadd.f32 %v4374_v39, %v1076_v3  ;;  %v1218_v52 = vadd.f32 %v4366_v30, %v1079_v40 }
 0x1a7   :  { %v1077_v16 = vadd.f32 %v949_v0, %v547_v41  ;;  %v5019_v13 = vadd.f32 %v1650_v2, %v4893_v57  ;;  %v1652_v55 = vpop.f32.mrb[15].mxu0  ;;  %v1078_v15 = vadd.f32 %v950_v9, %v548_v44  ;;  %v1080_v41 = vadd.f32 %v952_v26, %v550_v14  ;;  %v791_v2 = vpop.permute.xlu0 %790 }
 0x1a8   :  { %v5026_v22 = vadd.f32 %v1652_v55, %v4905_v43 }
 0x1a9   :  { %v1216_v34 = vadd.f32 %v4366_v30, %v1077_v16  ;;  %v362_v49 = vpop.permute.xlu1 %361  ;;  %v1217_v31 = vadd.f32 %v4374_v39, %v1078_v15  ;;  %v1219_v3 = vadd.f32 %v4374_v39, %v1080_v41 }
 0x1aa   :  { %v3646_v27 = vpop.eup %3645  ;;  %v551_v45 = vmul.f32 %v4342_v18, %v362_v49  ;;  %v552_v56 = vmul.f32 %v4349_v20, %v362_v49 }
 0x1ab   :  { %v3648_v35 = vpop.eup %3647  ;;  %v1296_v36 = vpack.c.bf16 %v1216_v34, %v1214_v24  ;;  %v1297_v38 = vpack.c.bf16 %v1217_v31, %v1215_v29  ;;  %v372_v40 = vpop.permute.xlu0 %371 }
 0x1ac   :  { %1834 = vmatprep.mubr.bf16.mxu1 %v3648_v35 }
 0x1ad   :  { %3649 = vtanh.bf16 %v1296_v36  ;;  %1835 = vmatmul.mubr.bf16.gmra.mrb[24].mxu1 %v3646_v27 }
 0x1ae   :  { %3651 = vtanh.bf16 %v1297_v38  ;;  %v779_v42 = vpop.permute.xlu1 %778 }
 0x1af   :  { %v953_v44 = vmul.f32 %v4339_v17, %v779_v42  ;;  %v954_v54 = vmul.f32 %v4346_v19, %v779_v42 }
 0x1b1   :  { %v1081_v0 = vadd.f32 %v953_v44, %v551_v45  ;;  %v1082_v11 = vadd.f32 %v954_v54, %v552_v56  ;;  %v555_v44 = vmul.f32 %v4342_v18, %v372_v40 }
 0x1b2   :  { %v1656_v9 = vpop.f32.mrb[16].mxu0 }
 0x1b3   :  { %v1220_v28 = vadd.f32 %v4366_v30, %v1081_v0  ;;  %v1221_v16 = vadd.f32 %v4374_v39, %v1082_v11  ;;  %v1658_v55 = vpop.f32.mrb[17].mxu0  ;;  %v367_v14 = vpop.permute.xlu1 %366  ;;  %v5047_v34 = vadd.f32 %v1656_v9, %v4893_v57 }
 0x1b4   :  { %v1660_v15 = vpop.f32.mrb[18].mxu0  ;;  %v5053_v27 = vadd.f32 %v1658_v55, %v4905_v43  ;;  %v553_v56 = vmul.f32 %v4342_v18, %v367_v14  ;;  %v554_v54 = vmul.f32 %v4349_v20, %v367_v14 }
 0x1b5   :  { %v1298_v48 = vpack.c.bf16 %v1220_v28, %v1218_v52  ;;  %v1299_v24 = vpack.c.bf16 %v1221_v16, %v1219_v3  ;;  %v5050_v49 = vadd.f32 %v1660_v15, %v4893_v57  ;;  %v1662_v26 = vpop.f32.mrb[19].mxu0  ;;  %v556_v52 = vmul.f32 %v4349_v20, %v372_v40  ;;  %v377_v16 = vpop.permute.xlu0 %376 }
 0x1b6   :  { %v5056_v29 = vadd.f32 %v1662_v26, %v4905_v43  ;;  %v959_v15 = vmul.f32 %v4339_v17, %v791_v2  ;;  %v960_v26 = vmul.f32 %v4346_v19, %v791_v2 }
 0x1b7   :  { %3653 = vtanh.bf16 %v1298_v48 }
 0x1b8   :  { %v3650_v35 = vpop.eup %3649  ;;  %3655 = vtanh.bf16 %v1299_v24  ;;  %v783_v38 = vpop.permute.xlu1 %782 }
 0x1b9   :  { %v3652_v41 = vpop.eup %3651  ;;  %v955_v42 = vmul.f32 %v4339_v17, %v783_v38  ;;  %v956_v45 = vmul.f32 %v4346_v19, %v783_v38 }
 0x1ba   :  { %1844 = vmatprep.mubr.bf16.mxu1 %v3652_v41 }
 0x1bb   :  { %1845 = vmatmul.mubr.bf16.gmra.mrb[28].mxu1 %v3650_v35  ;;  %v1083_v3 = vadd.f32 %v955_v42, %v553_v56  ;;  %v1084_v55 = vadd.f32 %v956_v45, %v554_v54  ;;  %v557_v56 = vmul.f32 %v4342_v18, %v377_v16 }
 0x1bc   :  { %v1666_v0 = vpop.f32.mrb[20].mxu0  ;;  %v787_v11 = vpop.permute.xlu1 %786 }
 0x1bd   :  { %v957_v9 = vmul.f32 %v4339_v17, %v787_v11  ;;  %v1668_v28 = vpop.f32.mrb[21].mxu0  ;;  %v958_v48 = vmul.f32 %v4346_v19, %v787_v11  ;;  %v5073_v35 = vadd.f32 %v1666_v0, %v4893_v57  ;;  %v1222_v54 = vadd.f32 %v4366_v30, %v1083_v3 }
 0x1be   :  { %v1670_v24 = vpop.f32.mrb[22].mxu0  ;;  %v5079_v42 = vadd.f32 %v1668_v28, %v4905_v43  ;;  %v558_v11 = vmul.f32 %v4349_v20, %v377_v16  ;;  %v1087_v3 = vadd.f32 %v959_v15, %v557_v56 }
 0x1bf   :  { %v1085_v14 = vadd.f32 %v957_v9, %v555_v44  ;;  %v5076_v38 = vadd.f32 %v1670_v24, %v4893_v57  ;;  %v1672_v40 = vpop.f32.mrb[23].mxu0  ;;  %v1086_v41 = vadd.f32 %v958_v48, %v556_v52  ;;  %v1223_v52 = vadd.f32 %v4374_v39, %v1084_v55 }
 0x1c0   :  { %v5082_v45 = vadd.f32 %v1672_v40, %v4905_v43 }
 0x1c1   :  { %v1224_v2 = vadd.f32 %v4366_v30, %v1085_v14  ;;  %v382_v0 = vpop.permute.xlu1 %381  ;;  %v1225_v28 = vadd.f32 %v4374_v39, %v1086_v41  ;;  %v1088_v14 = vadd.f32 %v960_v26, %v558_v11 }
 0x1c2   :  { %v3654_v9 = vpop.eup %3653  ;;  %v559_v16 = vmul.f32 %v4342_v18, %v382_v0  ;;  %v560_v36 = vmul.f32 %v4349_v20, %v382_v0 }
 0x1c3   :  { %v3656_v24 = vpop.eup %3655  ;;  %v1300_v40 = vpack.c.bf16 %v1224_v2, %v1222_v54  ;;  %v1301_v31 = vpack.c.bf16 %v1225_v28, %v1223_v52  ;;  %v1226_v54 = vadd.f32 %v4366_v30, %v1087_v3  ;;  %v1227_v2 = vadd.f32 %v4374_v39, %v1088_v14 }
 0x1c4   :  { %1854 = vmatprep.mubr.bf16.mxu1 %v3656_v24 }
 0x1c5   :  { %3657 = vtanh.bf16 %v1300_v40  ;;  %1855 = vmatmul.mubr.bf16.gmra.mrb[32].mxu1 %v3654_v9  ;;  %v392_v9 = vpop.permute.xlu0 %391 }
 0x1c6   :  { %3659 = vtanh.bf16 %v1301_v31  ;;  %v795_v44 = vpop.permute.xlu1 %794 }
 0x1c7   :  { %v961_v55 = vmul.f32 %v4339_v17, %v795_v44  ;;  %v962_v41 = vmul.f32 %v4346_v19, %v795_v44 }
 0x1c9   :  { %v1089_v25 = vadd.f32 %v961_v55, %v559_v16  ;;  %v1090_v48 = vadd.f32 %v962_v41, %v560_v36  ;;  %v807_v16 = vpop.permute.xlu0 %806 }
 0x1ca   :  { %v1676_v52 = vpop.f32.mrb[24].mxu0  ;;  %v967_v37 = vmul.f32 %v4339_v17, %v807_v16 }
 0x1cb   :  { %v1228_v15 = vadd.f32 %v4366_v30, %v1089_v25  ;;  %v1229_v31 = vadd.f32 %v4374_v39, %v1090_v48  ;;  %v1678_v26 = vpop.f32.mrb[25].mxu0  ;;  %v387_v56 = vpop.permute.xlu1 %386  ;;  %v5103_v24 = vadd.f32 %v1676_v52, %v4893_v57 }
 0x1cc   :  { %v1680_v11 = vpop.f32.mrb[26].mxu0  ;;  %v5109_v40 = vadd.f32 %v1678_v26, %v4905_v43  ;;  %v561_v52 = vmul.f32 %v4342_v18, %v387_v56  ;;  %v563_v26 = vmul.f32 %v4342_v18, %v392_v9 }
 0x1cd   :  { %v1302_v0 = vpack.c.bf16 %v1228_v15, %v1226_v54  ;;  %v1303_v28 = vpack.c.bf16 %v1229_v31, %v1227_v2  ;;  %v5106_v36 = vadd.f32 %v1680_v11, %v4893_v57  ;;  %v1682_v44 = vpop.f32.mrb[27].mxu0  ;;  %v562_v15 = vmul.f32 %v4349_v20, %v387_v56 }
 0x1ce   :  { %v5112_v25 = vadd.f32 %v1682_v44, %v4905_v43  ;;  %v564_v11 = vmul.f32 %v4349_v20, %v392_v9  ;;  %v968_v9 = vmul.f32 %v4346_v19, %v807_v16 }
 0x1cf   :  { %3661 = vtanh.bf16 %v1302_v0 }
 0x1d0   :  { %v3658_v3 = vpop.eup %3657  ;;  %3663 = vtanh.bf16 %v1303_v28 }
 0x1d1   :  { %v3660_v55 = vpop.eup %3659  ;;  %v799_v41 = vpop.permute.xlu1 %798 }
 0x1d2   :  { %v963_v54 = vmul.f32 %v4339_v17, %v799_v41  ;;  %v964_v2 = vmul.f32 %v4346_v19, %v799_v41  ;;  %1864 = vmatprep.mubr.bf16.mxu1 %v3660_v55  ;;  %v397_v55 = vpop.permute.xlu0 %396 }
 0x1d3   :  { %1865 = vmatmul.mubr.bf16.gmra.mrb[36].mxu1 %v3658_v3  ;;  %v566_v46 = vmul.f32 %v4349_v20, %v397_v55 }
 0x1d4   :  { %v1686_v31 = vpop.f32.mrb[28].mxu0  ;;  %v1091_v0 = vadd.f32 %v963_v54, %v561_v52  ;;  %v1092_v48 = vadd.f32 %v964_v2, %v562_v15 }
 0x1d5   :  { %v803_v28 = vpop.permute.xlu1 %802  ;;  %v1688_v44 = vpop.f32.mrb[29].mxu0  ;;  %v5127_v5 = vadd.f32 %v1686_v31, %v4893_v57  ;;  %v1096_v58 = vadd.f32 %v968_v9, %v566_v46 }
 0x1d6   :  { %v965_v14 = vmul.f32 %v4339_v17, %v803_v28  ;;  %v966_v33 = vmul.f32 %v4346_v19, %v803_v28  ;;  %v1690_v41 = vpop.f32.mrb[30].mxu0  ;;  %v5135_v2 = vadd.f32 %v1688_v44, %v4905_v43  ;;  %v1230_v28 = vadd.f32 %v4366_v30, %v1091_v0 }
 0x1d7   :  { %v5130_v56 = vadd.f32 %v1690_v41, %v4893_v57  ;;  %v1692_v3 = vpop.f32.mrb[31].mxu0  ;;  %v565_v41 = vmul.f32 %v4342_v18, %v397_v55  ;;  %v1231_v16 = vadd.f32 %v4374_v39, %v1092_v48 }
 0x1d8   :  { %v1093_v54 = vadd.f32 %v965_v14, %v563_v26  ;;  %v1094_v52 = vadd.f32 %v966_v33, %v564_v11  ;;  %v5138_v15 = vadd.f32 %v1692_v3, %v4905_v43 }
 0x1d9   :  { %v1095_v31 = vadd.f32 %v967_v37, %v565_v41  ;;  %v412_v37 = vpop.permute.xlu0 %411 }
 0x1da   :  { %v3662_v60 = vpop.eup %3661  ;;  %v1232_v33 = vadd.f32 %v4366_v30, %v1093_v54  ;;  %v1233_v14 = vadd.f32 %v4374_v39, %v1094_v52  ;;  %v402_v11 = vpop.permute.xlu1 %401 }
 0x1db   :  { %v3664_v44 = vpop.eup %3663  ;;  %v567_v48 = vmul.f32 %v4342_v18, %v402_v11  ;;  %v568_v54 = vmul.f32 %v4349_v20, %v402_v11 }
 0x1dc   :  { %v1304_v0 = vpack.c.bf16 %v1232_v33, %v1230_v28  ;;  %v1305_v3 = vpack.c.bf16 %v1233_v14, %v1231_v16  ;;  %1874 = vmatprep.mubr.bf16.mxu1 %v3664_v44  ;;  %v1234_v28 = vadd.f32 %v4366_v30, %v1095_v31  ;;  %v1235_v16 = vadd.f32 %v4374_v39, %v1096_v58 }
 0x1dd   :  { %1875 = vmatmul.mubr.bf16.gmra.mrb[40].mxu1 %v3662_v60 }
 0x1de   :  { %3665 = vtanh.bf16 %v1304_v0 }
 0x1df   :  { %3667 = vtanh.bf16 %v1305_v3  ;;  %v811_v55 = vpop.permute.xlu1 %810 }
 0x1e0   :  { %v969_v52 = vmul.f32 %v4339_v17, %v811_v55  ;;  %v970_v47 = vmul.f32 %v4346_v19, %v811_v55 }
 0x1e2   :  { %v1097_v26 = vadd.f32 %v969_v52, %v567_v48  ;;  %v1098_v1 = vadd.f32 %v970_v47, %v568_v54  ;;  %v1696_v60 = vpop.f32.mrb[32].mxu0 }
 0x1e3   :  { %v1698_v33 = vpop.f32.mrb[33].mxu0  ;;  %v5159_v11 = vadd.f32 %v1696_v60, %v4893_v57 }
 0x1e4   :  { %v1236_v46 = vadd.f32 %v4366_v30, %v1097_v26  ;;  %v1237_v9 = vadd.f32 %v4374_v39, %v1098_v1  ;;  %v407_v41 = vpop.permute.xlu1 %406  ;;  %v1700_v14 = vpop.f32.mrb[34].mxu0  ;;  %v5165_v58 = vadd.f32 %v1698_v33, %v4905_v43 }
 0x1e5   :  { %5969 = vst [vmem:[#allocation10_spill] sm:$0xff] %v5159_v11  ;;  %v5162_v44 = vadd.f32 %v1700_v14, %v4893_v57  ;;  %v1702_v47 = vpop.f32.mrb[35].mxu0  ;;  %v569_v60 = vmul.f32 %v4342_v18, %v407_v41  ;;  %v570_v33 = vmul.f32 %v4349_v20, %v407_v41 }
 0x1e6   :  { %v1306_v0 = vpack.c.bf16 %v1236_v46, %v1234_v28  ;;  %v1307_v31 = vpack.c.bf16 %v1237_v9, %v1235_v16  ;;  %5971 = vst [vmem:[#allocation12_spill] sm:$0xff] %v5165_v58  ;;  %v5168_v3 = vadd.f32 %v1702_v47, %v4905_v43  ;;  %v417_v16 = vpop.permute.xlu0 %416  ;;  %v571_v46 = vmul.f32 %v4342_v18, %v412_v37 }
 0x1e7   :  { %5970 = vst [vmem:[#allocation11_spill] sm:$0xff] %v5162_v44  ;;  %v572_v9 = vmul.f32 %v4349_v20, %v412_v37 }
 0x1e8   :  { %3669 = vtanh.bf16 %v1306_v0 }
 0x1e9   :  { %v3666_v55 = vpop.eup %3665  ;;  %3671 = vtanh.bf16 %v1307_v31  ;;  %v815_v48 = vpop.permute.xlu1 %814 }
 0x1ea   :  { %v3668_v54 = vpop.eup %3667  ;;  %v971_v52 = vmul.f32 %v4339_v17, %v815_v48  ;;  %v972_v28 = vmul.f32 %v4346_v19, %v815_v48 }
 0x1eb   :  { %1884 = vmatprep.mubr.bf16.mxu1 %v3668_v54 }
 0x1ec   :  { %1885 = vmatmul.mubr.bf16.gmra.mrb[44].mxu1 %v3666_v55  ;;  %v1706_v14 = vpop.f32.mrb[36].mxu0  ;;  %v1099_v47 = vadd.f32 %v971_v52, %v569_v60  ;;  %v1100_v1 = vadd.f32 %v972_v28, %v570_v33  ;;  %v823_v55 = vpop.permute.xlu0 %822 }
 0x1ed   :  { %v819_v0 = vpop.permute.xlu1 %818  ;;  %v1708_v31 = vpop.f32.mrb[37].mxu0  ;;  %v5183_v7 = vadd.f32 %v1706_v14, %v4893_v57 }
 0x1ee   :  { %v973_v26 = vmul.f32 %v4339_v17, %v819_v0  ;;  %v974_v48 = vmul.f32 %v4346_v19, %v819_v0  ;;  %v1710_v6 = vpop.f32.mrb[38].mxu0  ;;  %v5189_v52 = vadd.f32 %v1708_v31, %v4905_v43  ;;  %v1238_v60 = vadd.f32 %v4366_v30, %v1099_v47 }
 0x1ef   :  { %5972 = vst [vmem:[#allocation13_spill] sm:$0xff] %v5183_v7  ;;  %v5186_v41 = vadd.f32 %v1710_v6, %v4893_v57  ;;  %v1712_v54 = vpop.f32.mrb[39].mxu0  ;;  %v1239_v14 = vadd.f32 %v4374_v39, %v1100_v1  ;;  %v573_v31 = vmul.f32 %v4342_v18, %v417_v16  ;;  %v975_v47 = vmul.f32 %v4339_v17, %v823_v55 }
 0x1f0   :  { %v1101_v11 = vadd.f32 %v973_v26, %v571_v46  ;;  %v1102_v37 = vadd.f32 %v974_v48, %v572_v9  ;;  %5974 = vst [vmem:[#allocation15_spill] sm:$0xff] %v5189_v52  ;;  %v5192_v28 = vadd.f32 %v1712_v54, %v4905_v43  ;;  %v574_v48 = vmul.f32 %v4349_v20, %v417_v16 }
 0x1f1   :  { %5973 = vst [vmem:[#allocation14_spill] sm:$0xff] %v5186_v41  ;;  %v976_v54 = vmul.f32 %v4346_v19, %v823_v55 }
 0x1f2   :  { %5975 = vst [vmem:[#allocation16_spill] sm:$0xff] %v5192_v28  ;;  %v1240_v6 = vadd.f32 %v4366_v30, %v1101_v11  ;;  %v1241_v0 = vadd.f32 %v4374_v39, %v1102_v37  ;;  %v422_v46 = vpop.permute.xlu1 %421  ;;  %v1103_v11 = vadd.f32 %v975_v47, %v573_v31 }
 0x1f3   :  { %v3670_v9 = vpop.eup %3669  ;;  %v1104_v37 = vadd.f32 %v976_v54, %v574_v48  ;;  %v575_v41 = vmul.f32 %v4342_v18, %v422_v46  ;;  %v576_v52 = vmul.f32 %v4349_v20, %v422_v46 }
 0x1f4   :  { %v3672_v33 = vpop.eup %3671  ;;  %v1308_v7 = vpack.c.bf16 %v1240_v6, %v1238_v60  ;;  %v1309_v1 = vpack.c.bf16 %v1241_v0, %v1239_v14 }
 0x1f5   :  { %1894 = vmatprep.mubr.bf16.mxu1 %v3672_v33  ;;  %v1242_v33 = vadd.f32 %v4366_v30, %v1103_v11 }
 0x1f6   :  { %3673 = vtanh.bf16 %v1308_v7  ;;  %1895 = vmatmul.mubr.bf16.gmra.mrb[48].mxu1 %v3670_v9  ;;  %v1243_v7 = vadd.f32 %v4374_v39, %v1104_v37 }
 0x1f7   :  { %3675 = vtanh.bf16 %v1309_v1  ;;  %v827_v26 = vpop.permute.xlu1 %826  ;;  %v432_v1 = vpop.permute.xlu0 %431 }
 0x1f8   :  { %v977_v16 = vmul.f32 %v4339_v17, %v827_v26  ;;  %v978_v28 = vmul.f32 %v4346_v19, %v827_v26 }
 0x1fa   :  { %v1105_v44 = vadd.f32 %v977_v16, %v575_v41  ;;  %v1106_v55 = vadd.f32 %v978_v28, %v576_v52  ;;  %v1716_v58 = vpop.f32.mrb[40].mxu0 }
 0x1fb   :  { %v1718_v60 = vpop.f32.mrb[41].mxu0  ;;  %v5215_v46 = vadd.f32 %v1716_v58, %v4893_v57 }
 0x1fc   :  { %v1244_v14 = vadd.f32 %v4366_v30, %v1105_v44  ;;  %v1245_v6 = vadd.f32 %v4374_v39, %v1106_v55  ;;  %v427_v0 = vpop.permute.xlu1 %426  ;;  %v1720_v9 = vpop.f32.mrb[42].mxu0  ;;  %v5221_v26 = vadd.f32 %v1718_v60, %v4905_v43 }
 0x1fd   :  { %v5218_v31 = vadd.f32 %v1720_v9, %v4893_v57  ;;  %v1722_v41 = vpop.f32.mrb[43].mxu0  ;;  %v577_v55 = vmul.f32 %v4342_v18, %v427_v0  ;;  %v578_v60 = vmul.f32 %v4349_v20, %v427_v0 }
 0x1fe   :  { %v1310_v52 = vpack.c.bf16 %v1244_v14, %v1242_v33  ;;  %v1311_v28 = vpack.c.bf16 %v1245_v6, %v1243_v7  ;;  %v5224_v48 = vadd.f32 %v1722_v41, %v4905_v43  ;;  %v579_v7 = vmul.f32 %v4342_v18, %v432_v1 }
 0x1ff   :  { %v580_v14 = vmul.f32 %v4349_v20, %v432_v1 }
 0x200   :  { %3677 = vtanh.bf16 %v1310_v52 }
 0x201   :  { %v3674_v47 = vpop.eup %3673  ;;  %3679 = vtanh.bf16 %v1311_v28  ;;  %v831_v54 = vpop.permute.xlu1 %830 }
 0x202   :  { %v3676_v11 = vpop.eup %3675  ;;  %v979_v37 = vmul.f32 %v4339_v17, %v831_v54  ;;  %v980_v16 = vmul.f32 %v4346_v19, %v831_v54 }
 0x203   :  { %1904 = vmatprep.mubr.bf16.mxu1 %v3676_v11 }
 0x204   :  { %1905 = vmatmul.mubr.bf16.gmra.mrb[52].mxu1 %v3674_v47  ;;  %v1726_v33 = vpop.f32.mrb[44].mxu0  ;;  %v1107_v6 = vadd.f32 %v979_v37, %v577_v55  ;;  %v1108_v52 = vadd.f32 %v980_v16, %v578_v60 }
 0x205   :  { %v835_v9 = vpop.permute.xlu1 %834  ;;  %v1728_v41 = vpop.f32.mrb[45].mxu0  ;;  %v5239_v58 = vadd.f32 %v1726_v33, %v4893_v57 }
 0x206   :  { %v981_v28 = vmul.f32 %v4339_v17, %v835_v9  ;;  %v982_v44 = vmul.f32 %v4346_v19, %v835_v9  ;;  %v1730_v54 = vpop.f32.mrb[46].mxu0  ;;  %v5245_v20 = vadd.f32 %v1728_v41, %v4905_v43  ;;  %v1246_v17 = vadd.f32 %v4366_v30, %v1107_v6  ;;  %v3541_v9 = vld [vmem:[#allocation2] sm:$0xff]  }
 0x207   :  { %v5242_v0 = vadd.f32 %v1730_v54, %v4893_v57  ;;  %v1732_v47 = vpop.f32.mrb[47].mxu0  ;;  %v1247_v37 = vadd.f32 %v4374_v39, %v1108_v52  ;;  %2884 = vmatpush1.bf16.msra.mxu0 %v3541_v9  ;;  %v5976_v6 = vmov 0  }
 0x208   :  { %v1109_v11 = vadd.f32 %v981_v28, %v579_v7  ;;  %v1110_v18 = vadd.f32 %v982_v44, %v580_v14  ;;  %v5248_v1 = vadd.f32 %v1732_v47, %v4905_v43  ;;  %2885 = vmatprep.subr.bf16.mxu0 %v5976_v6 }
 0x209   :  { %v1957_v19 = vpack.c.bf16 %v5242_v0, %v5239_v58 }
 0x20a   :  { %v1248_v16 = vadd.f32 %v4366_v30, %v1109_v11  ;;  %v1249_v55 = vadd.f32 %v4374_v39, %v1110_v18  ;;  %v1958_v44 = vpack.c.bf16 %v5248_v1, %v5245_v20  ;;  %v5977_v30 = vpack.c.bf16 %v4919_v63, %v4916_v61  ;;  %v3553_v20 = vld [vmem:[#allocation2 + $0x60] sm:$0xff]  }
 0x20b   :  { %v3678_v60 = vpop.eup %3677  ;;  %v5978_v63 = vpack.c.bf16 %v4913_v51, %v4910_v50  ;;  %v5980_v50 = vpack.c.bf16 %v4966_v59, %v4963_v62 }
 0x20c   :  { %v3680_v33 = vpop.eup %3679  ;;  %v1312_v7 = vpack.c.bf16 %v1248_v16, %v1246_v17  ;;  %v1313_v14 = vpack.c.bf16 %v1249_v55, %v1247_v37  ;;  %v3542_v17 = vld [vmem:[#allocation2 + $0x8] sm:$0xff]   ;;  %v5979_v55 = vpack.c.bf16 %v4972_v8, %v4969_v4 }
 0x20d   :  { %1914 = vmatprep.mubr.bf16.mxu1 %v3680_v33  ;;  %2886 = vmatpush1.bf16.msra.mxu0 %v3542_v17 }
 0x20e   :  { %3681 = vtanh.bf16 %v1312_v7  ;;  %1915 = vmatmul.mubr.bf16.gmra.mrb[56].mxu1 %v3678_v60  ;;  %2887 = vmatprep.subr.bf16.mxu0 %v5976_v6  ;;  %v3543_v7 = vld [vmem:[#allocation2 + $0x10] sm:$0xff]  }
 0x20f   :  { %3683 = vtanh.bf16 %v1313_v14  ;;  %v5981_v14 = vpack.c.bf16 %v5000_v32, %v4997_v53  ;;  %v3544_v32 = vld [vmem:[#allocation2 + $0x18] sm:$0xff]  }
 0x210   :  { %3685 = vtanh.bf16 %v5977_v30 }
 0x211   :  { %3687 = vtanh.bf16 %v5978_v63  ;;  %2888 = vmatpush1.bf16.msra.mxu0 %v3543_v7 }
 0x212   :  { %v1736_v39 = vpop.f32.mrb[48].mxu0  ;;  %3689 = vtanh.bf16 %v5979_v55  ;;  %2889 = vmatprep.subr.bf16.mxu0 %v5976_v6  ;;  %v5982_v55 = vpack.c.bf16 %v4994_v23, %v4991_v12  ;;  %v6001_v12 = vld [vmem:[#allocation14_spill] sm:$0xff] }
 0x213   :  { %v1738_v41 = vpop.f32.mrb[49].mxu0  ;;  %v5263_v28 = vadd.f32 %v1736_v39, %v4893_v57  ;;  %3691 = vtanh.bf16 %v5980_v50 }
 0x214   :  { %v1740_v52 = vpop.f32.mrb[50].mxu0  ;;  %v5269_v11 = vadd.f32 %v1738_v41, %v4905_v43  ;;  %3693 = vtanh.bf16 %v5981_v14 }
 0x215   :  { %v5266_v54 = vadd.f32 %v1740_v52, %v4893_v57  ;;  %v1742_v47 = vpop.f32.mrb[51].mxu0  ;;  %2890 = vmatpush1.bf16.msra.mxu0 %v3544_v32  ;;  %3695 = vtanh.bf16 %v5982_v55 }
 0x216   :  { %v5272_v18 = vadd.f32 %v1742_v47, %v4905_v43  ;;  %2891 = vmatprep.subr.bf16.mxu0 %v5976_v6 }
 0x217   :  { %v1959_v61 = vpack.c.bf16 %v5266_v54, %v5263_v28 }
 0x218   :  { %v1960_v37 = vpack.c.bf16 %v5272_v18, %v5269_v11 }
 0x219   :  { %v3682_v16 = vpop.eup %3681 }
 0x21a   :  { %v3684_v60 = vpop.eup %3683 }
 0x21b   :  { %1924 = vmatprep.mubr.bf16.mxu1 %v3684_v60  ;;  %v3686_v33 = vpop.eup %3685 }
 0x21c   :  { %1925 = vmatmul.mubr.bf16.gmra.mrb[60].mxu1 %v3682_v16  ;;  %v3688_v8 = vpop.eup %3687 }
 0x21d   :  { %2299 = vmatprep.mubr.bf16.mxu1 %v3686_v33  ;;  %v3690_v62 = vpop.eup %3689 }
 0x21e   :  { %v3692_v23 = vpop.eup %3691 }
 0x220   :  { %v1746_v51 = vpop.f32.mrb[52].mxu0 }
 0x221   :  { %v1748_v9 = vpop.f32.mrb[53].mxu0  ;;  %v5292_v30 = vadd.f32 %v1746_v51, %v4893_v57  ;;  %v5983_v51 = vpack.c.bf16 %v5026_v22, %v5023_v21  ;;  %v5984_v21 = vpack.c.bf16 %v5019_v13, %v5016_v10  ;;  %v5985_v22 = vpack.c.bf16 %v5056_v29, %v5053_v27  ;;  %v3546_v10 = vld [vmem:[#allocation2 + $0x28] sm:$0xff]  }
 0x222   :  { %v1750_v4 = vpop.f32.mrb[54].mxu0  ;;  %v5299_v59 = vadd.f32 %v1748_v9, %v4905_v43  ;;  %v5987_v13 = vpack.c.bf16 %v5082_v45, %v5079_v42 }
 0x223   :  { %v5295_v39 = vadd.f32 %v1750_v4, %v4893_v57  ;;  %v1752_v41 = vpop.f32.mrb[55].mxu0  ;;  %3697 = vtanh.bf16 %v5983_v51  ;;  %v3694_v4 = vpop.eup %3693 }
 0x224   :  { %v5302_v53 = vadd.f32 %v1752_v41, %v4905_v43  ;;  %2300 = vmatmul.mubr.bf16.vlgmr.msra.gmra.mrb[64].mxu1 %v3688_v8  ;;  %v1776_v47 = vpop.f32.mrb[0].mxu1  ;;  %v3545_v8 = vld [vmem:[#allocation2 + $0x20] sm:$0xff]   ;;  %3699 = vtanh.bf16 %v5984_v21  ;;  %v3696_v41 = vpop.eup %3695  ;;  %v3547_v21 = vld [vmem:[#allocation2 + $0x30] sm:$0xff]  }
 0x225   :  { %v1961_v52 = vpack.c.bf16 %v5295_v39, %v5292_v30  ;;  %2309 = vmatprep.mubr.bf16.mxu1 %v3690_v62  ;;  %v1778_v63 = vpop.f32.mrb[1].mxu1  ;;  %v5313_v60 = vadd.f32 %v1776_v47, %v4893_v57  ;;  %2892 = vmatpush1.bf16.msra.mxu0 %v3545_v8  ;;  %3701 = vtanh.bf16 %v5985_v22 }
 0x226   :  { %v1962_v17 = vpack.c.bf16 %v5302_v53, %v5299_v59  ;;  %v1780_v16 = vpop.f32.mrb[2].mxu1  ;;  %v5322_v7 = vadd.f32 %v1778_v63, %v4905_v43  ;;  %2893 = vmatprep.subr.bf16.mxu0 %v5976_v6  ;;  %v5986_v63 = vpack.c.bf16 %v5050_v49, %v5047_v34  ;;  %v3555_v59 = vld [vmem:[#allocation2 + $0x70] sm:$0xff]  }
 0x227   :  { %v5316_v33 = vadd.f32 %v1780_v16, %v4893_v57  ;;  %v1782_v50 = vpop.f32.mrb[3].mxu1 }
 0x228   :  { %v5325_v14 = vadd.f32 %v1782_v50, %v4905_v43  ;;  %3703 = vtanh.bf16 %v5986_v63 }
 0x229   :  { %3705 = vtanh.bf16 %v5987_v13  ;;  %2894 = vmatpush1.bf16.msra.mxu0 %v3546_v10  ;;  %v5989_v13 = vpack.c.bf16 %v5112_v25, %v5109_v40  ;;  %v3551_v10 = vld [vmem:[#allocation2 + $0x50] sm:$0xff]  }
 0x22a   :  { %2895 = vmatprep.subr.bf16.mxu0 %v5976_v6 }
 0x22c   :  { %2310 = vmatmul.mubr.bf16.gmra.mrb[68].mxu1 %v3692_v23 }
 0x22d   :  { %2319 = vmatprep.mubr.bf16.mxu1 %v3694_v4  ;;  %2896 = vmatpush1.bf16.msra.mxu0 %v3547_v21 }
 0x22e   :  { %v3698_v62 = vpop.eup %3697  ;;  %2897 = vmatprep.subr.bf16.mxu0 %v5976_v6 }
 0x22f   :  { %v3700_v49 = vpop.eup %3699 }
 0x230   :  { %v3702_v23 = vpop.eup %3701 }
 0x234   :  { %2320 = vmatmul.mubr.bf16.gmra.mrb[72].mxu1 %v3696_v41 }
 0x235   :  { %2329 = vmatprep.mubr.bf16.mxu1 %v3698_v62 }
 0x236   :  { %v1756_v32 = vpop.f32.mrb[56].mxu0 }
 0x237   :  { %v1758_v47 = vpop.f32.mrb[57].mxu0  ;;  %v5345_v27 = vadd.f32 %v1756_v32, %v4893_v57 }
 0x238   :  { %v1760_v16 = vpop.f32.mrb[58].mxu0  ;;  %v5351_v50 = vadd.f32 %v1758_v47, %v4905_v43 }
 0x239   :  { %v5348_v29 = vadd.f32 %v1760_v16, %v4893_v57  ;;  %v1762_v55 = vpop.f32.mrb[59].mxu0  ;;  %v5988_v16 = vpack.c.bf16 %v5076_v38, %v5073_v35  ;;  %v5991_v35 = vpack.c.bf16 %v5138_v15, %v5135_v2  ;;  %v5992_v2 = vpack.c.bf16 %v5130_v56, %v5127_v5 }
 0x23a   :  { %v5354_v51 = vadd.f32 %v1762_v55, %v4905_v43  ;;  %v1786_v34 = vpop.f32.mrb[4].mxu1  ;;  %v3704_v55 = vpop.eup %3703 }
 0x23b   :  { %v1963_v42 = vpack.c.bf16 %v5348_v29, %v5345_v27  ;;  %v1788_v45 = vpop.f32.mrb[5].mxu1  ;;  %v5362_v22 = vadd.f32 %v1786_v34, %v4893_v57  ;;  %3707 = vtanh.bf16 %v5988_v16  ;;  %v3706_v34 = vpop.eup %3705  ;;  %v6006_v27 = vpack.c.bf16 %v5325_v14, %v5322_v7 }
 0x23c   :  { %v1964_v4 = vpack.c.bf16 %v5354_v51, %v5351_v50  ;;  %2330 = vmatmul.mubr.bf16.gmra.mrb[76].mxu1 %v3700_v49  ;;  %v1790_v8 = vpop.f32.mrb[6].mxu1  ;;  %v5368_v32 = vadd.f32 %v1788_v45, %v4905_v43  ;;  %3709 = vtanh.bf16 %v5989_v13  ;;  %v3548_v49 = vld [vmem:[#allocation2 + $0x38] sm:$0xff]   ;;  %v5990_v45 = vpack.c.bf16 %v5106_v36, %v5103_v24  ;;  %v5993_v13 = vld [vmem:[#allocation12_spill] sm:$0xff] }
 0x23d   :  { %v5365_v41 = vadd.f32 %v1790_v8, %v4893_v57  ;;  %2339 = vmatprep.mubr.bf16.mxu1 %v3702_v23  ;;  %v1792_v62 = vpop.f32.mrb[7].mxu1  ;;  %2898 = vmatpush1.bf16.msra.mxu0 %v3548_v49  ;;  %v3556_v51 = vld [vmem:[#allocation2 + $0x78] sm:$0xff]   ;;  %v6007_v14 = vpack.c.bf16 %v5316_v33, %v5313_v60 }
 0x23e   :  { %v5371_v47 = vadd.f32 %v1792_v62, %v4905_v43  ;;  %3711 = vtanh.bf16 %v5990_v45  ;;  %2899 = vmatprep.subr.bf16.mxu0 %v5976_v6  ;;  %v3549_v45 = vld [vmem:[#allocation2 + $0x40] sm:$0xff]  }
 0x23f   :  { %3713 = vtanh.bf16 %v5991_v35 }
 0x240   :  { %3715 = vtanh.bf16 %v5992_v2 }
 0x241   :  { %2900 = vmatpush1.bf16.msra.mxu0 %v3549_v45 }
 0x242   :  { %2901 = vmatprep.subr.bf16.mxu0 %v5976_v6 }
 0x244   :  { %2340 = vmatmul.mubr.bf16.gmra.mrb[80].mxu1 %v3704_v55  ;;  %v5994_v55 = vpack.c.bf16 %v5168_v3, %v5993_v13  ;;  %v5995_v13 = vld [vmem:[#allocation11_spill] sm:$0xff] }
 0x245   :  { %2349 = vmatprep.mubr.bf16.mxu1 %v3706_v34 }
 0x246   :  { %v3708_v38 = vpop.eup %3707  ;;  %3717 = vtanh.bf16 %v5994_v55  ;;  %v5996_v55 = vld [vmem:[#allocation10_spill] sm:$0xff] }
 0x247   :  { %v3710_v23 = vpop.eup %3709  ;;  %v5997_v45 = vpack.c.bf16 %v5995_v13, %v5996_v55  ;;  %v6004_v13 = vpack.c.bf16 %v5224_v48, %v5221_v26 }
 0x249   :  { %v3712_v35 = vpop.eup %3711  ;;  %3719 = vtanh.bf16 %v5997_v45 }
 0x24a   :  { %v3714_v3 = vpop.eup %3713 }
 0x24c   :  { %2350 = vmatmul.mubr.bf16.gmra.mrb[84].mxu1 %v3708_v38  ;;  %v1766_v40 = vpop.f32.mrb[60].mxu0 }
 0x24d   :  { %2359 = vmatprep.mubr.bf16.mxu1 %v3710_v23  ;;  %v1768_v25 = vpop.f32.mrb[61].mxu0  ;;  %v5392_v21 = vadd.f32 %v1766_v40, %v4893_v57 }
 0x24e   :  { %v1770_v8 = vpop.f32.mrb[62].mxu0  ;;  %v5401_v15 = vadd.f32 %v1768_v25, %v4905_v43 }
 0x24f   :  { %v5395_v24 = vadd.f32 %v1770_v8, %v4893_v57  ;;  %v1772_v36 = vpop.f32.mrb[63].mxu0 }
 0x250   :  { %v5404_v62 = vadd.f32 %v1772_v36, %v4905_v43  ;;  %v1796_v16 = vpop.f32.mrb[8].mxu1  ;;  %v3550_v36 = vld [vmem:[#allocation2 + $0x48] sm:$0xff]  }
 0x251   :  { %v1965_v34 = vpack.c.bf16 %v5395_v24, %v5392_v21  ;;  %v1798_v49 = vpop.f32.mrb[9].mxu1  ;;  %v5414_v38 = vadd.f32 %v1796_v16, %v4893_v57  ;;  %2902 = vmatpush1.bf16.msra.mxu0 %v3550_v36  ;;  %v6002_v16 = vld [vmem:[#allocation13_spill] sm:$0xff] }
 0x252   :  { %v1966_v5 = vpack.c.bf16 %v5404_v62, %v5401_v15  ;;  %v1800_v56 = vpop.f32.mrb[10].mxu1  ;;  %v5420_v25 = vadd.f32 %v1798_v49, %v4905_v43  ;;  %2903 = vmatprep.subr.bf16.mxu0 %v5976_v6  ;;  %v5998_v49 = vld [vmem:[#allocation16_spill] sm:$0xff]  ;;  %v6003_v36 = vpack.c.bf16 %v6001_v12, %v6002_v16 }
 0x253   :  { %v5417_v23 = vadd.f32 %v1800_v56, %v4893_v57  ;;  %v1802_v40 = vpop.f32.mrb[11].mxu1  ;;  %v5999_v56 = vld [vmem:[#allocation15_spill] sm:$0xff] }
 0x254   :  { %v5423_v8 = vadd.f32 %v1802_v40, %v4905_v43  ;;  %2360 = vmatmul.mubr.bf16.gmra.mrb[88].mxu1 %v3712_v35  ;;  %v6000_v35 = vpack.c.bf16 %v5998_v49, %v5999_v56  ;;  %v3716_v40 = vpop.eup %3715 }
 0x255   :  { %2369 = vmatprep.mubr.bf16.mxu1 %v3714_v3  ;;  %v3718_v63 = vpop.eup %3717  ;;  %2904 = vmatpush1.bf16.msra.mxu0 %v3551_v10 }
 0x256   :  { %3721 = vtanh.bf16 %v6000_v35  ;;  %2905 = vmatprep.subr.bf16.mxu0 %v5976_v6  ;;  %v3720_v12 = vpop.eup %3719  ;;  %v3552_v35 = vld [vmem:[#allocation2 + $0x58] sm:$0xff]  }
 0x257   :  { %3723 = vtanh.bf16 %v6003_v36 }
 0x258   :  { %3725 = vtanh.bf16 %v6004_v13 }
 0x259   :  { %2906 = vmatpush1.bf16.msra.mxu0 %v3552_v35  ;;  %v3554_v35 = vld [vmem:[#allocation2 + $0x68] sm:$0xff]  }
 0x25a   :  { %2907 = vmatprep.subr.bf16.mxu0 %v5976_v6 }
 0x25c   :  { %2370 = vmatmul.mubr.bf16.gmra.mrb[92].mxu1 %v3716_v40 }
 0x25d   :  { %2379 = vmatprep.mubr.bf16.mxu1 %v3718_v63  ;;  %2908 = vmatpush1.bf16.msra.mxu0 %v3553_v20 }
 0x25e   :  { %v1806_v2 = vpop.f32.mrb[12].mxu1  ;;  %2909 = vmatprep.subr.bf16.mxu0 %v5976_v6 }
 0x25f   :  { %v1808_v3 = vpop.f32.mrb[13].mxu1  ;;  %v5444_v55 = vadd.f32 %v1806_v2, %v4893_v57 }
 0x260   :  { %v1810_v9 = vpop.f32.mrb[14].mxu1  ;;  %v5450_v63 = vadd.f32 %v1808_v3, %v4905_v43 }
 0x261   :  { %v5447_v45 = vadd.f32 %v1810_v9, %v4893_v57  ;;  %v1812_v49 = vpop.f32.mrb[15].mxu1  ;;  %v3722_v48 = vpop.eup %3721  ;;  %v6005_v9 = vpack.c.bf16 %v5218_v31, %v5215_v46  ;;  %2910 = vmatpush1.bf16.msra.mxu0 %v3554_v35 }
 0x262   :  { %v5453_v56 = vadd.f32 %v1812_v49, %v4905_v43  ;;  %v3724_v3 = vpop.eup %3723  ;;  %2911 = vmatprep.subr.bf16.mxu0 %v5976_v6 }
 0x263   :  { %v1973_v26 = vpack.c.bf16 %v5447_v45, %v5444_v55  ;;  %3727 = vtanh.bf16 %v6005_v9 }
 0x264   :  { %v1974_v2 = vpack.c.bf16 %v5453_v56, %v5450_v63  ;;  %2380 = vmatmul.mubr.bf16.gmra.mrb[96].mxu1 %v3720_v12  ;;  %3729 = vtanh.bf16 %v1958_v44  ;;  %v3726_v12 = vpop.eup %3725 }
 0x265   :  { %2389 = vmatprep.mubr.bf16.mxu1 %v3722_v48  ;;  %3731 = vtanh.bf16 %v1957_v19  ;;  %2912 = vmatpush1.bf16.msra.mxu0 %v3555_v59 }
 0x266   :  { %3733 = vtanh.bf16 %v1960_v37  ;;  %2913 = vmatprep.subr.bf16.mxu0 %v5976_v6 }
 0x267   :  { %3735 = vtanh.bf16 %v1959_v61 }
 0x268   :  { %v1816_v10 = vpop.f32.mrb[16].mxu1  ;;  %3737 = vtanh.bf16 %v1962_v17 }
 0x269   :  { %v1818_v16 = vpop.f32.mrb[17].mxu1  ;;  %v5467_v36 = vadd.f32 %v1816_v10, %v4893_v57  ;;  %3739 = vtanh.bf16 %v1961_v52  ;;  %2914 = vmatpush1.bf16.msra.mxu0 %v3556_v51 }
 0x26a   :  { %v1820_v40 = vpop.f32.mrb[18].mxu1  ;;  %v5473_v46 = vadd.f32 %v1818_v16, %v4905_v43  ;;  %3741 = vtanh.bf16 %v1964_v4 }
 0x26b   :  { %v5470_v13 = vadd.f32 %v1820_v40, %v4893_v57  ;;  %v1822_v49 = vpop.f32.mrb[19].mxu1  ;;  %3743 = vtanh.bf16 %v1963_v42 }
 0x26c   :  { %v5476_v31 = vadd.f32 %v1822_v49, %v4905_v43  ;;  %2390 = vmatmul.mubr.bf16.gmra.mrb[100].mxu1 %v3724_v3  ;;  %3745 = vtanh.bf16 %v1966_v5 }
 0x26d   :  { %v1975_v1 = vpack.c.bf16 %v5470_v13, %v5467_v36  ;;  %2399 = vmatprep.mubr.bf16.mxu1 %v3726_v12  ;;  %3747 = vtanh.bf16 %v1965_v34 }
 0x26e   :  { %v1976_v44 = vpack.c.bf16 %v5476_v31, %v5473_v46  ;;  %v3728_v48 = vpop.eup %3727  ;;  %3749 = vtanh.bf16 %v6006_v27 }
 0x26f   :  { %v3730_v9 = vpop.eup %3729  ;;  %3751 = vtanh.bf16 %v6007_v14 }
 0x270   :  { %v3732_v28 = vpop.eup %3731 }
 0x271   :  { %v3734_v61 = vpop.eup %3733 }
 0x272   :  { %v3736_v49 = vpop.eup %3735 }
 0x273   :  { %v3738_v30 = vpop.eup %3737 }
 0x274   :  { %2400 = vmatmul.mubr.bf16.gmra.mrb[104].mxu1 %v3728_v48  ;;  %v3740_v4 = vpop.eup %3739 }
 0x275   :  { %2409 = vmatprep.mubr.bf16.mxu1 %v3730_v9  ;;  %v3742_v9 = vpop.eup %3741 }
 0x276   :  { %v1826_v10 = vpop.f32.mrb[20].mxu1  ;;  %v3744_v21 = vpop.eup %3743 }
 0x277   :  { %v1828_v16 = vpop.f32.mrb[21].mxu1  ;;  %v5497_v58 = vadd.f32 %v1826_v10, %v4893_v57  ;;  %v3746_v34 = vpop.eup %3745 }
 0x278   :  { %v1830_v40 = vpop.f32.mrb[22].mxu1  ;;  %v5503_v11 = vadd.f32 %v1828_v16, %v4905_v43  ;;  %v3748_v59 = vpop.eup %3747 }
 0x279   :  { %v5500_v0 = vadd.f32 %v1830_v40, %v4893_v57  ;;  %v1832_v19 = vpop.f32.mrb[23].mxu1 }
 0x27a   :  { %v5506_v18 = vadd.f32 %v1832_v19, %v4905_v43  ;;  %v6008_v19 = vpack.c.bf16 %v5371_v47, %v5368_v32  ;;  %v6009_v47 = vpack.c.bf16 %v5365_v41, %v5362_v22 }
 0x27b   :  { %v1977_v54 = vpack.c.bf16 %v5500_v0, %v5497_v58 }
 0x27c   :  { %v1978_v37 = vpack.c.bf16 %v5506_v18, %v5503_v11  ;;  %2410 = vmatmul.mubr.bf16.gmra.mrb[108].mxu1 %v3732_v28  ;;  %3753 = vtanh.bf16 %v6008_v19 }
 0x27d   :  { %2419 = vmatprep.mubr.bf16.mxu1 %v3734_v61  ;;  %3755 = vtanh.bf16 %v6009_v47 }
 0x280   :  { %v1836_v53 = vpop.f32.mrb[24].mxu1 }
 0x281   :  { %v1838_v17 = vpop.f32.mrb[25].mxu1  ;;  %v5521_v12 = vadd.f32 %v1836_v53, %v4893_v57 }
 0x282   :  { %v1840_v3 = vpop.f32.mrb[26].mxu1  ;;  %v5527_v39 = vadd.f32 %v1838_v17, %v4905_v43 }
 0x283   :  { %v5524_v20 = vadd.f32 %v1840_v3, %v4893_v57  ;;  %v1842_v48 = vpop.f32.mrb[27].mxu1 }
 0x284   :  { %v5530_v52 = vadd.f32 %v1842_v48, %v4905_v43  ;;  %2420 = vmatmul.mubr.bf16.gmra.mrb[112].mxu1 %v3736_v49  ;;  %v3750_v49 = vpop.eup %3749 }
 0x285   :  { %v1979_v50 = vpack.c.bf16 %v5524_v20, %v5521_v12  ;;  %2429 = vmatprep.mubr.bf16.mxu1 %v3738_v30  ;;  %v6010_v30 = vpack.c.bf16 %v5423_v8, %v5420_v25  ;;  %v3752_v51 = vpop.eup %3751 }
 0x286   :  { %v1980_v6 = vpack.c.bf16 %v5530_v52, %v5527_v39 }
 0x287   :  { %3757 = vtanh.bf16 %v6010_v30 }
 0x28c   :  { %2430 = vmatmul.mubr.bf16.gmra.mrb[116].mxu1 %v3740_v4  ;;  %v3754_v4 = vpop.eup %3753 }
 0x28d   :  { %2439 = vmatprep.mubr.bf16.mxu1 %v3742_v9 }
 0x28e   :  { %v1846_v10 = vpop.f32.mrb[28].mxu1 }
 0x28f   :  { %v1848_v16 = vpop.f32.mrb[29].mxu1  ;;  %v5549_v29 = vadd.f32 %v1846_v10, %v4893_v57 }
 0x290   :  { %v1850_v35 = vpop.f32.mrb[30].mxu1  ;;  %v5555_v62 = vadd.f32 %v1848_v16, %v4905_v43  ;;  %v6011_v16 = vpack.c.bf16 %v5417_v23, %v5414_v38  ;;  %v3756_v38 = vpop.eup %3755 }
 0x291   :  { %v5552_v42 = vadd.f32 %v1850_v35, %v4893_v57  ;;  %v1852_v15 = vpop.f32.mrb[31].mxu1 }
 0x292   :  { %v5558_v5 = vadd.f32 %v1852_v15, %v4905_v43  ;;  %3759 = vtanh.bf16 %v6011_v16  ;;  %v3758_v15 = vpop.eup %3757 }
 0x293   :  { %v1981_v24 = vpack.c.bf16 %v5552_v42, %v5549_v29  ;;  %3761 = vtanh.bf16 %v1974_v2 }
 0x294   :  { %v1982_v7 = vpack.c.bf16 %v5558_v5, %v5555_v62  ;;  %2440 = vmatmul.mubr.bf16.gmra.mrb[120].mxu1 %v3744_v21  ;;  %3763 = vtanh.bf16 %v1973_v26 }
 0x295   :  { %2449 = vmatprep.mubr.bf16.mxu1 %v3746_v34  ;;  %3765 = vtanh.bf16 %v1976_v44 }
 0x296   :  { %3767 = vtanh.bf16 %v1975_v1 }
 0x297   :  { %3769 = vtanh.bf16 %v1978_v37 }
 0x298   :  { %v1856_v40 = vpop.f32.mrb[32].mxu1  ;;  %3771 = vtanh.bf16 %v1977_v54 }
 0x299   :  { %v1858_v28 = vpop.f32.mrb[33].mxu1  ;;  %v5571_v53 = vadd.f32 %v1856_v40, %v4893_v57  ;;  %3773 = vtanh.bf16 %v1980_v6 }
 0x29a   :  { %v1860_v61 = vpop.f32.mrb[34].mxu1  ;;  %v5577_v48 = vadd.f32 %v1858_v28, %v4905_v43  ;;  %3775 = vtanh.bf16 %v1979_v50 }
 0x29b   :  { %v5574_v17 = vadd.f32 %v1860_v61, %v4893_v57  ;;  %v1862_v3 = vpop.f32.mrb[35].mxu1  ;;  %3777 = vtanh.bf16 %v1982_v7 }
 0x29c   :  { %v5580_v60 = vadd.f32 %v1862_v3, %v4905_v43  ;;  %2450 = vmatmul.mubr.bf16.gmra.mrb[124].mxu1 %v3748_v59  ;;  %3779 = vtanh.bf16 %v1981_v24 }
 0x29d   :  { %v1983_v33 = vpack.c.bf16 %v5574_v17, %v5571_v53  ;;  %2459 = vmatprep.mubr.bf16.mxu1 %v3750_v49  ;;  %v3760_v34 = vpop.eup %3759 }
 0x29e   :  { %v1984_v32 = vpack.c.bf16 %v5580_v60, %v5577_v48  ;;  %v3762_v28 = vpop.eup %3761 }
 0x29f   :  { %v3764_v46 = vpop.eup %3763 }
 0x2a0   :  { %v3766_v31 = vpop.eup %3765  ;;  %3781 = vtanh.bf16 %v1984_v32 }
 0x2a1   :  { %v3768_v18 = vpop.eup %3767  ;;  %3783 = vtanh.bf16 %v1983_v33 }
 0x2a2   :  { %v3770_v58 = vpop.eup %3769 }
 0x2a3   :  { %v3772_v6 = vpop.eup %3771 }
 0x2a4   :  { %2460 = vmatmul.mubr.bf16.gmra.mrb[128].mxu1 %v3752_v51  ;;  %v3774_v47 = vpop.eup %3773 }
 0x2a5   :  { %2469 = vmatprep.mubr.bf16.mxu1 %v3754_v4  ;;  %v3776_v5 = vpop.eup %3775 }
 0x2a6   :  { %v1866_v9 = vpop.f32.mrb[36].mxu1  ;;  %v3778_v7 = vpop.eup %3777 }
 0x2a7   :  { %v1868_v10 = vpop.f32.mrb[37].mxu1  ;;  %v5599_v22 = vadd.f32 %v1866_v9, %v4893_v57  ;;  %v3780_v60 = vpop.eup %3779 }
 0x2a8   :  { %v1870_v35 = vpop.f32.mrb[38].mxu1  ;;  %v5605_v8 = vadd.f32 %v1868_v10, %v4905_v43 }
 0x2a9   :  { %v5602_v41 = vadd.f32 %v1870_v35, %v4893_v57  ;;  %v1872_v25 = vpop.f32.mrb[39].mxu1 }
 0x2aa   :  { %v5608_v27 = vadd.f32 %v1872_v25, %v4905_v43 }
 0x2ab   :  { %v1985_v23 = vpack.c.bf16 %v5602_v41, %v5599_v22  ;;  %v3782_v53 = vpop.eup %3781 }
 0x2ac   :  { %v1986_v63 = vpack.c.bf16 %v5608_v27, %v5605_v8  ;;  %2470 = vmatmul.mubr.bf16.gmra.mrb[132].mxu1 %v3756_v38  ;;  %v3784_v8 = vpop.eup %3783 }
 0x2ad   :  { %2479 = vmatprep.mubr.bf16.mxu1 %v3758_v15 }
 0x2ae   :  { %3785 = vtanh.bf16 %v1986_v63 }
 0x2af   :  { %3787 = vtanh.bf16 %v1985_v23 }
 0x2b0   :  { %v1876_v56 = vpop.f32.mrb[40].mxu1 }
 0x2b1   :  { %v1878_v2 = vpop.f32.mrb[41].mxu1  ;;  %v5621_v14 = vadd.f32 %v1876_v56, %v4893_v57 }
 0x2b2   :  { %v1880_v21 = vpop.f32.mrb[42].mxu1  ;;  %v5627_v61 = vadd.f32 %v1878_v2, %v4905_v43 }
 0x2b3   :  { %v5624_v40 = vadd.f32 %v1880_v21, %v4893_v57  ;;  %v1882_v19 = vpop.f32.mrb[43].mxu1 }
 0x2b4   :  { %v5630_v55 = vadd.f32 %v1882_v19, %v4905_v43  ;;  %2480 = vmatmul.mubr.bf16.gmra.mrb[136].mxu1 %v3760_v34 }
 0x2b5   :  { %v1987_v45 = vpack.c.bf16 %v5624_v40, %v5621_v14  ;;  %2489 = vmatprep.mubr.bf16.mxu1 %v3762_v28 }
 0x2b6   :  { %v1988_v26 = vpack.c.bf16 %v5630_v55, %v5627_v61 }
 0x2b8   :  { %3789 = vtanh.bf16 %v1988_v26 }
 0x2b9   :  { %v3786_v38 = vpop.eup %3785  ;;  %3791 = vtanh.bf16 %v1987_v45 }
 0x2ba   :  { %v3788_v23 = vpop.eup %3787 }
 0x2bc   :  { %2490 = vmatmul.mubr.bf16.gmra.mrb[140].mxu1 %v3764_v46 }
 0x2bd   :  { %2499 = vmatprep.mubr.bf16.mxu1 %v3766_v31  ;;  %v2095_v31 = vld [vmem:[%s5952_s6] sm:$0x3] }
 0x2bf   :  { %v1886_v44 = vpop.f32.mrb[44].mxu1 }
 0x2c0   :  { %v1888_v59 = vpop.f32.mrb[45].mxu1  ;;  %v5649_v13 = vadd.f32 %v1886_v44, %v4893_v57 }
 0x2c1   :  { %v1890_v36 = vpop.f32.mrb[46].mxu1  ;;  %v1889_v37 = vadd.f32 %v1888_v59, %v4905_v43 }
 0x2c2   :  { %v5652_v1 = vadd.f32 %v1890_v36, %v4893_v57  ;;  %v1892_v11 = vpop.f32.mrb[47].mxu1 }
 0x2c3   :  { %v1893_v3 = vadd.f32 %v1892_v11, %v4905_v43  ;;  %v3790_v34 = vpop.eup %3789  ;;  %v6013_v11 = vld [vmem:[#allocation8_spill] sm:$0xff] }
 0x2c4   :  { %v1989_v0 = vpack.c.bf16 %v5652_v1, %v5649_v13  ;;  %2500 = vmatmul.mubr.bf16.gmra.mrb[144].mxu1 %v3768_v18  ;;  %v3792_v40 = vpop.eup %3791  ;;  %v6012_v13 = vld [vmem:[#allocation9_spill] sm:$0xff]  ;;  %v5732_v18 = vrot.slane %v2095_v31, %v6013_v11 }
 0x2c5   :  { %v1990_v54 = vpack.c.bf16 %v1893_v3, %v1889_v37  ;;  %2509 = vmatprep.mubr.bf16.mxu1 %v3770_v58 }
 0x2c7   :  { %3793 = vtanh.bf16 %v1990_v54 }
 0x2c8   :  { %3795 = vtanh.bf16 %v1989_v0 }
 0x2c9   :  { %v1896_v39 = vpop.f32.mrb[48].mxu1 }
 0x2ca   :  { %v1898_v52 = vpop.f32.mrb[49].mxu1  ;;  %v5665_v30 = vadd.f32 %v1896_v39, %v4893_v57 }
 0x2cb   :  { %v1900_v49 = vpop.f32.mrb[50].mxu1  ;;  %v1899_v12 = vadd.f32 %v1898_v52, %v4905_v43 }
 0x2cc   :  { %v5668_v51 = vadd.f32 %v1900_v49, %v4893_v57  ;;  %v1902_v4 = vpop.f32.mrb[51].mxu1  ;;  %2510 = vmatmul.mubr.bf16.gmra.mrb[148].mxu1 %v3772_v6 }
 0x2cd   :  { %v1903_v20 = vadd.f32 %v1902_v4, %v4905_v43  ;;  %2519 = vmatprep.mubr.bf16.mxu1 %v3774_v47 }
 0x2ce   :  { %v1991_v50 = vpack.c.bf16 %v5668_v51, %v5665_v30 }
 0x2cf   :  { %v1992_v62 = vpack.c.bf16 %v1903_v20, %v1899_v12 }
 0x2d1   :  { %3797 = vtanh.bf16 %v1992_v62 }
 0x2d2   :  { %v3794_v44 = vpop.eup %3793  ;;  %3799 = vtanh.bf16 %v1991_v50 }
 0x2d3   :  { %v3796_v54 = vpop.eup %3795 }
 0x2d4   :  { %2520 = vmatmul.mubr.bf16.gmra.mrb[152].mxu1 %v3776_v5 }
 0x2d5   :  { %2529 = vmatprep.mubr.bf16.mxu1 %v3778_v7 }
 0x2d7   :  { %v1906_v9 = vpop.f32.mrb[52].mxu1 }
 0x2d8   :  { %v1908_v10 = vpop.f32.mrb[53].mxu1  ;;  %v5687_v42 = vadd.f32 %v1906_v9, %v4893_v57 }
 0x2d9   :  { %v1910_v29 = vpop.f32.mrb[54].mxu1  ;;  %v1909_v32 = vadd.f32 %v1908_v10, %v4905_v43 }
 0x2da   :  { %v5690_v24 = vadd.f32 %v1910_v29, %v4893_v57  ;;  %v1912_v48 = vpop.f32.mrb[55].mxu1 }
 0x2db   :  { %v1913_v16 = vadd.f32 %v1912_v48, %v4905_v43 }
 0x2dc   :  { %v1993_v17 = vpack.c.bf16 %v5690_v24, %v5687_v42  ;;  %2530 = vmatmul.mubr.bf16.gmra.mrb[156].mxu1 %v3780_v60  ;;  %v3798_v6 = vpop.eup %3797 }
 0x2dd   :  { %v1994_v33 = vpack.c.bf16 %v1913_v16, %v1909_v32  ;;  %2539 = vmatprep.mubr.bf16.mxu1 %v3782_v53  ;;  %v3800_v62 = vpop.eup %3799 }
 0x2df   :  { %3801 = vtanh.bf16 %v1994_v33 }
 0x2e0   :  { %3803 = vtanh.bf16 %v1993_v17 }
 0x2e1   :  { %v1916_v35 = vpop.f32.mrb[56].mxu1 }
 0x2e2   :  { %v1918_v25 = vpop.f32.mrb[57].mxu1  ;;  %v5700_v15 = vadd.f32 %v1916_v35, %v4893_v57 }
 0x2e3   :  { %v1920_v27 = vpop.f32.mrb[58].mxu1  ;;  %v1919_v2 = vadd.f32 %v1918_v25, %v4905_v43 }
 0x2e4   :  { %v5703_v63 = vadd.f32 %v1920_v27, %v4893_v57  ;;  %v1922_v56 = vpop.f32.mrb[59].mxu1  ;;  %2540 = vmatmul.mubr.bf16.gmra.mrb[160].mxu1 %v3784_v8 }
 0x2e5   :  { %v1923_v21 = vadd.f32 %v1922_v56, %v4905_v43  ;;  %2549 = vmatprep.mubr.bf16.mxu1 %v3786_v38 }
 0x2e6   :  { %v1995_v22 = vpack.c.bf16 %v5703_v63, %v5700_v15 }
 0x2e7   :  { %v1996_v41 = vpack.c.bf16 %v1923_v21, %v1919_v2 }
 0x2ea   :  { %v3802_v9 = vpop.eup %3801 }
 0x2eb   :  { %v3804_v48 = vpop.eup %3803 }
 0x2ec   :  { %2550 = vmatmul.mubr.bf16.gmra.mrb[164].mxu1 %v3788_v23 }
 0x2ed   :  { %2559 = vmatprep.mubr.bf16.mxu1 %v3790_v34 }
 0x2ef   :  { %v1926_v19 = vpop.f32.mrb[60].mxu1 }
 0x2f0   :  { %v1928_v28 = vpop.f32.mrb[61].mxu1  ;;  %v5716_v55 = vadd.f32 %v1926_v19, %v4893_v57 }
 0x2f1   :  { %v1930_v61 = vpop.f32.mrb[62].mxu1  ;;  %v1929_v45 = vadd.f32 %v1928_v28, %v4905_v43 }
 0x2f2   :  { %v5719_v26 = vadd.f32 %v1930_v61, %v4893_v57  ;;  %v1932_v14 = vpop.f32.mrb[63].mxu1  ;;  %v5729_v57 = vrot.slane %v2095_v31, %v6012_v13 }
 0x2f3   :  { %v1933_v46 = vadd.f32 %v1932_v14, %v4905_v43 }
 0x2f4   :  { %v1997_v59 = vpack.c.bf16 %v5719_v26, %v5716_v55  ;;  %2560 = vmatmul.mubr.bf16.gmra.mrb[168].mxu1 %v3792_v40 }
 0x2f5   :  { %v1998_v36 = vpack.c.bf16 %v1933_v46, %v1929_v45  ;;  %2569 = vmatprep.mubr.bf16.mxu1 %v3794_v44 }
 0x2f7   :  { %v2301_v1 = vpop.f32.mrb[64].mxu1 }
 0x2f8   :  { %v2303_v43 = vpop.f32.mrb[65].mxu1  ;;  %v2302_v3 = vadd.f32 %v2301_v1, %v5729_v57 }
 0x2f9   :  { %v2305_v37 = vpop.f32.mrb[66].mxu1  ;;  %v2304_v39 = vadd.f32 %v2303_v43, %v5732_v18 }
 0x2fa   :  { %v2306_v58 = vadd.f32 %v2305_v37, %v5729_v57  ;;  %v2307_v0 = vpop.f32.mrb[67].mxu1 }
 0x2fb   :  { %v2308_v52 = vadd.f32 %v2307_v0, %v5732_v18 }
 0x2fc   :  { %v2620_v49 = vpack.c.bf16 %v2306_v58, %v2302_v3  ;;  %2570 = vmatmul.mubr.bf16.gmra.mrb[172].mxu1 %v3796_v54 }
 0x2fd   :  { %v2621_v47 = vpack.c.bf16 %v2308_v52, %v2304_v39  ;;  %2579 = vmatprep.mubr.bf16.mxu1 %v3798_v6 }
 0x2ff   :  { %3805 = vtanh.bf16 %v2621_v47  ;;  %v2311_v30 = vpop.f32.mrb[68].mxu1 }
 0x300   :  { %3807 = vtanh.bf16 %v2620_v49  ;;  %v2313_v51 = vpop.f32.mrb[69].mxu1  ;;  %v2312_v12 = vadd.f32 %v2311_v30, %v5729_v57 }
 0x301   :  { %3809 = vtanh.bf16 %v1996_v41  ;;  %v2315_v4 = vpop.f32.mrb[70].mxu1  ;;  %v2314_v5 = vadd.f32 %v2313_v51, %v5732_v18 }
 0x302   :  { %v2316_v20 = vadd.f32 %v2315_v4, %v5729_v57  ;;  %v2317_v50 = vpop.f32.mrb[71].mxu1  ;;  %3811 = vtanh.bf16 %v1995_v22 }
 0x303   :  { %v2318_v7 = vadd.f32 %v2317_v50, %v5732_v18 }
 0x304   :  { %v2622_v10 = vpack.c.bf16 %v2316_v20, %v2312_v12  ;;  %2580 = vmatmul.mubr.bf16.gmra.mrb[176].mxu1 %v3800_v62 }
 0x305   :  { %v2623_v29 = vpack.c.bf16 %v2318_v7, %v2314_v5  ;;  %2589 = vmatprep.mubr.bf16.mxu1 %v3802_v9 }
 0x307   :  { %3813 = vtanh.bf16 %v2623_v29  ;;  %v2321_v42 = vpop.f32.mrb[72].mxu1 }
 0x308   :  { %3815 = vtanh.bf16 %v2622_v10  ;;  %v2323_v24 = vpop.f32.mrb[73].mxu1  ;;  %v2322_v16 = vadd.f32 %v2321_v42, %v5729_v57 }
 0x309   :  { %3817 = vtanh.bf16 %v1998_v36  ;;  %v2325_v60 = vpop.f32.mrb[74].mxu1  ;;  %v2324_v35 = vadd.f32 %v2323_v24, %v5732_v18 }
 0x30a   :  { %v3806_v32 = vpop.eup %3805  ;;  %v2326_v53 = vadd.f32 %v2325_v60, %v5729_v57  ;;  %v2327_v17 = vpop.f32.mrb[75].mxu1  ;;  %3819 = vtanh.bf16 %v1997_v59 }
 0x30b   :  { %v3808_v33 = vpop.eup %3807  ;;  %v2328_v25 = vadd.f32 %v2327_v17, %v5732_v18  ;;  %2915 = vmatprep.mubr.bf16.mxu0 %v3806_v32 }
 0x30c   :  { %v3810_v8 = vpop.eup %3809  ;;  %v2624_v27 = vpack.c.bf16 %v2326_v53, %v2322_v16  ;;  %2590 = vmatmul.mubr.bf16.gmra.mrb[180].mxu1 %v3804_v48  ;;  %2916 = vmatmul.mubr.bf16.vlgmr.msra.gmra.mrb[64].mxu0 %v3808_v33 }
 0x30d   :  { %v2625_v38 = vpack.c.bf16 %v2328_v25, %v2324_v35  ;;  %2599 = vmatprep.mubr.bf16.mxu1 %v3810_v8  ;;  %v3812_v56 = vpop.eup %3811 }
 0x30f   :  { %3821 = vtanh.bf16 %v2625_v38  ;;  %v2331_v15 = vpop.f32.mrb[76].mxu1 }
 0x310   :  { %3823 = vtanh.bf16 %v2624_v27  ;;  %v2333_v63 = vpop.f32.mrb[77].mxu1  ;;  %v2332_v22 = vadd.f32 %v2331_v15, %v5729_v57 }
 0x311   :  { %v2335_v2 = vpop.f32.mrb[78].mxu1  ;;  %v2334_v19 = vadd.f32 %v2333_v63, %v5732_v18 }
 0x312   :  { %v3814_v21 = vpop.eup %3813  ;;  %v2336_v41 = vadd.f32 %v2335_v2, %v5729_v57  ;;  %v2337_v23 = vpop.f32.mrb[79].mxu1 }
 0x313   :  { %v3816_v34 = vpop.eup %3815  ;;  %v2338_v28 = vadd.f32 %v2337_v23, %v5732_v18  ;;  %2923 = vmatprep.mubr.bf16.mxu0 %v3814_v21 }
 0x314   :  { %v3818_v61 = vpop.eup %3817  ;;  %v2626_v55 = vpack.c.bf16 %v2336_v41, %v2332_v22  ;;  %2600 = vmatmul.mubr.bf16.gmra.mrb[184].mxu1 %v3812_v56  ;;  %2924 = vmatmul.mubr.bf16.gmra.mrb[68].mxu0 %v3816_v34 }
 0x315   :  { %v2627_v26 = vpack.c.bf16 %v2338_v28, %v2334_v19  ;;  %2609 = vmatprep.mubr.bf16.mxu1 %v3818_v61  ;;  %v3820_v45 = vpop.eup %3819 }
 0x317   :  { %3825 = vtanh.bf16 %v2627_v26  ;;  %v2341_v14 = vpop.f32.mrb[80].mxu1 }
 0x318   :  { %3827 = vtanh.bf16 %v2626_v55  ;;  %v2343_v40 = vpop.f32.mrb[81].mxu1  ;;  %v2342_v44 = vadd.f32 %v2341_v14, %v5729_v57 }
 0x319   :  { %v2345_v46 = vpop.f32.mrb[82].mxu1  ;;  %v2344_v1 = vadd.f32 %v2343_v40, %v5732_v18 }
 0x31a   :  { %v3822_v31 = vpop.eup %3821  ;;  %v2346_v59 = vadd.f32 %v2345_v46, %v5729_v57  ;;  %v2347_v36 = vpop.f32.mrb[83].mxu1 }
 0x31b   :  { %v3824_v13 = vpop.eup %3823  ;;  %v2348_v11 = vadd.f32 %v2347_v36, %v5732_v18  ;;  %2931 = vmatprep.mubr.bf16.mxu0 %v3822_v31 }
 0x31c   :  { %v2628_v43 = vpack.c.bf16 %v2346_v59, %v2342_v44  ;;  %2610 = vmatmul.mubr.bf16.gmra.mrb[188].mxu1 %v3820_v45  ;;  %2932 = vmatmul.mubr.bf16.gmra.mrb[72].mxu0 %v3824_v13 }
 0x31d   :  { %v2629_v37 = vpack.c.bf16 %v2348_v11, %v2344_v1 }
 0x31f   :  { %3829 = vtanh.bf16 %v2629_v37  ;;  %v2351_v3 = vpop.f32.mrb[84].mxu1 }
 0x320   :  { %3831 = vtanh.bf16 %v2628_v43  ;;  %v2353_v58 = vpop.f32.mrb[85].mxu1  ;;  %v2352_v39 = vadd.f32 %v2351_v3, %v5729_v57 }
 0x321   :  { %v2355_v0 = vpop.f32.mrb[86].mxu1  ;;  %v2354_v47 = vadd.f32 %v2353_v58, %v5732_v18 }
 0x322   :  { %v3826_v54 = vpop.eup %3825  ;;  %v2356_v52 = vadd.f32 %v2355_v0, %v5729_v57  ;;  %v2357_v6 = vpop.f32.mrb[87].mxu1 }
 0x323   :  { %v3828_v49 = vpop.eup %3827  ;;  %v2358_v30 = vadd.f32 %v2357_v6, %v5732_v18  ;;  %2939 = vmatprep.mubr.bf16.mxu0 %v3826_v54 }
 0x324   :  { %v2630_v51 = vpack.c.bf16 %v2356_v52, %v2352_v39  ;;  %2940 = vmatmul.mubr.bf16.gmra.mrb[76].mxu0 %v3828_v49 }
 0x325   :  { %v2631_v4 = vpack.c.bf16 %v2358_v30, %v2354_v47 }
 0x327   :  { %3833 = vtanh.bf16 %v2631_v4  ;;  %v2361_v12 = vpop.f32.mrb[88].mxu1 }
 0x328   :  { %3835 = vtanh.bf16 %v2630_v51  ;;  %v2363_v20 = vpop.f32.mrb[89].mxu1  ;;  %v2362_v5 = vadd.f32 %v2361_v12, %v5729_v57 }
 0x329   :  { %v2365_v50 = vpop.f32.mrb[90].mxu1  ;;  %v2364_v29 = vadd.f32 %v2363_v20, %v5732_v18 }
 0x32a   :  { %v3830_v62 = vpop.eup %3829  ;;  %v2366_v7 = vadd.f32 %v2365_v50, %v5729_v57  ;;  %v2367_v9 = vpop.f32.mrb[91].mxu1 }
 0x32b   :  { %v3832_v10 = vpop.eup %3831  ;;  %v2368_v42 = vadd.f32 %v2367_v9, %v5732_v18  ;;  %2947 = vmatprep.mubr.bf16.mxu0 %v3830_v62 }
 0x32c   :  { %v2632_v24 = vpack.c.bf16 %v2366_v7, %v2362_v5  ;;  %2948 = vmatmul.mubr.bf16.gmra.mrb[80].mxu0 %v3832_v10 }
 0x32d   :  { %v2633_v48 = vpack.c.bf16 %v2368_v42, %v2364_v29 }
 0x32f   :  { %3837 = vtanh.bf16 %v2633_v48  ;;  %v2371_v60 = vpop.f32.mrb[92].mxu1 }
 0x330   :  { %3839 = vtanh.bf16 %v2632_v24  ;;  %v2373_v32 = vpop.f32.mrb[93].mxu1  ;;  %v2372_v17 = vadd.f32 %v2371_v60, %v5729_v57 }
 0x331   :  { %v2375_v16 = vpop.f32.mrb[94].mxu1  ;;  %v2374_v8 = vadd.f32 %v2373_v32, %v5732_v18 }
 0x332   :  { %v3834_v53 = vpop.eup %3833  ;;  %v2376_v33 = vadd.f32 %v2375_v16, %v5729_v57  ;;  %v2377_v35 = vpop.f32.mrb[95].mxu1 }
 0x333   :  { %v3836_v25 = vpop.eup %3835  ;;  %v2378_v27 = vadd.f32 %v2377_v35, %v5732_v18  ;;  %2955 = vmatprep.mubr.bf16.mxu0 %v3834_v53 }
 0x334   :  { %v2634_v38 = vpack.c.bf16 %v2376_v33, %v2372_v17  ;;  %2956 = vmatmul.mubr.bf16.gmra.mrb[84].mxu0 %v3836_v25 }
 0x335   :  { %v2635_v15 = vpack.c.bf16 %v2378_v27, %v2374_v8 }
 0x337   :  { %3841 = vtanh.bf16 %v2635_v15  ;;  %v2381_v63 = vpop.f32.mrb[96].mxu1 }
 0x338   :  { %3843 = vtanh.bf16 %v2634_v38  ;;  %v2383_v56 = vpop.f32.mrb[97].mxu1  ;;  %v2382_v22 = vadd.f32 %v2381_v63, %v5729_v57 }
 0x339   :  { %v2385_v2 = vpop.f32.mrb[98].mxu1  ;;  %v2384_v19 = vadd.f32 %v2383_v56, %v5732_v18 }
 0x33a   :  { %v3838_v21 = vpop.eup %3837  ;;  %v2386_v41 = vadd.f32 %v2385_v2, %v5729_v57  ;;  %v2387_v23 = vpop.f32.mrb[99].mxu1 }
 0x33b   :  { %v3840_v34 = vpop.eup %3839  ;;  %v2388_v28 = vadd.f32 %v2387_v23, %v5732_v18  ;;  %2963 = vmatprep.mubr.bf16.mxu0 %v3838_v21 }
 0x33c   :  { %v2636_v61 = vpack.c.bf16 %v2386_v41, %v2382_v22  ;;  %2964 = vmatmul.mubr.bf16.gmra.mrb[88].mxu0 %v3840_v34 }
 0x33d   :  { %v2637_v55 = vpack.c.bf16 %v2388_v28, %v2384_v19 }
 0x33f   :  { %3845 = vtanh.bf16 %v2637_v55  ;;  %v2391_v26 = vpop.f32.mrb[100].mxu1 }
 0x340   :  { %3847 = vtanh.bf16 %v2636_v61  ;;  %v2393_v14 = vpop.f32.mrb[101].mxu1  ;;  %v2392_v46 = vadd.f32 %v2391_v26, %v5729_v57 }
 0x341   :  { %v2395_v40 = vpop.f32.mrb[102].mxu1  ;;  %v2394_v36 = vadd.f32 %v2393_v14, %v5732_v18 }
 0x342   :  { %v3842_v45 = vpop.eup %3841  ;;  %v2396_v31 = vadd.f32 %v2395_v40, %v5729_v57  ;;  %v2397_v44 = vpop.f32.mrb[103].mxu1 }
 0x343   :  { %v3844_v59 = vpop.eup %3843  ;;  %v2398_v13 = vadd.f32 %v2397_v44, %v5732_v18  ;;  %2971 = vmatprep.mubr.bf16.mxu0 %v3842_v45 }
 0x344   :  { %v2638_v1 = vpack.c.bf16 %v2396_v31, %v2392_v46  ;;  %2972 = vmatmul.mubr.bf16.gmra.mrb[92].mxu0 %v3844_v59 }
 0x345   :  { %v2639_v11 = vpack.c.bf16 %v2398_v13, %v2394_v36 }
 0x347   :  { %3849 = vtanh.bf16 %v2639_v11  ;;  %v2401_v43 = vpop.f32.mrb[104].mxu1 }
 0x348   :  { %3851 = vtanh.bf16 %v2638_v1  ;;  %v2403_v37 = vpop.f32.mrb[105].mxu1  ;;  %v2402_v0 = vadd.f32 %v2401_v43, %v5729_v57 }
 0x349   :  { %v2405_v3 = vpop.f32.mrb[106].mxu1  ;;  %v2404_v6 = vadd.f32 %v2403_v37, %v5732_v18 }
 0x34a   :  { %v3846_v58 = vpop.eup %3845  ;;  %v2406_v54 = vadd.f32 %v2405_v3, %v5729_v57  ;;  %v2407_v39 = vpop.f32.mrb[107].mxu1 }
 0x34b   :  { %v3848_v52 = vpop.eup %3847  ;;  %v2408_v49 = vadd.f32 %v2407_v39, %v5732_v18  ;;  %2979 = vmatprep.mubr.bf16.mxu0 %v3846_v58 }
 0x34c   :  { %v2640_v47 = vpack.c.bf16 %v2406_v54, %v2402_v0  ;;  %2980 = vmatmul.mubr.bf16.gmra.mrb[96].mxu0 %v3848_v52 }
 0x34d   :  { %v2641_v30 = vpack.c.bf16 %v2408_v49, %v2404_v6 }
 0x34f   :  { %3853 = vtanh.bf16 %v2641_v30  ;;  %v2411_v51 = vpop.f32.mrb[108].mxu1 }
 0x350   :  { %3855 = vtanh.bf16 %v2640_v47  ;;  %v2413_v4 = vpop.f32.mrb[109].mxu1  ;;  %v2412_v50 = vadd.f32 %v2411_v51, %v5729_v57 }
 0x351   :  { %v2415_v12 = vpop.f32.mrb[110].mxu1  ;;  %v2414_v9 = vadd.f32 %v2413_v4, %v5732_v18 }
 0x352   :  { %v3850_v20 = vpop.eup %3849  ;;  %v2416_v62 = vadd.f32 %v2415_v12, %v5729_v57  ;;  %v2417_v5 = vpop.f32.mrb[111].mxu1 }
 0x353   :  { %v3852_v7 = vpop.eup %3851  ;;  %v2418_v10 = vadd.f32 %v2417_v5, %v5732_v18  ;;  %2987 = vmatprep.mubr.bf16.mxu0 %v3850_v20 }
 0x354   :  { %v2642_v29 = vpack.c.bf16 %v2416_v62, %v2412_v50  ;;  %2988 = vmatmul.mubr.bf16.gmra.mrb[100].mxu0 %v3852_v7 }
 0x355   :  { %v2643_v42 = vpack.c.bf16 %v2418_v10, %v2414_v9 }
 0x357   :  { %3857 = vtanh.bf16 %v2643_v42  ;;  %v2421_v24 = vpop.f32.mrb[112].mxu1 }
 0x358   :  { %3859 = vtanh.bf16 %v2642_v29  ;;  %v2423_v48 = vpop.f32.mrb[113].mxu1  ;;  %v2422_v16 = vadd.f32 %v2421_v24, %v5729_v57 }
 0x359   :  { %v2425_v60 = vpop.f32.mrb[114].mxu1  ;;  %v2424_v35 = vadd.f32 %v2423_v48, %v5732_v18 }
 0x35a   :  { %v3854_v32 = vpop.eup %3853  ;;  %v2426_v53 = vadd.f32 %v2425_v60, %v5729_v57  ;;  %v2427_v17 = vpop.f32.mrb[115].mxu1 }
 0x35b   :  { %v3856_v33 = vpop.eup %3855  ;;  %v2428_v25 = vadd.f32 %v2427_v17, %v5732_v18  ;;  %2995 = vmatprep.mubr.bf16.mxu0 %v3854_v32 }
 0x35c   :  { %v2644_v8 = vpack.c.bf16 %v2426_v53, %v2422_v16  ;;  %2996 = vmatmul.mubr.bf16.gmra.mrb[104].mxu0 %v3856_v33 }
 0x35d   :  { %v2645_v27 = vpack.c.bf16 %v2428_v25, %v2424_v35 }
 0x35f   :  { %3861 = vtanh.bf16 %v2645_v27  ;;  %v2431_v38 = vpop.f32.mrb[116].mxu1 }
 0x360   :  { %3863 = vtanh.bf16 %v2644_v8  ;;  %v2433_v15 = vpop.f32.mrb[117].mxu1  ;;  %v2432_v2 = vadd.f32 %v2431_v38, %v5729_v57 }
 0x361   :  { %v2435_v63 = vpop.f32.mrb[118].mxu1  ;;  %v2434_v23 = vadd.f32 %v2433_v15, %v5732_v18 }
 0x362   :  { %v3858_v56 = vpop.eup %3857  ;;  %v2436_v21 = vadd.f32 %v2435_v63, %v5729_v57  ;;  %v2437_v22 = vpop.f32.mrb[119].mxu1 }
 0x363   :  { %v3860_v41 = vpop.eup %3859  ;;  %v2438_v34 = vadd.f32 %v2437_v22, %v5732_v18  ;;  %3003 = vmatprep.mubr.bf16.mxu0 %v3858_v56 }
 0x364   :  { %v2646_v19 = vpack.c.bf16 %v2436_v21, %v2432_v2  ;;  %3004 = vmatmul.mubr.bf16.gmra.mrb[108].mxu0 %v3860_v41 }
 0x365   :  { %v2647_v28 = vpack.c.bf16 %v2438_v34, %v2434_v23 }
 0x367   :  { %3865 = vtanh.bf16 %v2647_v28  ;;  %v2441_v61 = vpop.f32.mrb[120].mxu1 }
 0x368   :  { %3867 = vtanh.bf16 %v2646_v19  ;;  %v2443_v55 = vpop.f32.mrb[121].mxu1  ;;  %v2442_v40 = vadd.f32 %v2441_v61, %v5729_v57 }
 0x369   :  { %v2445_v26 = vpop.f32.mrb[122].mxu1  ;;  %v2444_v44 = vadd.f32 %v2443_v55, %v5732_v18 }
 0x36a   :  { %v3862_v14 = vpop.eup %3861  ;;  %v2446_v45 = vadd.f32 %v2445_v26, %v5729_v57  ;;  %v2447_v46 = vpop.f32.mrb[123].mxu1 }
 0x36b   :  { %v3864_v31 = vpop.eup %3863  ;;  %v2448_v59 = vadd.f32 %v2447_v46, %v5732_v18  ;;  %3011 = vmatprep.mubr.bf16.mxu0 %v3862_v14 }
 0x36c   :  { %v2648_v36 = vpack.c.bf16 %v2446_v45, %v2442_v40  ;;  %3012 = vmatmul.mubr.bf16.gmra.mrb[112].mxu0 %v3864_v31 }
 0x36d   :  { %v2649_v13 = vpack.c.bf16 %v2448_v59, %v2444_v44 }
 0x36f   :  { %3869 = vtanh.bf16 %v2649_v13  ;;  %v2451_v1 = vpop.f32.mrb[124].mxu1 }
 0x370   :  { %3871 = vtanh.bf16 %v2648_v36  ;;  %v2453_v11 = vpop.f32.mrb[125].mxu1  ;;  %v2452_v3 = vadd.f32 %v2451_v1, %v5729_v57 }
 0x371   :  { %v2455_v43 = vpop.f32.mrb[126].mxu1  ;;  %v2454_v39 = vadd.f32 %v2453_v11, %v5732_v18 }
 0x372   :  { %v3866_v37 = vpop.eup %3865  ;;  %v2456_v58 = vadd.f32 %v2455_v43, %v5729_v57  ;;  %v2457_v0 = vpop.f32.mrb[127].mxu1 }
 0x373   :  { %v3868_v54 = vpop.eup %3867  ;;  %v2458_v52 = vadd.f32 %v2457_v0, %v5732_v18  ;;  %3019 = vmatprep.mubr.bf16.mxu0 %v3866_v37 }
 0x374   :  { %v2650_v6 = vpack.c.bf16 %v2456_v58, %v2452_v3  ;;  %3020 = vmatmul.mubr.bf16.gmra.mrb[116].mxu0 %v3868_v54 }
 0x375   :  { %v2651_v49 = vpack.c.bf16 %v2458_v52, %v2454_v39 }
 0x377   :  { %3873 = vtanh.bf16 %v2651_v49  ;;  %v2461_v47 = vpop.f32.mrb[128].mxu1 }
 0x378   :  { %3875 = vtanh.bf16 %v2650_v6  ;;  %v2463_v30 = vpop.f32.mrb[129].mxu1  ;;  %v2462_v12 = vadd.f32 %v2461_v47, %v5729_v57 }
 0x379   :  { %v2465_v51 = vpop.f32.mrb[130].mxu1  ;;  %v2464_v5 = vadd.f32 %v2463_v30, %v5732_v18 }
 0x37a   :  { %v3870_v4 = vpop.eup %3869  ;;  %v2466_v20 = vadd.f32 %v2465_v51, %v5729_v57  ;;  %v2467_v50 = vpop.f32.mrb[131].mxu1 }
 0x37b   :  { %v3872_v62 = vpop.eup %3871  ;;  %v2468_v7 = vadd.f32 %v2467_v50, %v5732_v18  ;;  %3027 = vmatprep.mubr.bf16.mxu0 %v3870_v4 }
 0x37c   :  { %v2652_v9 = vpack.c.bf16 %v2466_v20, %v2462_v12  ;;  %3028 = vmatmul.mubr.bf16.gmra.mrb[120].mxu0 %v3872_v62 }
 0x37d   :  { %v2653_v10 = vpack.c.bf16 %v2468_v7, %v2464_v5 }
 0x37f   :  { %3877 = vtanh.bf16 %v2653_v10  ;;  %v2471_v29 = vpop.f32.mrb[132].mxu1 }
 0x380   :  { %3879 = vtanh.bf16 %v2652_v9  ;;  %v2473_v42 = vpop.f32.mrb[133].mxu1  ;;  %v2472_v60 = vadd.f32 %v2471_v29, %v5729_v57 }
 0x381   :  { %v2475_v24 = vpop.f32.mrb[134].mxu1  ;;  %v2474_v17 = vadd.f32 %v2473_v42, %v5732_v18 }
 0x382   :  { %v3874_v48 = vpop.eup %3873  ;;  %v2476_v32 = vadd.f32 %v2475_v24, %v5729_v57  ;;  %v2477_v16 = vpop.f32.mrb[135].mxu1 }
 0x383   :  { %v3876_v53 = vpop.eup %3875  ;;  %v2478_v33 = vadd.f32 %v2477_v16, %v5732_v18  ;;  %3035 = vmatprep.mubr.bf16.mxu0 %v3874_v48 }
 0x384   :  { %v2654_v35 = vpack.c.bf16 %v2476_v32, %v2472_v60  ;;  %3036 = vmatmul.mubr.bf16.gmra.mrb[124].mxu0 %v3876_v53 }
 0x385   :  { %v2655_v25 = vpack.c.bf16 %v2478_v33, %v2474_v17 }
 0x387   :  { %3881 = vtanh.bf16 %v2655_v25  ;;  %v2481_v8 = vpop.f32.mrb[136].mxu1 }
 0x388   :  { %3883 = vtanh.bf16 %v2654_v35  ;;  %v2483_v27 = vpop.f32.mrb[137].mxu1  ;;  %v2482_v63 = vadd.f32 %v2481_v8, %v5729_v57 }
 0x389   :  { %v2485_v38 = vpop.f32.mrb[138].mxu1  ;;  %v2484_v22 = vadd.f32 %v2483_v27, %v5732_v18 }
 0x38a   :  { %v3878_v15 = vpop.eup %3877  ;;  %v2486_v56 = vadd.f32 %v2485_v38, %v5729_v57  ;;  %v2487_v2 = vpop.f32.mrb[139].mxu1 }
 0x38b   :  { %v3880_v21 = vpop.eup %3879  ;;  %v2488_v41 = vadd.f32 %v2487_v2, %v5732_v18  ;;  %3043 = vmatprep.mubr.bf16.mxu0 %v3878_v15 }
 0x38c   :  { %v2656_v23 = vpack.c.bf16 %v2486_v56, %v2482_v63  ;;  %3044 = vmatmul.mubr.bf16.gmra.mrb[128].mxu0 %v3880_v21 }
 0x38d   :  { %v2657_v34 = vpack.c.bf16 %v2488_v41, %v2484_v22 }
 0x38f   :  { %3885 = vtanh.bf16 %v2657_v34  ;;  %v2491_v19 = vpop.f32.mrb[140].mxu1 }
 0x390   :  { %3887 = vtanh.bf16 %v2656_v23  ;;  %v2493_v28 = vpop.f32.mrb[141].mxu1  ;;  %v2492_v26 = vadd.f32 %v2491_v19, %v5729_v57 }
 0x391   :  { %v2495_v61 = vpop.f32.mrb[142].mxu1  ;;  %v2494_v46 = vadd.f32 %v2493_v28, %v5732_v18 }
 0x392   :  { %v3882_v55 = vpop.eup %3881  ;;  %v2496_v14 = vadd.f32 %v2495_v61, %v5729_v57  ;;  %v2497_v40 = vpop.f32.mrb[143].mxu1 }
 0x393   :  { %v3884_v45 = vpop.eup %3883  ;;  %v2498_v31 = vadd.f32 %v2497_v40, %v5732_v18  ;;  %3051 = vmatprep.mubr.bf16.mxu0 %v3882_v55 }
 0x394   :  { %v2658_v44 = vpack.c.bf16 %v2496_v14, %v2492_v26  ;;  %3052 = vmatmul.mubr.bf16.gmra.mrb[132].mxu0 %v3884_v45 }
 0x395   :  { %v2659_v59 = vpack.c.bf16 %v2498_v31, %v2494_v46 }
 0x397   :  { %3889 = vtanh.bf16 %v2659_v59  ;;  %v2501_v36 = vpop.f32.mrb[144].mxu1 }
 0x398   :  { %3891 = vtanh.bf16 %v2658_v44  ;;  %v2503_v13 = vpop.f32.mrb[145].mxu1  ;;  %v2502_v43 = vadd.f32 %v2501_v36, %v5729_v57 }
 0x399   :  { %v2505_v1 = vpop.f32.mrb[146].mxu1  ;;  %v2504_v0 = vadd.f32 %v2503_v13, %v5732_v18 }
 0x39a   :  { %v3886_v11 = vpop.eup %3885  ;;  %v2506_v37 = vadd.f32 %v2505_v1, %v5729_v57  ;;  %v2507_v3 = vpop.f32.mrb[147].mxu1 }
 0x39b   :  { %v3888_v58 = vpop.eup %3887  ;;  %v2508_v54 = vadd.f32 %v2507_v3, %v5732_v18  ;;  %3059 = vmatprep.mubr.bf16.mxu0 %v3886_v11 }
 0x39c   :  { %v2660_v39 = vpack.c.bf16 %v2506_v37, %v2502_v43  ;;  %3060 = vmatmul.mubr.bf16.gmra.mrb[136].mxu0 %v3888_v58 }
 0x39d   :  { %v2661_v52 = vpack.c.bf16 %v2508_v54, %v2504_v0 }
 0x39f   :  { %3893 = vtanh.bf16 %v2661_v52  ;;  %v2511_v6 = vpop.f32.mrb[148].mxu1 }
 0x3a0   :  { %3895 = vtanh.bf16 %v2660_v39  ;;  %v2513_v49 = vpop.f32.mrb[149].mxu1  ;;  %v2512_v51 = vadd.f32 %v2511_v6, %v5729_v57 }
 0x3a1   :  { %v2515_v47 = vpop.f32.mrb[150].mxu1  ;;  %v2514_v50 = vadd.f32 %v2513_v49, %v5732_v18 }
 0x3a2   :  { %v3890_v30 = vpop.eup %3889  ;;  %v2516_v4 = vadd.f32 %v2515_v47, %v5729_v57  ;;  %v2517_v12 = vpop.f32.mrb[151].mxu1 }
 0x3a3   :  { %v3892_v20 = vpop.eup %3891  ;;  %v2518_v62 = vadd.f32 %v2517_v12, %v5732_v18  ;;  %3067 = vmatprep.mubr.bf16.mxu0 %v3890_v30 }
 0x3a4   :  { %v2662_v5 = vpack.c.bf16 %v2516_v4, %v2512_v51  ;;  %3068 = vmatmul.mubr.bf16.gmra.mrb[140].mxu0 %v3892_v20 }
 0x3a5   :  { %v2663_v7 = vpack.c.bf16 %v2518_v62, %v2514_v50 }
 0x3a7   :  { %3897 = vtanh.bf16 %v2663_v7  ;;  %v2521_v9 = vpop.f32.mrb[152].mxu1 }
 0x3a8   :  { %3899 = vtanh.bf16 %v2662_v5  ;;  %v2523_v10 = vpop.f32.mrb[153].mxu1  ;;  %v2522_v24 = vadd.f32 %v2521_v9, %v5729_v57 }
 0x3a9   :  { %v2525_v29 = vpop.f32.mrb[154].mxu1  ;;  %v2524_v16 = vadd.f32 %v2523_v10, %v5732_v18 }
 0x3aa   :  { %v3894_v42 = vpop.eup %3893  ;;  %v2526_v48 = vadd.f32 %v2525_v29, %v5729_v57  ;;  %v2527_v60 = vpop.f32.mrb[155].mxu1 }
 0x3ab   :  { %v3896_v32 = vpop.eup %3895  ;;  %v2528_v53 = vadd.f32 %v2527_v60, %v5732_v18  ;;  %3075 = vmatprep.mubr.bf16.mxu0 %v3894_v42 }
 0x3ac   :  { %v2664_v17 = vpack.c.bf16 %v2526_v48, %v2522_v24  ;;  %3076 = vmatmul.mubr.bf16.gmra.mrb[144].mxu0 %v3896_v32 }
 0x3ad   :  { %v2665_v33 = vpack.c.bf16 %v2528_v53, %v2524_v16 }
 0x3af   :  { %3901 = vtanh.bf16 %v2665_v33  ;;  %v2531_v35 = vpop.f32.mrb[156].mxu1 }
 0x3b0   :  { %3903 = vtanh.bf16 %v2664_v17  ;;  %v2533_v25 = vpop.f32.mrb[157].mxu1  ;;  %v2532_v38 = vadd.f32 %v2531_v35, %v5729_v57 }
 0x3b1   :  { %v2535_v8 = vpop.f32.mrb[158].mxu1  ;;  %v2534_v2 = vadd.f32 %v2533_v25, %v5732_v18 }
 0x3b2   :  { %v3898_v27 = vpop.eup %3897  ;;  %v2536_v15 = vadd.f32 %v2535_v8, %v5729_v57  ;;  %v2537_v63 = vpop.f32.mrb[159].mxu1 }
 0x3b3   :  { %v3900_v56 = vpop.eup %3899  ;;  %v2538_v21 = vadd.f32 %v2537_v63, %v5732_v18  ;;  %3083 = vmatprep.mubr.bf16.mxu0 %v3898_v27 }
 0x3b4   :  { %v2666_v22 = vpack.c.bf16 %v2536_v15, %v2532_v38  ;;  %3084 = vmatmul.mubr.bf16.gmra.mrb[148].mxu0 %v3900_v56 }
 0x3b5   :  { %v2667_v41 = vpack.c.bf16 %v2538_v21, %v2534_v2 }
 0x3b7   :  { %3905 = vtanh.bf16 %v2667_v41  ;;  %v2541_v23 = vpop.f32.mrb[160].mxu1 }
 0x3b8   :  { %3907 = vtanh.bf16 %v2666_v22  ;;  %v2543_v34 = vpop.f32.mrb[161].mxu1  ;;  %v2542_v61 = vadd.f32 %v2541_v23, %v5729_v57  ;;  %v5856_v22 = vld [vmem:[%s5954_s8] ss:$0 sm:$0xff]  ;;  %s3994_s8 = smov [#allocation5]  }
 0x3b9   :  { %v2545_v19 = vpop.f32.mrb[162].mxu1  ;;  %v2544_v40 = vadd.f32 %v2543_v34, %v5732_v18  ;;  %s3241_s25 = sshll.u32 %s3994_s8, 4  ;;  %s3242_s25 = int_to_ptr.vmem [resolvable:$true] %s3241_s25 }
 0x3ba   :  { %v3902_v28 = vpop.eup %3901  ;;  %v2546_v55 = vadd.f32 %v2545_v19, %v5729_v57  ;;  %v2547_v26 = vpop.f32.mrb[163].mxu1  ;;  %s3963_s26 = scalar_lea.vmem %s3242_s25, 8192  ;;  %p3968_p9 = scmp.lt.s32.totalorder %s3242_s25, %s3242_s25 }
 0x3bb   :  { %v3904_v14 = vpop.eup %3903  ;;  %v2548_v45 = vadd.f32 %v2547_v26, %v5732_v18  ;;  %3091 = vmatprep.mubr.bf16.mxu0 %v3902_v28  ;;  %p3964_p8 = scmp.ne.s32.totalorder %s3242_s25, %s3963_s26  ;;  %p3969_p10 = scmp.lt.s32.totalorder %s3963_s26, %s3963_s26 }
 0x3bc   :  { %v2668_v46 = vpack.c.bf16 %v2546_v55, %v2542_v61  ;;  %3092 = vmatmul.mubr.bf16.gmra.mrb[152].mxu0 %v3904_v14 }
 0x3bd   :  { %v2669_v31 = vpack.c.bf16 %v2548_v45, %v2544_v40  ;;  %p3970_p11 = por %p3969_p10, %p3968_p9 }
 0x3bf   :  { %3909 = vtanh.bf16 %v2669_v31  ;;  %v2551_v44 = vpop.f32.mrb[164].mxu1  ;;  %p3971_p12 = pnand %p3970_p11, %p3964_p8 }
 0x3c0   :  { %3911 = vtanh.bf16 %v2668_v46  ;;  %v2553_v59 = vpop.f32.mrb[165].mxu1  ;;  %v2552_v1 = vadd.f32 %v2551_v44, %v5729_v57 }
 0x3c1   :  { %v2555_v36 = vpop.f32.mrb[166].mxu1  ;;  %v2554_v3 = vadd.f32 %v2553_v59, %v5732_v18 }
 0x3c2   :  { %v3906_v13 = vpop.eup %3905  ;;  %v2556_v11 = vadd.f32 %v2555_v36, %v5729_v57  ;;  %v2557_v43 = vpop.f32.mrb[167].mxu1 }
 0x3c3   :  { %v3908_v37 = vpop.eup %3907  ;;  %v2558_v58 = vadd.f32 %v2557_v43, %v5732_v18  ;;  %3099 = vmatprep.mubr.bf16.mxu0 %v3906_v13 }
 0x3c4   :  { %v2670_v0 = vpack.c.bf16 %v2556_v11, %v2552_v1  ;;  %3100 = vmatmul.mubr.bf16.gmra.mrb[156].mxu0 %v3908_v37 }
 0x3c5   :  { %v2671_v54 = vpack.c.bf16 %v2558_v58, %v2554_v3 }
 0x3c7   :  { %3913 = vtanh.bf16 %v2671_v54  ;;  %v2561_v39 = vpop.f32.mrb[168].mxu1 }
 0x3c8   :  { %3915 = vtanh.bf16 %v2670_v0  ;;  %v2563_v52 = vpop.f32.mrb[169].mxu1  ;;  %v2562_v47 = vadd.f32 %v2561_v39, %v5729_v57 }
 0x3c9   :  { %v2565_v6 = vpop.f32.mrb[170].mxu1  ;;  %v2564_v12 = vadd.f32 %v2563_v52, %v5732_v18 }
 0x3ca   :  { %v3910_v49 = vpop.eup %3909  ;;  %v2566_v30 = vadd.f32 %v2565_v6, %v5729_v57  ;;  %v2567_v51 = vpop.f32.mrb[171].mxu1 }
 0x3cb   :  { %v3912_v4 = vpop.eup %3911  ;;  %v2568_v20 = vadd.f32 %v2567_v51, %v5732_v18  ;;  %3107 = vmatprep.mubr.bf16.mxu0 %v3910_v49 }
 0x3cc   :  { %v2672_v50 = vpack.c.bf16 %v2566_v30, %v2562_v47  ;;  %3108 = vmatmul.mubr.bf16.gmra.mrb[160].mxu0 %v3912_v4 }
 0x3cd   :  { %v2673_v62 = vpack.c.bf16 %v2568_v20, %v2564_v12 }
 0x3cf   :  { %3917 = vtanh.bf16 %v2673_v62  ;;  %v2571_v5 = vpop.f32.mrb[172].mxu1 }
 0x3d0   :  { %3919 = vtanh.bf16 %v2672_v50  ;;  %v2573_v7 = vpop.f32.mrb[173].mxu1  ;;  %v2572_v29 = vadd.f32 %v2571_v5, %v5729_v57 }
 0x3d1   :  { %v2575_v9 = vpop.f32.mrb[174].mxu1  ;;  %v2574_v60 = vadd.f32 %v2573_v7, %v5732_v18 }
 0x3d2   :  { %v3914_v10 = vpop.eup %3913  ;;  %v2576_v42 = vadd.f32 %v2575_v9, %v5729_v57  ;;  %v2577_v24 = vpop.f32.mrb[175].mxu1 }
 0x3d3   :  { %v3916_v48 = vpop.eup %3915  ;;  %v2578_v32 = vadd.f32 %v2577_v24, %v5732_v18  ;;  %3115 = vmatprep.mubr.bf16.mxu0 %v3914_v10 }
 0x3d4   :  { %v2674_v16 = vpack.c.bf16 %v2576_v42, %v2572_v29  ;;  %3116 = vmatmul.mubr.bf16.gmra.mrb[164].mxu0 %v3916_v48 }
 0x3d5   :  { %v2675_v53 = vpack.c.bf16 %v2578_v32, %v2574_v60 }
 0x3d7   :  { %3921 = vtanh.bf16 %v2675_v53  ;;  %v2581_v17 = vpop.f32.mrb[176].mxu1 }
 0x3d8   :  { %3923 = vtanh.bf16 %v2674_v16  ;;  %v2583_v33 = vpop.f32.mrb[177].mxu1  ;;  %v2582_v8 = vadd.f32 %v2581_v17, %v5729_v57 }
 0x3d9   :  { %v2585_v35 = vpop.f32.mrb[178].mxu1  ;;  %v2584_v63 = vadd.f32 %v2583_v33, %v5732_v18 }
 0x3da   :  { %v3918_v25 = vpop.eup %3917  ;;  %v2586_v27 = vadd.f32 %v2585_v35, %v5729_v57  ;;  %v2587_v38 = vpop.f32.mrb[179].mxu1 }
 0x3db   :  { %v3920_v15 = vpop.eup %3919  ;;  %v2588_v56 = vadd.f32 %v2587_v38, %v5732_v18  ;;  %3123 = vmatprep.mubr.bf16.mxu0 %v3918_v25 }
 0x3dc   :  { %v2676_v2 = vpack.c.bf16 %v2586_v27, %v2582_v8  ;;  %3124 = vmatmul.mubr.bf16.gmra.mrb[168].mxu0 %v3920_v15 }
 0x3dd   :  { %v2677_v21 = vpack.c.bf16 %v2588_v56, %v2584_v63 }
 0x3df   :  { %3925 = vtanh.bf16 %v2677_v21  ;;  %v2591_v41 = vpop.f32.mrb[180].mxu1  ;;  %v2917_v23 = vpop.f32.mrb[64].mxu0 }
 0x3e0   :  { %3927 = vtanh.bf16 %v2676_v2  ;;  %v2918_v34 = vadd.f32 %v5856_v22, %v2917_v23  ;;  %v2593_v19 = vpop.f32.mrb[181].mxu1  ;;  %v2919_v28 = vpop.f32.mrb[65].mxu0  ;;  %v2592_v14 = vadd.f32 %v2591_v41, %v5729_v57 }
 0x3e1   :  { %v2595_v61 = vpop.f32.mrb[182].mxu1  ;;  %v2920_v55 = vpop.f32.mrb[66].mxu0  ;;  %v2594_v59 = vadd.f32 %v2593_v19, %v5732_v18 }
 0x3e2   :  { %v3922_v26 = vpop.eup %3921  ;;  %3172 = vst [vmem:[#allocation5] sm:$0xff] %v2918_v34  ;;  %v2596_v40 = vadd.f32 %v2595_v61, %v5729_v57  ;;  %v2921_v45 = vadd.f32 %v5856_v22, %v2920_v55  ;;  %v2597_v46 = vpop.f32.mrb[183].mxu1 }
 0x3e3   :  { %v2922_v31 = vpop.f32.mrb[67].mxu0  ;;  %v3924_v44 = vpop.eup %3923  ;;  %v2598_v36 = vadd.f32 %v2597_v46, %v5732_v18  ;;  %3131 = vmatprep.mubr.bf16.mxu0 %v3922_v26 }
 0x3e4   :  { %v2678_v13 = vpack.c.bf16 %v2596_v40, %v2592_v14  ;;  %3173 = vst [vmem:[#allocation5 + $0x8] sm:$0xff] %v2921_v45  ;;  %3132 = vmatmul.mubr.bf16.gmra.mrb[172].mxu0 %v3924_v44 }
 0x3e5   :  { %v2679_v1 = vpack.c.bf16 %v2598_v36, %v2594_v59 }
 0x3e7   :  { %3929 = vtanh.bf16 %v2679_v1  ;;  %v2601_v11 = vpop.f32.mrb[184].mxu1  ;;  %v2925_v43 = vpop.f32.mrb[68].mxu0 }
 0x3e8   :  { %3931 = vtanh.bf16 %v2678_v13  ;;  %v2926_v37 = vadd.f32 %v5856_v22, %v2925_v43  ;;  %v2603_v3 = vpop.f32.mrb[185].mxu1  ;;  %v2927_v58 = vpop.f32.mrb[69].mxu0  ;;  %v2602_v52 = vadd.f32 %v2601_v11, %v5729_v57 }
 0x3e9   :  { %v2605_v0 = vpop.f32.mrb[186].mxu1  ;;  %v2928_v54 = vpop.f32.mrb[70].mxu0  ;;  %v2604_v4 = vadd.f32 %v2603_v3, %v5732_v18 }
 0x3ea   :  { %v3926_v39 = vpop.eup %3925  ;;  %3174 = vst [vmem:[#allocation5 + $0x10] sm:$0xff] %v2926_v37  ;;  %v2606_v6 = vadd.f32 %v2605_v0, %v5729_v57  ;;  %v2929_v49 = vadd.f32 %v5856_v22, %v2928_v54  ;;  %v2607_v47 = vpop.f32.mrb[187].mxu1 }
 0x3eb   :  { %v2930_v30 = vpop.f32.mrb[71].mxu0  ;;  %v3928_v51 = vpop.eup %3927  ;;  %v2608_v12 = vadd.f32 %v2607_v47, %v5732_v18  ;;  %3139 = vmatprep.mubr.bf16.mxu0 %v3926_v39 }
 0x3ec   :  { %v2680_v20 = vpack.c.bf16 %v2606_v6, %v2602_v52  ;;  %3175 = vst [vmem:[#allocation5 + $0x18] sm:$0xff] %v2929_v49  ;;  %3140 = vmatmul.mubr.bf16.gmra.mrb[176].mxu0 %v3928_v51 }
 0x3ed   :  { %v2681_v50 = vpack.c.bf16 %v2608_v12, %v2604_v4 }
 0x3ef   :  { %3933 = vtanh.bf16 %v2681_v50  ;;  %v2611_v62 = vpop.f32.mrb[188].mxu1  ;;  %v2933_v5 = vpop.f32.mrb[72].mxu0 }
 0x3f0   :  { %3935 = vtanh.bf16 %v2680_v20  ;;  %v2934_v7 = vadd.f32 %v5856_v22, %v2933_v5  ;;  %v2613_v9 = vpop.f32.mrb[189].mxu1  ;;  %v2935_v10 = vpop.f32.mrb[73].mxu0  ;;  %v2612_v48 = vadd.f32 %v2611_v62, %v5729_v57 }
 0x3f1   :  { %v2615_v29 = vpop.f32.mrb[190].mxu1  ;;  %v2936_v42 = vpop.f32.mrb[74].mxu0  ;;  %v2614_v33 = vadd.f32 %v2613_v9, %v5732_v18 }
 0x3f2   :  { %v3930_v24 = vpop.eup %3929  ;;  %3176 = vst [vmem:[#allocation5 + $0x20] sm:$0xff] %v2934_v7  ;;  %v2616_v60 = vadd.f32 %v2615_v29, %v5729_v57  ;;  %v2937_v32 = vadd.f32 %v5856_v22, %v2936_v42  ;;  %v2617_v16 = vpop.f32.mrb[191].mxu1 }
 0x3f3   :  { %v2938_v53 = vpop.f32.mrb[75].mxu0  ;;  %v3932_v17 = vpop.eup %3931  ;;  %v2618_v35 = vadd.f32 %v2617_v16, %v5732_v18  ;;  %3147 = vmatprep.mubr.bf16.mxu0 %v3930_v24 }
 0x3f4   :  { %v2682_v25 = vpack.c.bf16 %v2616_v60, %v2612_v48  ;;  %3177 = vst [vmem:[#allocation5 + $0x28] sm:$0xff] %v2937_v32  ;;  %3148 = vmatmul.mubr.bf16.gmra.mrb[180].mxu0 %v3932_v17 }
 0x3f5   :  { %v2683_v8 = vpack.c.bf16 %v2618_v35, %v2614_v33 }
 0x3f7   :  { %3937 = vtanh.bf16 %v2683_v8  ;;  %v2941_v27 = vpop.f32.mrb[76].mxu0 }
 0x3f8   :  { %3939 = vtanh.bf16 %v2682_v25  ;;  %v2942_v38 = vadd.f32 %v5856_v22, %v2941_v27  ;;  %v2943_v57 = vpop.f32.mrb[77].mxu0 }
 0x3f9   :  { %v2944_v15 = vpop.f32.mrb[78].mxu0 }
 0x3fa   :  { %v3934_v63 = vpop.eup %3933  ;;  %3178 = vst [vmem:[#allocation5 + $0x30] sm:$0xff] %v2942_v38  ;;  %v2945_v56 = vadd.f32 %v5856_v22, %v2944_v15  ;;  %v2946_v2 = vpop.f32.mrb[79].mxu0 }
 0x3fb   :  { %v3936_v21 = vpop.eup %3935  ;;  %3155 = vmatprep.mubr.bf16.mxu0 %v3934_v63 }
 0x3fc   :  { %3179 = vst [vmem:[#allocation5 + $0x38] sm:$0xff] %v2945_v56  ;;  %3156 = vmatmul.mubr.bf16.gmra.mrb[184].mxu0 %v3936_v21 }
 0x3ff   :  { %v2949_v18 = vpop.f32.mrb[80].mxu0 }
 0x400   :  { %v2950_v41 = vadd.f32 %v5856_v22, %v2949_v18  ;;  %v2951_v23 = vpop.f32.mrb[81].mxu0 }
 0x401   :  { %v2952_v34 = vpop.f32.mrb[82].mxu0 }
 0x402   :  { %v3938_v19 = vpop.eup %3937  ;;  %3180 = vst [vmem:[#allocation5 + $0x40] sm:$0xff] %v2950_v41  ;;  %v2953_v28 = vadd.f32 %v5856_v22, %v2952_v34  ;;  %v2954_v61 = vpop.f32.mrb[83].mxu0 }
 0x403   :  { %v3940_v55 = vpop.eup %3939  ;;  %3163 = vmatprep.mubr.bf16.mxu0 %v3938_v19 }
 0x404   :  { %3181 = vst [vmem:[#allocation5 + $0x48] sm:$0xff] %v2953_v28  ;;  %3164 = vmatmul.mubr.bf16.gmra.mrb[188].mxu0 %v3940_v55 }
 0x407   :  { %v2957_v26 = vpop.f32.mrb[84].mxu0 }
 0x408   :  { %v2958_v14 = vadd.f32 %v5856_v22, %v2957_v26  ;;  %v2959_v40 = vpop.f32.mrb[85].mxu0 }
 0x409   :  { %v2960_v45 = vpop.f32.mrb[86].mxu0 }
 0x40a   :  { %3182 = vst [vmem:[#allocation5 + $0x50] sm:$0xff] %v2958_v14  ;;  %v2961_v46 = vadd.f32 %v5856_v22, %v2960_v45  ;;  %v2962_v31 = vpop.f32.mrb[87].mxu0 }
 0x40c   :  { %3183 = vst [vmem:[#allocation5 + $0x58] sm:$0xff] %v2961_v46 }
 0x40f   :  { %v2965_v44 = vpop.f32.mrb[88].mxu0 }
 0x410   :  { %v2966_v59 = vadd.f32 %v5856_v22, %v2965_v44  ;;  %v2967_v36 = vpop.f32.mrb[89].mxu0 }
 0x411   :  { %v2968_v13 = vpop.f32.mrb[90].mxu0 }
 0x412   :  { %3184 = vst [vmem:[#allocation5 + $0x60] sm:$0xff] %v2966_v59  ;;  %v2969_v1 = vadd.f32 %v5856_v22, %v2968_v13  ;;  %v2970_v11 = vpop.f32.mrb[91].mxu0 }
 0x414   :  { %3185 = vst [vmem:[#allocation5 + $0x68] sm:$0xff] %v2969_v1 }
 0x417   :  { %v2973_v43 = vpop.f32.mrb[92].mxu0 }
 0x418   :  { %v2974_v37 = vadd.f32 %v5856_v22, %v2973_v43  ;;  %v2975_v3 = vpop.f32.mrb[93].mxu0 }
 0x419   :  { %v2976_v58 = vpop.f32.mrb[94].mxu0 }
 0x41a   :  { %3186 = vst [vmem:[#allocation5 + $0x70] sm:$0xff] %v2974_v37  ;;  %v2977_v0 = vadd.f32 %v5856_v22, %v2976_v58  ;;  %v2978_v54 = vpop.f32.mrb[95].mxu0 }
 0x41c   :  { %3187 = vst [vmem:[#allocation5 + $0x78] sm:$0xff] %v2977_v0 }
 0x41f   :  { %v2981_v39 = vpop.f32.mrb[96].mxu0 }
 0x420   :  { %v2982_v52 = vadd.f32 %v5856_v22, %v2981_v39  ;;  %v2983_v6 = vpop.f32.mrb[97].mxu0 }
 0x421   :  { %v2984_v49 = vpop.f32.mrb[98].mxu0 }
 0x422   :  { %3188 = vst [vmem:[#allocation5 + $0x80] sm:$0xff] %v2982_v52  ;;  %v2985_v47 = vadd.f32 %v5856_v22, %v2984_v49  ;;  %v2986_v30 = vpop.f32.mrb[99].mxu0 }
 0x424   :  { %3189 = vst [vmem:[#allocation5 + $0x88] sm:$0xff] %v2985_v47 }
 0x427   :  { %v2989_v51 = vpop.f32.mrb[100].mxu0 }
 0x428   :  { %v2990_v4 = vadd.f32 %v5856_v22, %v2989_v51  ;;  %v2991_v12 = vpop.f32.mrb[101].mxu0 }
 0x429   :  { %v2992_v20 = vpop.f32.mrb[102].mxu0 }
 0x42a   :  { %3190 = vst [vmem:[#allocation5 + $0x90] sm:$0xff] %v2990_v4  ;;  %v2993_v50 = vadd.f32 %v5856_v22, %v2992_v20  ;;  %v2994_v62 = vpop.f32.mrb[103].mxu0 }
 0x42c   :  { %3191 = vst [vmem:[#allocation5 + $0x98] sm:$0xff] %v2993_v50 }
 0x42f   :  { %v2997_v5 = vpop.f32.mrb[104].mxu0 }
 0x430   :  { %v2998_v7 = vadd.f32 %v5856_v22, %v2997_v5  ;;  %v2999_v9 = vpop.f32.mrb[105].mxu0 }
 0x431   :  { %v3000_v10 = vpop.f32.mrb[106].mxu0 }
 0x432   :  { %3192 = vst [vmem:[#allocation5 + $0xa0] sm:$0xff] %v2998_v7  ;;  %v3001_v29 = vadd.f32 %v5856_v22, %v3000_v10  ;;  %v3002_v42 = vpop.f32.mrb[107].mxu0 }
 0x434   :  { %3193 = vst [vmem:[#allocation5 + $0xa8] sm:$0xff] %v3001_v29 }
 0x437   :  { %v3005_v24 = vpop.f32.mrb[108].mxu0 }
 0x438   :  { %v3006_v48 = vadd.f32 %v5856_v22, %v3005_v24  ;;  %v3007_v60 = vpop.f32.mrb[109].mxu0 }
 0x439   :  { %v3008_v32 = vpop.f32.mrb[110].mxu0 }
 0x43a   :  { %3194 = vst [vmem:[#allocation5 + $0xb0] sm:$0xff] %v3006_v48  ;;  %v3009_v16 = vadd.f32 %v5856_v22, %v3008_v32  ;;  %v3010_v53 = vpop.f32.mrb[111].mxu0 }
 0x43c   :  { %3195 = vst [vmem:[#allocation5 + $0xb8] sm:$0xff] %v3009_v16 }
 0x43f   :  { %v3013_v17 = vpop.f32.mrb[112].mxu0 }
 0x440   :  { %v3014_v33 = vadd.f32 %v5856_v22, %v3013_v17  ;;  %v3015_v35 = vpop.f32.mrb[113].mxu0 }
 0x441   :  { %v3016_v25 = vpop.f32.mrb[114].mxu0 }
 0x442   :  { %3196 = vst [vmem:[#allocation5 + $0xc0] sm:$0xff] %v3014_v33  ;;  %v3017_v8 = vadd.f32 %v5856_v22, %v3016_v25  ;;  %v3018_v27 = vpop.f32.mrb[115].mxu0 }
 0x444   :  { %3197 = vst [vmem:[#allocation5 + $0xc8] sm:$0xff] %v3017_v8 }
 0x447   :  { %v3021_v38 = vpop.f32.mrb[116].mxu0 }
 0x448   :  { %v3022_v57 = vadd.f32 %v5856_v22, %v3021_v38  ;;  %v3023_v15 = vpop.f32.mrb[117].mxu0 }
 0x449   :  { %v3024_v63 = vpop.f32.mrb[118].mxu0 }
 0x44a   :  { %3198 = vst [vmem:[#allocation5 + $0xd0] sm:$0xff] %v3022_v57  ;;  %v3025_v56 = vadd.f32 %v5856_v22, %v3024_v63  ;;  %v3026_v2 = vpop.f32.mrb[119].mxu0 }
 0x44c   :  { %3199 = vst [vmem:[#allocation5 + $0xd8] sm:$0xff] %v3025_v56 }
 0x44f   :  { %v3029_v21 = vpop.f32.mrb[120].mxu0 }
 0x450   :  { %v3030_v18 = vadd.f32 %v5856_v22, %v3029_v21  ;;  %v3031_v41 = vpop.f32.mrb[121].mxu0 }
 0x451   :  { %v3032_v23 = vpop.f32.mrb[122].mxu0 }
 0x452   :  { %3200 = vst [vmem:[#allocation5 + $0xe0] sm:$0xff] %v3030_v18  ;;  %v3033_v34 = vadd.f32 %v5856_v22, %v3032_v23  ;;  %v3034_v19 = vpop.f32.mrb[123].mxu0 }
 0x454   :  { %3201 = vst [vmem:[#allocation5 + $0xe8] sm:$0xff] %v3033_v34 }
 0x457   :  { %v3037_v28 = vpop.f32.mrb[124].mxu0 }
 0x458   :  { %v3038_v61 = vadd.f32 %v5856_v22, %v3037_v28  ;;  %v3039_v55 = vpop.f32.mrb[125].mxu0 }
 0x459   :  { %v3040_v26 = vpop.f32.mrb[126].mxu0 }
 0x45a   :  { %3202 = vst [vmem:[#allocation5 + $0xf0] sm:$0xff] %v3038_v61  ;;  %v3041_v14 = vadd.f32 %v5856_v22, %v3040_v26  ;;  %v3042_v40 = vpop.f32.mrb[127].mxu0 }
 0x45c   :  { %3203 = vst [vmem:[#allocation5 + $0xf8] sm:$0xff] %v3041_v14 }
 0x45f   :  { %v3045_v45 = vpop.f32.mrb[128].mxu0 }
 0x460   :  { %v3046_v46 = vadd.f32 %v5856_v22, %v3045_v45  ;;  %v3047_v31 = vpop.f32.mrb[129].mxu0 }
 0x461   :  { %v3048_v44 = vpop.f32.mrb[130].mxu0 }
 0x462   :  { %3204 = vst [vmem:[#allocation5 + $0x100] sm:$0xff] %v3046_v46  ;;  %v3049_v59 = vadd.f32 %v5856_v22, %v3048_v44  ;;  %v3050_v36 = vpop.f32.mrb[131].mxu0 }
 0x464   :  { %3205 = vst [vmem:[#allocation5 + $0x108] sm:$0xff] %v3049_v59 }
 0x467   :  { %v3053_v13 = vpop.f32.mrb[132].mxu0 }
 0x468   :  { %v3054_v1 = vadd.f32 %v5856_v22, %v3053_v13  ;;  %v3055_v11 = vpop.f32.mrb[133].mxu0 }
 0x469   :  { %v3056_v43 = vpop.f32.mrb[134].mxu0 }
 0x46a   :  { %3206 = vst [vmem:[#allocation5 + $0x110] sm:$0xff] %v3054_v1  ;;  %v3057_v37 = vadd.f32 %v5856_v22, %v3056_v43  ;;  %v3058_v3 = vpop.f32.mrb[135].mxu0 }
 0x46c   :  { %3207 = vst [vmem:[#allocation5 + $0x118] sm:$0xff] %v3057_v37 }
 0x46f   :  { %v3061_v58 = vpop.f32.mrb[136].mxu0 }
 0x470   :  { %v3062_v0 = vadd.f32 %v5856_v22, %v3061_v58  ;;  %v3063_v54 = vpop.f32.mrb[137].mxu0 }
 0x471   :  { %v3064_v39 = vpop.f32.mrb[138].mxu0 }
 0x472   :  { %3208 = vst [vmem:[#allocation5 + $0x120] sm:$0xff] %v3062_v0  ;;  %v3065_v52 = vadd.f32 %v5856_v22, %v3064_v39  ;;  %v3066_v6 = vpop.f32.mrb[139].mxu0 }
 0x474   :  { %3209 = vst [vmem:[#allocation5 + $0x128] sm:$0xff] %v3065_v52 }
 0x477   :  { %v3069_v49 = vpop.f32.mrb[140].mxu0 }
 0x478   :  { %v3070_v47 = vadd.f32 %v5856_v22, %v3069_v49  ;;  %v3071_v30 = vpop.f32.mrb[141].mxu0 }
 0x479   :  { %v3072_v51 = vpop.f32.mrb[142].mxu0 }
 0x47a   :  { %3210 = vst [vmem:[#allocation5 + $0x130] sm:$0xff] %v3070_v47  ;;  %v3073_v4 = vadd.f32 %v5856_v22, %v3072_v51  ;;  %v3074_v12 = vpop.f32.mrb[143].mxu0 }
 0x47c   :  { %3211 = vst [vmem:[#allocation5 + $0x138] sm:$0xff] %v3073_v4 }
 0x47f   :  { %v3077_v20 = vpop.f32.mrb[144].mxu0 }
 0x480   :  { %v3078_v50 = vadd.f32 %v5856_v22, %v3077_v20  ;;  %v3079_v62 = vpop.f32.mrb[145].mxu0 }
 0x481   :  { %v3080_v5 = vpop.f32.mrb[146].mxu0 }
 0x482   :  { %3212 = vst [vmem:[#allocation5 + $0x140] sm:$0xff] %v3078_v50  ;;  %v3081_v7 = vadd.f32 %v5856_v22, %v3080_v5  ;;  %v3082_v9 = vpop.f32.mrb[147].mxu0 }
 0x484   :  { %3213 = vst [vmem:[#allocation5 + $0x148] sm:$0xff] %v3081_v7 }
 0x487   :  { %v3085_v10 = vpop.f32.mrb[148].mxu0 }
 0x488   :  { %v3086_v29 = vadd.f32 %v5856_v22, %v3085_v10  ;;  %v3087_v42 = vpop.f32.mrb[149].mxu0 }
 0x489   :  { %v3088_v24 = vpop.f32.mrb[150].mxu0 }
 0x48a   :  { %3214 = vst [vmem:[#allocation5 + $0x150] sm:$0xff] %v3086_v29  ;;  %v3089_v48 = vadd.f32 %v5856_v22, %v3088_v24  ;;  %v3090_v60 = vpop.f32.mrb[151].mxu0 }
 0x48c   :  { %3215 = vst [vmem:[#allocation5 + $0x158] sm:$0xff] %v3089_v48 }
 0x48f   :  { %v3093_v32 = vpop.f32.mrb[152].mxu0 }
 0x490   :  { %v3094_v16 = vadd.f32 %v5856_v22, %v3093_v32  ;;  %v3095_v53 = vpop.f32.mrb[153].mxu0 }
 0x491   :  { %v3096_v17 = vpop.f32.mrb[154].mxu0 }
 0x492   :  { %3216 = vst [vmem:[#allocation5 + $0x160] sm:$0xff] %v3094_v16  ;;  %v3097_v33 = vadd.f32 %v5856_v22, %v3096_v17  ;;  %v3098_v35 = vpop.f32.mrb[155].mxu0 }
 0x494   :  { %3217 = vst [vmem:[#allocation5 + $0x168] sm:$0xff] %v3097_v33 }
 0x497   :  { %v3101_v25 = vpop.f32.mrb[156].mxu0 }
 0x498   :  { %v3102_v8 = vadd.f32 %v5856_v22, %v3101_v25  ;;  %v3103_v27 = vpop.f32.mrb[157].mxu0 }
 0x499   :  { %v3104_v38 = vpop.f32.mrb[158].mxu0 }
 0x49a   :  { %3218 = vst [vmem:[#allocation5 + $0x170] sm:$0xff] %v3102_v8  ;;  %v3105_v57 = vadd.f32 %v5856_v22, %v3104_v38  ;;  %v3106_v15 = vpop.f32.mrb[159].mxu0 }
 0x49c   :  { %3219 = vst [vmem:[#allocation5 + $0x178] sm:$0xff] %v3105_v57 }
 0x49f   :  { %v3109_v63 = vpop.f32.mrb[160].mxu0 }
 0x4a0   :  { %v3110_v56 = vadd.f32 %v5856_v22, %v3109_v63  ;;  %v3111_v2 = vpop.f32.mrb[161].mxu0 }
 0x4a1   :  { %v3112_v21 = vpop.f32.mrb[162].mxu0 }
 0x4a2   :  { %3220 = vst [vmem:[#allocation5 + $0x180] sm:$0xff] %v3110_v56  ;;  %v3113_v18 = vadd.f32 %v5856_v22, %v3112_v21  ;;  %v3114_v41 = vpop.f32.mrb[163].mxu0 }
 0x4a4   :  { %3221 = vst [vmem:[#allocation5 + $0x188] sm:$0xff] %v3113_v18 }
 0x4a7   :  { %v3117_v23 = vpop.f32.mrb[164].mxu0 }
 0x4a8   :  { %v3118_v34 = vadd.f32 %v5856_v22, %v3117_v23  ;;  %v3119_v19 = vpop.f32.mrb[165].mxu0 }
 0x4a9   :  { %v3120_v28 = vpop.f32.mrb[166].mxu0 }
 0x4aa   :  { %3222 = vst [vmem:[#allocation5 + $0x190] sm:$0xff] %v3118_v34  ;;  %v3121_v61 = vadd.f32 %v5856_v22, %v3120_v28  ;;  %v3122_v55 = vpop.f32.mrb[167].mxu0 }
 0x4ac   :  { %3223 = vst [vmem:[#allocation5 + $0x198] sm:$0xff] %v3121_v61 }
 0x4af   :  { %v3125_v26 = vpop.f32.mrb[168].mxu0 }
 0x4b0   :  { %v3126_v14 = vadd.f32 %v5856_v22, %v3125_v26  ;;  %v3127_v40 = vpop.f32.mrb[169].mxu0 }
 0x4b1   :  { %v3128_v45 = vpop.f32.mrb[170].mxu0 }
 0x4b2   :  { %3224 = vst [vmem:[#allocation5 + $0x1a0] sm:$0xff] %v3126_v14  ;;  %v3129_v46 = vadd.f32 %v5856_v22, %v3128_v45  ;;  %v3130_v31 = vpop.f32.mrb[171].mxu0 }
 0x4b4   :  { %3225 = vst [vmem:[#allocation5 + $0x1a8] sm:$0xff] %v3129_v46 }
 0x4b7   :  { %v3133_v44 = vpop.f32.mrb[172].mxu0 }
 0x4b8   :  { %v3134_v59 = vadd.f32 %v5856_v22, %v3133_v44  ;;  %v3135_v36 = vpop.f32.mrb[173].mxu0 }
 0x4b9   :  { %v3136_v13 = vpop.f32.mrb[174].mxu0 }
 0x4ba   :  { %3226 = vst [vmem:[#allocation5 + $0x1b0] sm:$0xff] %v3134_v59  ;;  %v3137_v1 = vadd.f32 %v5856_v22, %v3136_v13  ;;  %v3138_v11 = vpop.f32.mrb[175].mxu0 }
 0x4bc   :  { %3227 = vst [vmem:[#allocation5 + $0x1b8] sm:$0xff] %v3137_v1 }
 0x4bf   :  { %v3141_v43 = vpop.f32.mrb[176].mxu0 }
 0x4c0   :  { %v3142_v37 = vadd.f32 %v5856_v22, %v3141_v43  ;;  %v3143_v3 = vpop.f32.mrb[177].mxu0 }
 0x4c1   :  { %v3144_v58 = vpop.f32.mrb[178].mxu0 }
 0x4c2   :  { %3228 = vst [vmem:[#allocation5 + $0x1c0] sm:$0xff] %v3142_v37  ;;  %v3145_v0 = vadd.f32 %v5856_v22, %v3144_v58  ;;  %v3146_v54 = vpop.f32.mrb[179].mxu0 }
 0x4c4   :  { %3229 = vst [vmem:[#allocation5 + $0x1c8] sm:$0xff] %v3145_v0 }
 0x4c7   :  { %v3149_v39 = vpop.f32.mrb[180].mxu0 }
 0x4c8   :  { %v3150_v52 = vadd.f32 %v5856_v22, %v3149_v39  ;;  %v3151_v6 = vpop.f32.mrb[181].mxu0 }
 0x4c9   :  { %v3152_v49 = vpop.f32.mrb[182].mxu0 }
 0x4ca   :  { %3230 = vst [vmem:[#allocation5 + $0x1d0] sm:$0xff] %v3150_v52  ;;  %v3153_v47 = vadd.f32 %v5856_v22, %v3152_v49  ;;  %v3154_v30 = vpop.f32.mrb[183].mxu0 }
 0x4cc   :  { %3231 = vst [vmem:[#allocation5 + $0x1d8] sm:$0xff] %v3153_v47 }
 0x4cf   :  { %v3157_v51 = vpop.f32.mrb[184].mxu0 }
 0x4d0   :  { %v3158_v4 = vadd.f32 %v5856_v22, %v3157_v51  ;;  %v3159_v12 = vpop.f32.mrb[185].mxu0 }
 0x4d1   :  { %v3160_v20 = vpop.f32.mrb[186].mxu0 }
 0x4d2   :  { %3232 = vst [vmem:[#allocation5 + $0x1e0] sm:$0xff] %v3158_v4  ;;  %v3161_v50 = vadd.f32 %v5856_v22, %v3160_v20  ;;  %v3162_v62 = vpop.f32.mrb[187].mxu0 }
 0x4d4   :  { %3233 = vst [vmem:[#allocation5 + $0x1e8] sm:$0xff] %v3161_v50 }
 0x4d7   :  { %v3165_v5 = vpop.f32.mrb[188].mxu0 }
 0x4d8   :  { %v3166_v7 = vadd.f32 %v5856_v22, %v3165_v5  ;;  %v3167_v9 = vpop.f32.mrb[189].mxu0 }
 0x4d9   :  { %v3168_v10 = vpop.f32.mrb[190].mxu0 }
 0x4da   :  { %3234 = vst [vmem:[#allocation5 + $0x1f0] sm:$0xff] %v3166_v7  ;;  %v3169_v29 = vadd.f32 %v5856_v22, %v3168_v10  ;;  %v3170_v42 = vpop.f32.mrb[191].mxu0 }
 0x4dc   :  { %3235 = vst [vmem:[#allocation5 + $0x1f8] sm:$0xff] %v3169_v29 }
 0x4dd   :  { %3974 = shalt.err (!%p3971_p12)
}
 0x4de   :  { %s3975_s27 = scalar_lea.hbm %s5955_s9, 8192 }
 0x4df   :  { %p3976_p13 = scmp.ne.s32.totalorder %s5955_s9, %s3975_s27  ;;  %p3979_p0 = scmp.lt.u32.totalorder %s3975_s27, %s5955_s9 }
 0x4e1   :  { %p3981_p1 = pnand %p3979_p0, %p3976_p13 }
 0x4e3   :  { %3984 = shalt.err (!%p3981_p1)
}
 0x4e4   :  { %s3995_s30 = smov 128   ;;  %s3996_s10 = smov 8  }
 0x4e5   :  { %3247 = dma.vmem_to_hbm [thread:$0]  %s3242_s25, 8192, %s5955_s9, [#allocation4], %s3995_s30, %s3995_s30, %s3996_s10  }
 0x4e6   :  { %3987 = dma.done.wait [#allocation4], 8192  }
 0x4e7   :  { %3988 = vsyncadd [#allocation4], 4294959104 }
 0x4e8   :  { %3251 = vsyncpa [#allocation3], 1 }
 0x4e9   :  { %3252 = vsyncpa [#allocation4], 1 }

</bundles_post_ra>
